<compile_context>
chip_gen: v6e
topology: v6e:2x2x1
jax: 0.10.0
libtpu: 0.0.40
codegen_flags: <defaults>
</compile_context>

<pallas_src>
import numpy as np
import jax
import jax.numpy as jnp
from jax.experimental import pallas as pl
from jax.experimental.pallas import tpu as pltpu


# ----------------------------------------------------------------------------
# Host-side constant builders (tiny; computed once at trace time)
# ----------------------------------------------------------------------------
def _col_masks(W, n):
    # (2, n) float32 lane masks for the dx = -1 / +1 taps of a flattened (H, W) image:
    # row 0 = "left neighbour exists"  (c >= 1)
    # row 1 = "right neighbour exists" (c <= W-2)
    # Row (dy) boundaries are handled by the slice offsets + zero strips in the kernel,
    # so these are the only masks ever multiplied in (dx == 0 taps need no mask at all).
    c = np.arange(n) % W
    left = (c >= 1).astype(np.float32)
    right = (c <= W - 2).astype(np.float32)
    return jnp.asarray(np.stack([left, right], axis=0))


def _pool_select(H, W):
    # 0/1 selection matrix compacting the 2x2-window anchors of a flattened (H, W) image:
    # shape (H*W - W - 1, (H//2)*(W//2)); applied as an exact MXU matmul.
    Ho, Wo = H // 2, W // 2
    n_src = H * W - W - 1
    S = np.zeros((n_src, Ho * Wo), np.float32)
    for q in range(Ho * Wo):
        rq, cq = divmod(q, Wo)
        S[(2 * rq) * W + 2 * cq, q] = 1.0
    return jnp.asarray(S)


# ----------------------------------------------------------------------------
# In-kernel helper: conv3x3(pad=1, no bias) + folded BN + ReLU as one GEMM
# ----------------------------------------------------------------------------
def _conv3x3_bn_relu(x, col_masks, w2d, scale, shift, W, patches_ref):
    # x:          (Cin, n)      flattened image, spatial on lanes, n = H*W
    # col_masks:  (2, n)        [0]=left-valid, [1]=right-valid lane masks
    # w2d:        (Cout, 9*Cin) column order ((dy+1)*3 + (dx+1))*Cin + cin
    # scale/shift:(Cout, 1)     folded BatchNorm affine
    # patches_ref:(9*Cin, n)    VMEM scratch for the K = 9*Cin patch matrix
    cin, n = x.shape
    k = 0
    for dy in (-1, 0, 1):
        for dx in (-1, 0, 1):
            d = dy * W + dx
            rows = slice(k * cin, (k + 1) * cin)
            if dx == -1:
                cm = col_masks[0:1, :]
            elif dx == 1:
                cm = col_masks[1:2, :]
            else:
                cm = None
            if d >= 0:
                src = x[:, d:n]
                if cm is not None:
                    src = src * cm[:, 0:n - d]
                patches_ref[rows, 0:n - d] = src
                if d > 0:  # bottom-row taps: zero the (small) tail strip
                    patches_ref[rows, n - d:n] = jnp.zeros((cin, d), x.dtype)
            else:
                e = -d
                src = x[:, 0:n - e]
                if cm is not None:
                    src = src * cm[:, e:n]
                patches_ref[rows, 0:e] = jnp.zeros((cin, e), x.dtype)  # top-row strip
                patches_ref[rows, e:n] = src
            k += 1
    acc = jnp.dot(w2d, patches_ref[...], preferred_element_type=jnp.float32)  # (Cout, n)
    return jnp.maximum(acc * scale + shift, 0.0)


# ----------------------------------------------------------------------------
# Whole encoder as a single fused pallas_call
# ----------------------------------------------------------------------------
def encoder_forward(x_nchw, params):
    # x_nchw: (N, C0, H, W) float32.  Returns the list of per-stage feature maps (NCHW),
    # mirroring Encoder.forward.
    N, C0, H, W = x_nchw.shape
    S = len(params)
    dtype = x_nchw.dtype

    cins = [p[0]["w"].shape[2] for p in params]
    couts = [p[0]["w"].shape[3] for p in params]
    assert cins[0] == C0

    # Static per-stage (post-pool) geometry.
    dims = []
    h, w = H, W
    for s in range(S):
        if s > 0:
            assert h % 2 == 0 and w % 2 == 0, "MaxPool2d(2) needs even spatial dims"
            h, w = h // 2, w // 2
        dims.append((h, w))

    # ---- flat operand / spec lists ------------------------------------------------
    x_flat = x_nchw.reshape(N, C0, H * W)
    operands = [x_flat]
    in_specs = [pl.BlockSpec((1, C0, H * W), lambda n: (n, 0, 0))]

    def add_const(arr):
        operands.append(arr)
        in_specs.append(pl.BlockSpec(arr.shape, lambda n: (0, 0)))

    scratch_shapes = []
    for s, (p1, p2) in enumerate(params):
        hc, wc = dims[s]
        nc = hc * wc
        cin, cout = cins[s], couts[s]
        if s > 0:
            hp, wp = dims[s - 1]
            add_const(_pool_select(hp, wp))                               # (np-wp-1, nc)
        add_const(_col_masks(wc, nc))                                     # (2, nc)
        add_const(jnp.transpose(p1["w"], (3, 0, 1, 2)).reshape(cout, 9 * cin))
        add_const(p1["scale"].reshape(cout, 1))
        add_const(p1["shift"].reshape(cout, 1))
        add_const(jnp.transpose(p2["w"], (3, 0, 1, 2)).reshape(cout, 9 * cout))
        add_const(p2["scale"].reshape(cout, 1))
        add_const(p2["shift"].reshape(cout, 1))
        scratch_shapes.append(pltpu.VMEM((9 * cin, nc), jnp.float32))
        scratch_shapes.append(pltpu.VMEM((9 * cout, nc), jnp.float32))

    out_shape = tuple(
        jax.ShapeDtypeStruct((N, couts[s], dims[s][0] * dims[s][1]), dtype)
        for s in range(S))
    out_specs = tuple(
        pl.BlockSpec((1, couts[s], dims[s][0] * dims[s][1]), lambda n: (n, 0, 0))
        for s in range(S))

    n_in = len(operands)

    def kernel(*refs):
        in_refs = refs[:n_in]
        out_refs = refs[n_in:n_in + S]
        scratch = refs[n_in + S:]

        x = in_refs[0][0]                                                 # (C0, H*W)
        cur = 1
        w_prev = W
        for s in range(S):
            hc, wc = dims[s]
            if s > 0:
                sel = in_refs[cur][...]; cur += 1
                n_prev = x.shape[-1]
                # Fused 2x2/stride-2 max-pool: pairwise maxes over (row, row+1) then
                # (col, col+1), then compact the even/even anchors via a constant 0/1
                # selection matmul (MXU; no strided copies).
                v = jnp.maximum(x[:, 0:n_prev - w_prev], x[:, w_prev:n_prev])
                m = jnp.maximum(v[:, 0:n_prev - w_prev - 1], v[:, 1:n_prev - w_prev])
                x = jnp.dot(m, sel, preferred_element_type=jnp.float32)   # (Cin, hc*wc)
            cm = in_refs[cur][...]; cur += 1
            w1 = in_refs[cur][...]; s1 = in_refs[cur + 1][...]; b1 = in_refs[cur + 2][...]
            w2 = in_refs[cur + 3][...]; s2 = in_refs[cur + 4][...]; b2 = in_refs[cur + 5][...]
            cur += 6
            h1 = _conv3x3_bn_relu(x, cm, w1, s1, b1, wc, scratch[2 * s])
            x = _conv3x3_bn_relu(h1, cm, w2, s2, b2, wc, scratch[2 * s + 1])
            out_refs[s][0] = x.astype(out_refs[s].dtype)
            w_prev = wc

    outs = pl.pallas_call(
        kernel,
        out_shape=out_shape,
        grid=(N,),
        in_specs=in_specs,
        out_specs=out_specs,
        scratch_shapes=scratch_shapes,
        compiler_params=pltpu.CompilerParams(
            dimension_semantics=("parallel",),
            vmem_limit_bytes=64 * 1024 * 1024),
    )(*operands)

    return [o.reshape(N, couts[s], dims[s][0], dims[s][1]) for s, o in enumerate(outs)]


# ----------------------------------------------------------------------------
# Deterministic parameter initialization (synthetic, no checkpoint)
# ----------------------------------------------------------------------------
def _fold_bn(gamma, beta, mean, var, eps=1e-5):
    scale = gamma / jnp.sqrt(var + eps)
    return scale, beta - mean * scale


def _init_conv_bn(key, cin, cout):
    kw, kg, kb, km, kv = jax.random.split(key, 5)
    w = jax.random.normal(kw, (3, 3, cin, cout), jnp.float32) * jnp.sqrt(2.0 / (9 * cin))
    gamma = 1.0 + 0.1 * jax.random.normal(kg, (cout,), jnp.float32)
    beta = 0.1 * jax.random.normal(kb, (cout,), jnp.float32)
    mean = 0.1 * jax.random.normal(km, (cout,), jnp.float32)
    var = jnp.abs(jax.random.normal(kv, (cout,), jnp.float32)) + 0.5
    scale, shift = _fold_bn(gamma, beta, mean, var)
    return {"w": w, "scale": scale, "shift": shift}


def init_encoder_params(key, channels):
    params = []
    keys = jax.random.split(key, len(channels) - 1)
    for i in range(len(channels) - 1):
        k1, k2 = jax.random.split(keys[i])
        params.append((_init_conv_bn(k1, channels[i], channels[i + 1]),
                       _init_conv_bn(k2, channels[i + 1], channels[i + 1])))
    return params


# ----------------------------------------------------------------------------
# Pure-JAX reference (for correctness check)
# ----------------------------------------------------------------------------
def _ref_conv_bn_relu(x, w, scale, shift):
    y = jax.lax.conv_general_dilated(
        x, w, window_strides=(1, 1), padding=((1, 1), (1, 1)),
        dimension_numbers=("NHWC", "HWIO", "NHWC"))
    return jnp.maximum(y * scale + shift, 0.0)


def _ref_maxpool(x):
    return jax.lax.reduce_window(x, -jnp.inf, jax.lax.max,
                                 (1, 2, 2, 1), (1, 2, 2, 1), "VALID")


def _ref_encoder(x_nchw, params):
    x = jnp.transpose(x_nchw, (0, 2, 3, 1))

    def dc(x, p):
        x = _ref_conv_bn_relu(x, p[0]["w"], p[0]["scale"], p[0]["shift"])
        return _ref_conv_bn_relu(x, p[1]["w"], p[1]["scale"], p[1]["shift"])

    x = dc(x, params[0])
    outs = [x]
    for p in params[1:]:
        x = dc(_ref_maxpool(x), p)
        outs.append(x)
    return [jnp.transpose(o, (0, 3, 1, 2)) for o in outs]


# ----------------------------------------------------------------------------
if __name__ == "__main__":
    key = jax.random.PRNGKey(0)
    channels = [3, 8, 16, 32]
    kx, kp = jax.random.split(key)

    # NCHW input, matching the PyTorch module's convention.
    x = jax.random.normal(kx, (2, channels[0], 16, 16), jnp.float32)
    params = init_encoder_params(kp, channels)

    outs = encoder_forward(x, params)
    outs = [jax.block_until_ready(o) for o in outs]

    refs = _ref_encoder(x, params)
    expected_shapes = [(2, 8, 16, 16), (2, 16, 8, 8), (2, 32, 4, 4)]
    assert len(outs) == len(expected_shapes)
    for o, r, s in zip(outs, refs, expected_shapes):
        assert o.shape == s, (o.shape, s)
        assert jnp.allclose(o, r, atol=1e-2, rtol=1e-2), "mismatch vs reference"

    print("KERNEL_OK")
</pallas_src>

<mosaic_0001>
module attributes {stable_mosaic.version = 11 : i64} {
  func.func @kernel(%arg0: i32, %arg1: memref<1x3x256xf32, #tpu.memory_space<vmem>>, %arg2: memref<2x256xf32, #tpu.memory_space<vmem>>, %arg3: memref<8x27xf32, #tpu.memory_space<vmem>>, %arg4: memref<8x1xf32, #tpu.memory_space<vmem>>, %arg5: memref<8x1xf32, #tpu.memory_space<vmem>>, %arg6: memref<8x72xf32, #tpu.memory_space<vmem>>, %arg7: memref<8x1xf32, #tpu.memory_space<vmem>>, %arg8: memref<8x1xf32, #tpu.memory_space<vmem>>, %arg9: memref<239x64xf32, #tpu.memory_space<vmem>>, %arg10: memref<2x64xf32, #tpu.memory_space<vmem>>, %arg11: memref<16x72xf32, #tpu.memory_space<vmem>>, %arg12: memref<16x1xf32, #tpu.memory_space<vmem>>, %arg13: memref<16x1xf32, #tpu.memory_space<vmem>>, %arg14: memref<16x144xf32, #tpu.memory_space<vmem>>, %arg15: memref<16x1xf32, #tpu.memory_space<vmem>>, %arg16: memref<16x1xf32, #tpu.memory_space<vmem>>, %arg17: memref<55x16xf32, #tpu.memory_space<vmem>>, %arg18: memref<2x16xf32, #tpu.memory_space<vmem>>, %arg19: memref<32x144xf32, #tpu.memory_space<vmem>>, %arg20: memref<32x1xf32, #tpu.memory_space<vmem>>, %arg21: memref<32x1xf32, #tpu.memory_space<vmem>>, %arg22: memref<32x288xf32, #tpu.memory_space<vmem>>, %arg23: memref<32x1xf32, #tpu.memory_space<vmem>>, %arg24: memref<32x1xf32, #tpu.memory_space<vmem>>, %arg25: memref<1x8x256xf32, #tpu.memory_space<vmem>>, %arg26: memref<1x16x64xf32, #tpu.memory_space<vmem>>, %arg27: memref<1x32x16xf32, #tpu.memory_space<vmem>>, %arg28: memref<27x256xf32, #tpu.memory_space<vmem>>, %arg29: memref<72x256xf32, #tpu.memory_space<vmem>>, %arg30: memref<72x64xf32, #tpu.memory_space<vmem>>, %arg31: memref<144x64xf32, #tpu.memory_space<vmem>>, %arg32: memref<144x16xf32, #tpu.memory_space<vmem>>, %arg33: memref<288x16xf32, #tpu.memory_space<vmem>>) attributes {dimension_semantics = [#tpu.dimension_semantics<parallel>], iteration_bounds = array<i64: 2>, scalar_prefetch = 0 : i64, scratch_operands = 6 : i64, tpu.core_type = #tpu.core_type<tc>, window_params = [{transform_indices = @transform_0, window_bounds = array<i64: 1, 3, 256>}, {pipeline_mode = #tpu.pipeline_mode<synchronous>, transform_indices = @transform_1, window_bounds = array<i64: 2, 256>}, {pipeline_mode = #tpu.pipeline_mode<synchronous>, transform_indices = @transform_2, window_bounds = array<i64: 8, 27>}, {pipeline_mode = #tpu.pipeline_mode<synchronous>, transform_indices = @transform_3, window_bounds = array<i64: 8, 1>}, {pipeline_mode = #tpu.pipeline_mode<synchronous>, transform_indices = @transform_4, window_bounds = array<i64: 8, 1>}, {pipeline_mode = #tpu.pipeline_mode<synchronous>, transform_indices = @transform_5, window_bounds = array<i64: 8, 72>}, {pipeline_mode = #tpu.pipeline_mode<synchronous>, transform_indices = @transform_6, window_bounds = array<i64: 8, 1>}, {pipeline_mode = #tpu.pipeline_mode<synchronous>, transform_indices = @transform_7, window_bounds = array<i64: 8, 1>}, {pipeline_mode = #tpu.pipeline_mode<synchronous>, transform_indices = @transform_8, window_bounds = array<i64: 239, 64>}, {pipeline_mode = #tpu.pipeline_mode<synchronous>, transform_indices = @transform_9, window_bounds = array<i64: 2, 64>}, {pipeline_mode = #tpu.pipeline_mode<synchronous>, transform_indices = @transform_10, window_bounds = array<i64: 16, 72>}, {pipeline_mode = #tpu.pipeline_mode<synchronous>, transform_indices = @transform_11, window_bounds = array<i64: 16, 1>}, {pipeline_mode = #tpu.pipeline_mode<synchronous>, transform_indices = @transform_12, window_bounds = array<i64: 16, 1>}, {pipeline_mode = #tpu.pipeline_mode<synchronous>, transform_indices = @transform_13, window_bounds = array<i64: 16, 144>}, {pipeline_mode = #tpu.pipeline_mode<synchronous>, transform_indices = @transform_14, window_bounds = array<i64: 16, 1>}, {pipeline_mode = #tpu.pipeline_mode<synchronous>, transform_indices = @transform_15, window_bounds = array<i64: 16, 1>}, {pipeline_mode = #tpu.pipeline_mode<synchronous>, transform_indices = @transform_16, window_bounds = array<i64: 55, 16>}, {pipeline_mode = #tpu.pipeline_mode<synchronous>, transform_indices = @transform_17, window_bounds = array<i64: 2, 16>}, {pipeline_mode = #tpu.pipeline_mode<synchronous>, transform_indices = @transform_18, window_bounds = array<i64: 32, 144>}, {pipeline_mode = #tpu.pipeline_mode<synchronous>, transform_indices = @transform_19, window_bounds = array<i64: 32, 1>}, {pipeline_mode = #tpu.pipeline_mode<synchronous>, transform_indices = @transform_20, window_bounds = array<i64: 32, 1>}, {pipeline_mode = #tpu.pipeline_mode<synchronous>, transform_indices = @transform_21, window_bounds = array<i64: 32, 288>}, {pipeline_mode = #tpu.pipeline_mode<synchronous>, transform_indices = @transform_22, window_bounds = array<i64: 32, 1>}, {pipeline_mode = #tpu.pipeline_mode<synchronous>, transform_indices = @transform_23, window_bounds = array<i64: 32, 1>}, {transform_indices = @transform_24, window_bounds = array<i64: 1, 8, 256>}, {transform_indices = @transform_25, window_bounds = array<i64: 1, 16, 64>}, {transform_indices = @transform_26, window_bounds = array<i64: 1, 32, 16>}]} {
    %c0 = arith.constant 0 : index
    %c0_0 = arith.constant 0 : index
    %c0_1 = arith.constant 0 : index
    %0 = vector.load %arg1[%c0, %c0_0, %c0_1] : memref<1x3x256xf32, #tpu.memory_space<vmem>>, vector<1x3x256xf32>
    %1 = vector.shape_cast %0 : vector<1x3x256xf32> to vector<3x256xf32>
    %c0_2 = arith.constant 0 : index
    %c0_3 = arith.constant 0 : index
    %2 = vector.load %arg2[%c0_2, %c0_3] : memref<2x256xf32, #tpu.memory_space<vmem>>, vector<2x256xf32>
    %c0_4 = arith.constant 0 : index
    %c0_5 = arith.constant 0 : index
    %3 = vector.load %arg3[%c0_4, %c0_5] : memref<8x27xf32, #tpu.memory_space<vmem>>, vector<8x27xf32>
    %c0_6 = arith.constant 0 : index
    %c0_7 = arith.constant 0 : index
    %4 = vector.load %arg4[%c0_6, %c0_7] : memref<8x1xf32, #tpu.memory_space<vmem>>, vector<8x1xf32>
    %c0_8 = arith.constant 0 : index
    %c0_9 = arith.constant 0 : index
    %5 = vector.load %arg5[%c0_8, %c0_9] : memref<8x1xf32, #tpu.memory_space<vmem>>, vector<8x1xf32>
    %c0_10 = arith.constant 0 : index
    %c0_11 = arith.constant 0 : index
    %6 = vector.load %arg6[%c0_10, %c0_11] : memref<8x72xf32, #tpu.memory_space<vmem>>, vector<8x72xf32>
    %c0_12 = arith.constant 0 : index
    %c0_13 = arith.constant 0 : index
    %7 = vector.load %arg7[%c0_12, %c0_13] : memref<8x1xf32, #tpu.memory_space<vmem>>, vector<8x1xf32>
    %c0_14 = arith.constant 0 : index
    %c0_15 = arith.constant 0 : index
    %8 = vector.load %arg8[%c0_14, %c0_15] : memref<8x1xf32, #tpu.memory_space<vmem>>, vector<8x1xf32>
    %9 = vector.extract_strided_slice %2 {offsets = [0, 0], sizes = [1, 256], strides = [1, 1]} : vector<2x256xf32> to vector<1x256xf32>
    %10 = vector.extract_strided_slice %1 {offsets = [0, 0], sizes = [3, 239], strides = [1, 1]} : vector<3x256xf32> to vector<3x239xf32>
    %11 = vector.extract_strided_slice %9 {offsets = [0, 17], sizes = [1, 239], strides = [1, 1]} : vector<1x256xf32> to vector<1x239xf32>
    %12 = vector.broadcast %11 : vector<1x239xf32> to vector<3x239xf32>
    %13 = arith.mulf %10, %12 : vector<3x239xf32>
    %cst = arith.constant 0.000000e+00 : f32
    %14 = vector.broadcast %cst : f32 to vector<3x17xf32>
    %c0_16 = arith.constant 0 : index
    %c0_17 = arith.constant 0 : index
    %15 = vector.load %arg28[%c0_16, %c0_17] : memref<27x256xf32, #tpu.memory_space<vmem>>, vector<3x17xf32>
    tpu.vector_store %arg28[%c0_16, %c0_17], %14 {strides = array<i32>} : memref<27x256xf32, #tpu.memory_space<vmem>>, vector<3x17xf32>,
    %c0_18 = arith.constant 0 : index
    %c17 = arith.constant 17 : index
    %16 = vector.load %arg28[%c0_18, %c17] : memref<27x256xf32, #tpu.memory_space<vmem>>, vector<3x239xf32>
    tpu.vector_store %arg28[%c0_18, %c17], %13 {strides = array<i32>} : memref<27x256xf32, #tpu.memory_space<vmem>>, vector<3x239xf32>,
    %17 = vector.extract_strided_slice %1 {offsets = [0, 0], sizes = [3, 240], strides = [1, 1]} : vector<3x256xf32> to vector<3x240xf32>
    %cst_19 = arith.constant 0.000000e+00 : f32
    %18 = vector.broadcast %cst_19 : f32 to vector<3x16xf32>
    %c3 = arith.constant 3 : index
    %c0_20 = arith.constant 0 : index
    %19 = vector.load %arg28[%c3, %c0_20] : memref<27x256xf32, #tpu.memory_space<vmem>>, vector<3x16xf32>
    tpu.vector_store %arg28[%c3, %c0_20], %18 {strides = array<i32>} : memref<27x256xf32, #tpu.memory_space<vmem>>, vector<3x16xf32>,
    %c3_21 = arith.constant 3 : index
    %c16 = arith.constant 16 : index
    %20 = vector.load %arg28[%c3_21, %c16] : memref<27x256xf32, #tpu.memory_space<vmem>>, vector<3x240xf32>
    tpu.vector_store %arg28[%c3_21, %c16], %17 {strides = array<i32>} : memref<27x256xf32, #tpu.memory_space<vmem>>, vector<3x240xf32>,
    %21 = vector.extract_strided_slice %2 {offsets = [1, 0], sizes = [1, 256], strides = [1, 1]} : vector<2x256xf32> to vector<1x256xf32>
    %22 = vector.extract_strided_slice %1 {offsets = [0, 0], sizes = [3, 241], strides = [1, 1]} : vector<3x256xf32> to vector<3x241xf32>
    %23 = vector.extract_strided_slice %21 {offsets = [0, 15], sizes = [1, 241], strides = [1, 1]} : vector<1x256xf32> to vector<1x241xf32>
    %24 = vector.broadcast %23 : vector<1x241xf32> to vector<3x241xf32>
    %25 = arith.mulf %22, %24 : vector<3x241xf32>
    %cst_22 = arith.constant 0.000000e+00 : f32
    %26 = vector.broadcast %cst_22 : f32 to vector<3x15xf32>
    %c6 = arith.constant 6 : index
    %c0_23 = arith.constant 0 : index
    %27 = vector.load %arg28[%c6, %c0_23] : memref<27x256xf32, #tpu.memory_space<vmem>>, vector<3x15xf32>
    tpu.vector_store %arg28[%c6, %c0_23], %26 {strides = array<i32>} : memref<27x256xf32, #tpu.memory_space<vmem>>, vector<3x15xf32>,
    %c6_24 = arith.constant 6 : index
    %c15 = arith.constant 15 : index
    %28 = vector.load %arg28[%c6_24, %c15] : memref<27x256xf32, #tpu.memory_space<vmem>>, vector<3x241xf32>
    tpu.vector_store %arg28[%c6_24, %c15], %25 {strides = array<i32>} : memref<27x256xf32, #tpu.memory_space<vmem>>, vector<3x241xf32>,
    %29 = vector.extract_strided_slice %2 {offsets = [0, 0], sizes = [1, 256], strides = [1, 1]} : vector<2x256xf32> to vector<1x256xf32>
    %30 = vector.extract_strided_slice %1 {offsets = [0, 0], sizes = [3, 255], strides = [1, 1]} : vector<3x256xf32> to vector<3x255xf32>
    %31 = vector.extract_strided_slice %29 {offsets = [0, 1], sizes = [1, 255], strides = [1, 1]} : vector<1x256xf32> to vector<1x255xf32>
    %32 = vector.broadcast %31 : vector<1x255xf32> to vector<3x255xf32>
    %33 = arith.mulf %30, %32 : vector<3x255xf32>
    %cst_25 = arith.constant 0.000000e+00 : f32
    %34 = vector.broadcast %cst_25 : f32 to vector<3x1xf32>
    %c9 = arith.constant 9 : index
    %c0_26 = arith.constant 0 : index
    %35 = vector.load %arg28[%c9, %c0_26] : memref<27x256xf32, #tpu.memory_space<vmem>>, vector<3x1xf32>
    tpu.vector_store %arg28[%c9, %c0_26], %34 {strides = array<i32>} : memref<27x256xf32, #tpu.memory_space<vmem>>, vector<3x1xf32>,
    %c9_27 = arith.constant 9 : index
    %c1 = arith.constant 1 : index
    %36 = vector.load %arg28[%c9_27, %c1] : memref<27x256xf32, #tpu.memory_space<vmem>>, vector<3x255xf32>
    tpu.vector_store %arg28[%c9_27, %c1], %33 {strides = array<i32>} : memref<27x256xf32, #tpu.memory_space<vmem>>, vector<3x255xf32>,
    %c12 = arith.constant 12 : index
    %c0_28 = arith.constant 0 : index
    %37 = vector.load %arg28[%c12, %c0_28] : memref<27x256xf32, #tpu.memory_space<vmem>>, vector<3x256xf32>
    tpu.vector_store %arg28[%c12, %c0_28], %1 {strides = array<i32>} : memref<27x256xf32, #tpu.memory_space<vmem>>, vector<3x256xf32>,
    %38 = vector.extract_strided_slice %2 {offsets = [1, 0], sizes = [1, 256], strides = [1, 1]} : vector<2x256xf32> to vector<1x256xf32>
    %39 = vector.extract_strided_slice %1 {offsets = [0, 1], sizes = [3, 255], strides = [1, 1]} : vector<3x256xf32> to vector<3x255xf32>
    %40 = vector.extract_strided_slice %38 {offsets = [0, 0], sizes = [1, 255], strides = [1, 1]} : vector<1x256xf32> to vector<1x255xf32>
    %41 = vector.broadcast %40 : vector<1x255xf32> to vector<3x255xf32>
    %42 = arith.mulf %39, %41 : vector<3x255xf32>
    %c15_29 = arith.constant 15 : index
    %c0_30 = arith.constant 0 : index
    %43 = vector.load %arg28[%c15_29, %c0_30] : memref<27x256xf32, #tpu.memory_space<vmem>>, vector<3x255xf32>
    tpu.vector_store %arg28[%c15_29, %c0_30], %42 {strides = array<i32>} : memref<27x256xf32, #tpu.memory_space<vmem>>, vector<3x255xf32>,
    %cst_31 = arith.constant 0.000000e+00 : f32
    %44 = vector.broadcast %cst_31 : f32 to vector<3x1xf32>
    %c15_32 = arith.constant 15 : index
    %c255 = arith.constant 255 : index
    %45 = vector.load %arg28[%c15_32, %c255] : memref<27x256xf32, #tpu.memory_space<vmem>>, vector<3x1xf32>
    tpu.vector_store %arg28[%c15_32, %c255], %44 {strides = array<i32>} : memref<27x256xf32, #tpu.memory_space<vmem>>, vector<3x1xf32>,
    %46 = vector.extract_strided_slice %2 {offsets = [0, 0], sizes = [1, 256], strides = [1, 1]} : vector<2x256xf32> to vector<1x256xf32>
    %47 = vector.extract_strided_slice %1 {offsets = [0, 15], sizes = [3, 241], strides = [1, 1]} : vector<3x256xf32> to vector<3x241xf32>
    %48 = vector.extract_strided_slice %46 {offsets = [0, 0], sizes = [1, 241], strides = [1, 1]} : vector<1x256xf32> to vector<1x241xf32>
    %49 = vector.broadcast %48 : vector<1x241xf32> to vector<3x241xf32>
    %50 = arith.mulf %47, %49 : vector<3x241xf32>
    %c18 = arith.constant 18 : index
    %c0_33 = arith.constant 0 : index
    %51 = vector.load %arg28[%c18, %c0_33] : memref<27x256xf32, #tpu.memory_space<vmem>>, vector<3x241xf32>
    tpu.vector_store %arg28[%c18, %c0_33], %50 {strides = array<i32>} : memref<27x256xf32, #tpu.memory_space<vmem>>, vector<3x241xf32>,
    %cst_34 = arith.constant 0.000000e+00 : f32
    %52 = vector.broadcast %cst_34 : f32 to vector<3x15xf32>
    %c18_35 = arith.constant 18 : index
    %c241 = arith.constant 241 : index
    %53 = vector.load %arg28[%c18_35, %c241] : memref<27x256xf32, #tpu.memory_space<vmem>>, vector<3x15xf32>
    tpu.vector_store %arg28[%c18_35, %c241], %52 {strides = array<i32>} : memref<27x256xf32, #tpu.memory_space<vmem>>, vector<3x15xf32>,
    %54 = vector.extract_strided_slice %1 {offsets = [0, 16], sizes = [3, 240], strides = [1, 1]} : vector<3x256xf32> to vector<3x240xf32>
    %c21 = arith.constant 21 : index
    %c0_36 = arith.constant 0 : index
    %55 = vector.load %arg28[%c21, %c0_36] : memref<27x256xf32, #tpu.memory_space<vmem>>, vector<3x240xf32>
    tpu.vector_store %arg28[%c21, %c0_36], %54 {strides = array<i32>} : memref<27x256xf32, #tpu.memory_space<vmem>>, vector<3x240xf32>,
    %cst_37 = arith.constant 0.000000e+00 : f32
    %56 = vector.broadcast %cst_37 : f32 to vector<3x16xf32>
    %c21_38 = arith.constant 21 : index
    %c240 = arith.constant 240 : index
    %57 = vector.load %arg28[%c21_38, %c240] : memref<27x256xf32, #tpu.memory_space<vmem>>, vector<3x16xf32>
    tpu.vector_store %arg28[%c21_38, %c240], %56 {strides = array<i32>} : memref<27x256xf32, #tpu.memory_space<vmem>>, vector<3x16xf32>,
    %58 = vector.extract_strided_slice %2 {offsets = [1, 0], sizes = [1, 256], strides = [1, 1]} : vector<2x256xf32> to vector<1x256xf32>
    %59 = vector.extract_strided_slice %1 {offsets = [0, 17], sizes = [3, 239], strides = [1, 1]} : vector<3x256xf32> to vector<3x239xf32>
    %60 = vector.extract_strided_slice %58 {offsets = [0, 0], sizes = [1, 239], strides = [1, 1]} : vector<1x256xf32> to vector<1x239xf32>
    %61 = vector.broadcast %60 : vector<1x239xf32> to vector<3x239xf32>
    %62 = arith.mulf %59, %61 : vector<3x239xf32>
    %c24 = arith.constant 24 : index
    %c0_39 = arith.constant 0 : index
    %63 = vector.load %arg28[%c24, %c0_39] : memref<27x256xf32, #tpu.memory_space<vmem>>, vector<3x239xf32>
    tpu.vector_store %arg28[%c24, %c0_39], %62 {strides = array<i32>} : memref<27x256xf32, #tpu.memory_space<vmem>>, vector<3x239xf32>,
    %cst_40 = arith.constant 0.000000e+00 : f32
    %64 = vector.broadcast %cst_40 : f32 to vector<3x17xf32>
    %c24_41 = arith.constant 24 : index
    %c239 = arith.constant 239 : index
    %65 = vector.load %arg28[%c24_41, %c239] : memref<27x256xf32, #tpu.memory_space<vmem>>, vector<3x17xf32>
    tpu.vector_store %arg28[%c24_41, %c239], %64 {strides = array<i32>} : memref<27x256xf32, #tpu.memory_space<vmem>>, vector<3x17xf32>,
    %c0_42 = arith.constant 0 : index
    %c0_43 = arith.constant 0 : index
    %66 = vector.load %arg28[%c0_42, %c0_43] : memref<27x256xf32, #tpu.memory_space<vmem>>, vector<27x256xf32>
    %cst_44 = arith.constant dense<0.000000e+00> : vector<8x256xf32>
    %67 = tpu.matmul %3, %66, %cst_44 {dimension_numbers = #tpu.dot_dimension_numbers<[1], [0], [0], [1], [0, 0, 1, 1], [], []>} : vector<8x27xf32>, vector<27x256xf32>, vector<8x256xf32> -> vector<8x256xf32>
    %68 = vector.broadcast %4 : vector<8x1xf32> to vector<8x256xf32>
    %69 = arith.mulf %67, %68 : vector<8x256xf32>
    %70 = vector.broadcast %5 : vector<8x1xf32> to vector<8x256xf32>
    %71 = arith.addf %69, %70 : vector<8x256xf32>
    %cst_45 = arith.constant 0.000000e+00 : f32
    %72 = vector.broadcast %cst_45 : f32 to vector<8x256xf32>
    %73 = arith.maximumf %71, %72 : vector<8x256xf32>
    %74 = vector.extract_strided_slice %2 {offsets = [0, 0], sizes = [1, 256], strides = [1, 1]} : vector<2x256xf32> to vector<1x256xf32>
    %75 = vector.extract_strided_slice %73 {offsets = [0, 0], sizes = [8, 239], strides = [1, 1]} : vector<8x256xf32> to vector<8x239xf32>
    %76 = vector.extract_strided_slice %74 {offsets = [0, 17], sizes = [1, 239], strides = [1, 1]} : vector<1x256xf32> to vector<1x239xf32>
    %77 = vector.broadcast %76 : vector<1x239xf32> to vector<8x239xf32>
    %78 = arith.mulf %75, %77 : vector<8x239xf32>
    %cst_46 = arith.constant 0.000000e+00 : f32
    %79 = vector.broadcast %cst_46 : f32 to vector<8x17xf32>
    %c0_47 = arith.constant 0 : index
    %c0_48 = arith.constant 0 : index
    %80 = vector.load %arg29[%c0_47, %c0_48] : memref<72x256xf32, #tpu.memory_space<vmem>>, vector<8x17xf32>
    tpu.vector_store %arg29[%c0_47, %c0_48], %79 {strides = array<i32>} : memref<72x256xf32, #tpu.memory_space<vmem>>, vector<8x17xf32>,
    %c0_49 = arith.constant 0 : index
    %c17_50 = arith.constant 17 : index
    %81 = vector.load %arg29[%c0_49, %c17_50] : memref<72x256xf32, #tpu.memory_space<vmem>>, vector<8x239xf32>
    tpu.vector_store %arg29[%c0_49, %c17_50], %78 {strides = array<i32>} : memref<72x256xf32, #tpu.memory_space<vmem>>, vector<8x239xf32>,
    %82 = vector.extract_strided_slice %73 {offsets = [0, 0], sizes = [8, 240], strides = [1, 1]} : vector<8x256xf32> to vector<8x240xf32>
    %cst_51 = arith.constant 0.000000e+00 : f32
    %83 = vector.broadcast %cst_51 : f32 to vector<8x16xf32>
    %c8 = arith.constant 8 : index
    %c0_52 = arith.constant 0 : index
    %84 = vector.load %arg29[%c8, %c0_52] : memref<72x256xf32, #tpu.memory_space<vmem>>, vector<8x16xf32>
    tpu.vector_store %arg29[%c8, %c0_52], %83 {strides = array<i32>} : memref<72x256xf32, #tpu.memory_space<vmem>>, vector<8x16xf32>,
    %c8_53 = arith.constant 8 : index
    %c16_54 = arith.constant 16 : index
    %85 = vector.load %arg29[%c8_53, %c16_54] : memref<72x256xf32, #tpu.memory_space<vmem>>, vector<8x240xf32>
    tpu.vector_store %arg29[%c8_53, %c16_54], %82 {strides = array<i32>} : memref<72x256xf32, #tpu.memory_space<vmem>>, vector<8x240xf32>,
    %86 = vector.extract_strided_slice %2 {offsets = [1, 0], sizes = [1, 256], strides = [1, 1]} : vector<2x256xf32> to vector<1x256xf32>
    %87 = vector.extract_strided_slice %73 {offsets = [0, 0], sizes = [8, 241], strides = [1, 1]} : vector<8x256xf32> to vector<8x241xf32>
    %88 = vector.extract_strided_slice %86 {offsets = [0, 15], sizes = [1, 241], strides = [1, 1]} : vector<1x256xf32> to vector<1x241xf32>
    %89 = vector.broadcast %88 : vector<1x241xf32> to vector<8x241xf32>
    %90 = arith.mulf %87, %89 : vector<8x241xf32>
    %cst_55 = arith.constant 0.000000e+00 : f32
    %91 = vector.broadcast %cst_55 : f32 to vector<8x15xf32>
    %c16_56 = arith.constant 16 : index
    %c0_57 = arith.constant 0 : index
    %92 = vector.load %arg29[%c16_56, %c0_57] : memref<72x256xf32, #tpu.memory_space<vmem>>, vector<8x15xf32>
    tpu.vector_store %arg29[%c16_56, %c0_57], %91 {strides = array<i32>} : memref<72x256xf32, #tpu.memory_space<vmem>>, vector<8x15xf32>,
    %c16_58 = arith.constant 16 : index
    %c15_59 = arith.constant 15 : index
    %93 = vector.load %arg29[%c16_58, %c15_59] : memref<72x256xf32, #tpu.memory_space<vmem>>, vector<8x241xf32>
    tpu.vector_store %arg29[%c16_58, %c15_59], %90 {strides = array<i32>} : memref<72x256xf32, #tpu.memory_space<vmem>>, vector<8x241xf32>,
    %94 = vector.extract_strided_slice %2 {offsets = [0, 0], sizes = [1, 256], strides = [1, 1]} : vector<2x256xf32> to vector<1x256xf32>
    %95 = vector.extract_strided_slice %73 {offsets = [0, 0], sizes = [8, 255], strides = [1, 1]} : vector<8x256xf32> to vector<8x255xf32>
    %96 = vector.extract_strided_slice %94 {offsets = [0, 1], sizes = [1, 255], strides = [1, 1]} : vector<1x256xf32> to vector<1x255xf32>
    %97 = vector.broadcast %96 : vector<1x255xf32> to vector<8x255xf32>
    %98 = arith.mulf %95, %97 : vector<8x255xf32>
    %cst_60 = arith.constant 0.000000e+00 : f32
    %99 = vector.broadcast %cst_60 : f32 to vector<8x1xf32>
    %c24_61 = arith.constant 24 : index
    %c0_62 = arith.constant 0 : index
    %100 = vector.load %arg29[%c24_61, %c0_62] : memref<72x256xf32, #tpu.memory_space<vmem>>, vector<8x1xf32>
    tpu.vector_store %arg29[%c24_61, %c0_62], %99 {strides = array<i32>} : memref<72x256xf32, #tpu.memory_space<vmem>>, vector<8x1xf32>,
    %c24_63 = arith.constant 24 : index
    %c1_64 = arith.constant 1 : index
    %101 = vector.load %arg29[%c24_63, %c1_64] : memref<72x256xf32, #tpu.memory_space<vmem>>, vector<8x255xf32>
    tpu.vector_store %arg29[%c24_63, %c1_64], %98 {strides = array<i32>} : memref<72x256xf32, #tpu.memory_space<vmem>>, vector<8x255xf32>,
    %c32 = arith.constant 32 : index
    %c0_65 = arith.constant 0 : index
    %102 = vector.load %arg29[%c32, %c0_65] : memref<72x256xf32, #tpu.memory_space<vmem>>, vector<8x256xf32>
    tpu.vector_store %arg29[%c32, %c0_65], %73 {strides = array<i32>} : memref<72x256xf32, #tpu.memory_space<vmem>>, vector<8x256xf32>,
    %103 = vector.extract_strided_slice %2 {offsets = [1, 0], sizes = [1, 256], strides = [1, 1]} : vector<2x256xf32> to vector<1x256xf32>
    %104 = vector.extract_strided_slice %73 {offsets = [0, 1], sizes = [8, 255], strides = [1, 1]} : vector<8x256xf32> to vector<8x255xf32>
    %105 = vector.extract_strided_slice %103 {offsets = [0, 0], sizes = [1, 255], strides = [1, 1]} : vector<1x256xf32> to vector<1x255xf32>
    %106 = vector.broadcast %105 : vector<1x255xf32> to vector<8x255xf32>
    %107 = arith.mulf %104, %106 : vector<8x255xf32>
    %c40 = arith.constant 40 : index
    %c0_66 = arith.constant 0 : index
    %108 = vector.load %arg29[%c40, %c0_66] : memref<72x256xf32, #tpu.memory_space<vmem>>, vector<8x255xf32>
    tpu.vector_store %arg29[%c40, %c0_66], %107 {strides = array<i32>} : memref<72x256xf32, #tpu.memory_space<vmem>>, vector<8x255xf32>,
    %cst_67 = arith.constant 0.000000e+00 : f32
    %109 = vector.broadcast %cst_67 : f32 to vector<8x1xf32>
    %c40_68 = arith.constant 40 : index
    %c255_69 = arith.constant 255 : index
    %110 = vector.load %arg29[%c40_68, %c255_69] : memref<72x256xf32, #tpu.memory_space<vmem>>, vector<8x1xf32>
    tpu.vector_store %arg29[%c40_68, %c255_69], %109 {strides = array<i32>} : memref<72x256xf32, #tpu.memory_space<vmem>>, vector<8x1xf32>,
    %111 = vector.extract_strided_slice %2 {offsets = [0, 0], sizes = [1, 256], strides = [1, 1]} : vector<2x256xf32> to vector<1x256xf32>
    %112 = vector.extract_strided_slice %73 {offsets = [0, 15], sizes = [8, 241], strides = [1, 1]} : vector<8x256xf32> to vector<8x241xf32>
    %113 = vector.extract_strided_slice %111 {offsets = [0, 0], sizes = [1, 241], strides = [1, 1]} : vector<1x256xf32> to vector<1x241xf32>
    %114 = vector.broadcast %113 : vector<1x241xf32> to vector<8x241xf32>
    %115 = arith.mulf %112, %114 : vector<8x241xf32>
    %c48 = arith.constant 48 : index
    %c0_70 = arith.constant 0 : index
    %116 = vector.load %arg29[%c48, %c0_70] : memref<72x256xf32, #tpu.memory_space<vmem>>, vector<8x241xf32>
    tpu.vector_store %arg29[%c48, %c0_70], %115 {strides = array<i32>} : memref<72x256xf32, #tpu.memory_space<vmem>>, vector<8x241xf32>,
    %cst_71 = arith.constant 0.000000e+00 : f32
    %117 = vector.broadcast %cst_71 : f32 to vector<8x15xf32>
    %c48_72 = arith.constant 48 : index
    %c241_73 = arith.constant 241 : index
    %118 = vector.load %arg29[%c48_72, %c241_73] : memref<72x256xf32, #tpu.memory_space<vmem>>, vector<8x15xf32>
    tpu.vector_store %arg29[%c48_72, %c241_73], %117 {strides = array<i32>} : memref<72x256xf32, #tpu.memory_space<vmem>>, vector<8x15xf32>,
    %119 = vector.extract_strided_slice %73 {offsets = [0, 16], sizes = [8, 240], strides = [1, 1]} : vector<8x256xf32> to vector<8x240xf32>
    %c56 = arith.constant 56 : index
    %c0_74 = arith.constant 0 : index
    %120 = vector.load %arg29[%c56, %c0_74] : memref<72x256xf32, #tpu.memory_space<vmem>>, vector<8x240xf32>
    tpu.vector_store %arg29[%c56, %c0_74], %119 {strides = array<i32>} : memref<72x256xf32, #tpu.memory_space<vmem>>, vector<8x240xf32>,
    %cst_75 = arith.constant 0.000000e+00 : f32
    %121 = vector.broadcast %cst_75 : f32 to vector<8x16xf32>
    %c56_76 = arith.constant 56 : index
    %c240_77 = arith.constant 240 : index
    %122 = vector.load %arg29[%c56_76, %c240_77] : memref<72x256xf32, #tpu.memory_space<vmem>>, vector<8x16xf32>
    tpu.vector_store %arg29[%c56_76, %c240_77], %121 {strides = array<i32>} : memref<72x256xf32, #tpu.memory_space<vmem>>, vector<8x16xf32>,
    %123 = vector.extract_strided_slice %2 {offsets = [1, 0], sizes = [1, 256], strides = [1, 1]} : vector<2x256xf32> to vector<1x256xf32>
    %124 = vector.extract_strided_slice %73 {offsets = [0, 17], sizes = [8, 239], strides = [1, 1]} : vector<8x256xf32> to vector<8x239xf32>
    %125 = vector.extract_strided_slice %123 {offsets = [0, 0], sizes = [1, 239], strides = [1, 1]} : vector<1x256xf32> to vector<1x239xf32>
    %126 = vector.broadcast %125 : vector<1x239xf32> to vector<8x239xf32>
    %127 = arith.mulf %124, %126 : vector<8x239xf32>
    %c64 = arith.constant 64 : index
    %c0_78 = arith.constant 0 : index
    %128 = vector.load %arg29[%c64, %c0_78] : memref<72x256xf32, #tpu.memory_space<vmem>>, vector<8x239xf32>
    tpu.vector_store %arg29[%c64, %c0_78], %127 {strides = array<i32>} : memref<72x256xf32, #tpu.memory_space<vmem>>, vector<8x239xf32>,
    %cst_79 = arith.constant 0.000000e+00 : f32
    %129 = vector.broadcast %cst_79 : f32 to vector<8x17xf32>
    %c64_80 = arith.constant 64 : index
    %c239_81 = arith.constant 239 : index
    %130 = vector.load %arg29[%c64_80, %c239_81] : memref<72x256xf32, #tpu.memory_space<vmem>>, vector<8x17xf32>
    tpu.vector_store %arg29[%c64_80, %c239_81], %129 {strides = array<i32>} : memref<72x256xf32, #tpu.memory_space<vmem>>, vector<8x17xf32>,
    %c0_82 = arith.constant 0 : index
    %c0_83 = arith.constant 0 : index
    %131 = vector.load %arg29[%c0_82, %c0_83] : memref<72x256xf32, #tpu.memory_space<vmem>>, vector<72x256xf32>
    %cst_84 = arith.constant dense<0.000000e+00> : vector<8x256xf32>
    %132 = tpu.matmul %6, %131, %cst_84 {dimension_numbers = #tpu.dot_dimension_numbers<[1], [0], [0], [1], [0, 0, 1, 1], [], []>} : vector<8x72xf32>, vector<72x256xf32>, vector<8x256xf32> -> vector<8x256xf32>
    %133 = vector.broadcast %7 : vector<8x1xf32> to vector<8x256xf32>
    %134 = arith.mulf %132, %133 : vector<8x256xf32>
    %135 = vector.broadcast %8 : vector<8x1xf32> to vector<8x256xf32>
    %136 = arith.addf %134, %135 : vector<8x256xf32>
    %cst_85 = arith.constant 0.000000e+00 : f32
    %137 = vector.broadcast %cst_85 : f32 to vector<8x256xf32>
    %138 = arith.maximumf %136, %137 : vector<8x256xf32>
    %c0_86 = arith.constant 0 : index
    %c0_87 = arith.constant 0 : index
    %c0_88 = arith.constant 0 : index
    %139 = vector.load %arg25[%c0_86, %c0_87, %c0_88] : memref<1x8x256xf32, #tpu.memory_space<vmem>>, vector<1x8x256xf32>
    %140 = vector.shape_cast %139 : vector<1x8x256xf32> to vector<8x256xf32>
    %141 = vector.shape_cast %138 : vector<8x256xf32> to vector<1x8x256xf32>
    tpu.vector_store %arg25[%c0_86, %c0_87, %c0_88], %141 {strides = array<i32>} : memref<1x8x256xf32, #tpu.memory_space<vmem>>, vector<1x8x256xf32>,
    %c0_89 = arith.constant 0 : index
    %c0_90 = arith.constant 0 : index
    %142 = vector.load %arg9[%c0_89, %c0_90] : memref<239x64xf32, #tpu.memory_space<vmem>>, vector<239x64xf32>
    %143 = vector.extract_strided_slice %138 {offsets = [0, 0], sizes = [8, 240], strides = [1, 1]} : vector<8x256xf32> to vector<8x240xf32>
    %144 = vector.extract_strided_slice %138 {offsets = [0, 16], sizes = [8, 240], strides = [1, 1]} : vector<8x256xf32> to vector<8x240xf32>
    %145 = arith.maximumf %143, %144 : vector<8x240xf32>
    %146 = vector.extract_strided_slice %145 {offsets = [0, 0], sizes = [8, 239], strides = [1, 1]} : vector<8x240xf32> to vector<8x239xf32>
    %147 = vector.extract_strided_slice %145 {offsets = [0, 1], sizes = [8, 239], strides = [1, 1]} : vector<8x240xf32> to vector<8x239xf32>
    %148 = arith.maximumf %146, %147 : vector<8x239xf32>
    %cst_91 = arith.constant dense<0.000000e+00> : vector<8x64xf32>
    %149 = tpu.matmul %148, %142, %cst_91 {dimension_numbers = #tpu.dot_dimension_numbers<[1], [0], [0], [1], [0, 0, 1, 1], [], []>} : vector<8x239xf32>, vector<239x64xf32>, vector<8x64xf32> -> vector<8x64xf32>
    %c0_92 = arith.constant 0 : index
    %c0_93 = arith.constant 0 : index
    %150 = vector.load %arg10[%c0_92, %c0_93] : memref<2x64xf32, #tpu.memory_space<vmem>>, vector<2x64xf32>
    %c0_94 = arith.constant 0 : index
    %c0_95 = arith.constant 0 : index
    %151 = vector.load %arg11[%c0_94, %c0_95] : memref<16x72xf32, #tpu.memory_space<vmem>>, vector<16x72xf32>
    %c0_96 = arith.constant 0 : index
    %c0_97 = arith.constant 0 : index
    %152 = vector.load %arg12[%c0_96, %c0_97] : memref<16x1xf32, #tpu.memory_space<vmem>>, vector<16x1xf32>
    %c0_98 = arith.constant 0 : index
    %c0_99 = arith.constant 0 : index
    %153 = vector.load %arg13[%c0_98, %c0_99] : memref<16x1xf32, #tpu.memory_space<vmem>>, vector<16x1xf32>
    %c0_100 = arith.constant 0 : index
    %c0_101 = arith.constant 0 : index
    %154 = vector.load %arg14[%c0_100, %c0_101] : memref<16x144xf32, #tpu.memory_space<vmem>>, vector<16x144xf32>
    %c0_102 = arith.constant 0 : index
    %c0_103 = arith.constant 0 : index
    %155 = vector.load %arg15[%c0_102, %c0_103] : memref<16x1xf32, #tpu.memory_space<vmem>>, vector<16x1xf32>
    %c0_104 = arith.constant 0 : index
    %c0_105 = arith.constant 0 : index
    %156 = vector.load %arg16[%c0_104, %c0_105] : memref<16x1xf32, #tpu.memory_space<vmem>>, vector<16x1xf32>
    %157 = vector.extract_strided_slice %150 {offsets = [0, 0], sizes = [1, 64], strides = [1, 1]} : vector<2x64xf32> to vector<1x64xf32>
    %158 = vector.extract_strided_slice %149 {offsets = [0, 0], sizes = [8, 55], strides = [1, 1]} : vector<8x64xf32> to vector<8x55xf32>
    %159 = vector.extract_strided_slice %157 {offsets = [0, 9], sizes = [1, 55], strides = [1, 1]} : vector<1x64xf32> to vector<1x55xf32>
    %160 = vector.broadcast %159 : vector<1x55xf32> to vector<8x55xf32>
    %161 = arith.mulf %158, %160 : vector<8x55xf32>
    %cst_106 = arith.constant 0.000000e+00 : f32
    %162 = vector.broadcast %cst_106 : f32 to vector<8x9xf32>
    %c0_107 = arith.constant 0 : index
    %c0_108 = arith.constant 0 : index
    %163 = vector.load %arg30[%c0_107, %c0_108] : memref<72x64xf32, #tpu.memory_space<vmem>>, vector<8x9xf32>
    tpu.vector_store %arg30[%c0_107, %c0_108], %162 {strides = array<i32>} : memref<72x64xf32, #tpu.memory_space<vmem>>, vector<8x9xf32>,
    %c0_109 = arith.constant 0 : index
    %c9_110 = arith.constant 9 : index
    %164 = vector.load %arg30[%c0_109, %c9_110] : memref<72x64xf32, #tpu.memory_space<vmem>>, vector<8x55xf32>
    tpu.vector_store %arg30[%c0_109, %c9_110], %161 {strides = array<i32>} : memref<72x64xf32, #tpu.memory_space<vmem>>, vector<8x55xf32>,
    %165 = vector.extract_strided_slice %149 {offsets = [0, 0], sizes = [8, 56], strides = [1, 1]} : vector<8x64xf32> to vector<8x56xf32>
    %cst_111 = arith.constant 0.000000e+00 : f32
    %166 = vector.broadcast %cst_111 : f32 to vector<8x8xf32>
    %c8_112 = arith.constant 8 : index
    %c0_113 = arith.constant 0 : index
    %167 = vector.load %arg30[%c8_112, %c0_113] : memref<72x64xf32, #tpu.memory_space<vmem>>, vector<8x8xf32>
    tpu.vector_store %arg30[%c8_112, %c0_113], %166 {strides = array<i32>} : memref<72x64xf32, #tpu.memory_space<vmem>>, vector<8x8xf32>,
    %c8_114 = arith.constant 8 : index
    %c8_115 = arith.constant 8 : index
    %168 = vector.load %arg30[%c8_114, %c8_115] : memref<72x64xf32, #tpu.memory_space<vmem>>, vector<8x56xf32>
    tpu.vector_store %arg30[%c8_114, %c8_115], %165 {strides = array<i32>} : memref<72x64xf32, #tpu.memory_space<vmem>>, vector<8x56xf32>,
    %169 = vector.extract_strided_slice %150 {offsets = [1, 0], sizes = [1, 64], strides = [1, 1]} : vector<2x64xf32> to vector<1x64xf32>
    %170 = vector.extract_strided_slice %149 {offsets = [0, 0], sizes = [8, 57], strides = [1, 1]} : vector<8x64xf32> to vector<8x57xf32>
    %171 = vector.extract_strided_slice %169 {offsets = [0, 7], sizes = [1, 57], strides = [1, 1]} : vector<1x64xf32> to vector<1x57xf32>
    %172 = vector.broadcast %171 : vector<1x57xf32> to vector<8x57xf32>
    %173 = arith.mulf %170, %172 : vector<8x57xf32>
    %cst_116 = arith.constant 0.000000e+00 : f32
    %174 = vector.broadcast %cst_116 : f32 to vector<8x7xf32>
    %c16_117 = arith.constant 16 : index
    %c0_118 = arith.constant 0 : index
    %175 = vector.load %arg30[%c16_117, %c0_118] : memref<72x64xf32, #tpu.memory_space<vmem>>, vector<8x7xf32>
    tpu.vector_store %arg30[%c16_117, %c0_118], %174 {strides = array<i32>} : memref<72x64xf32, #tpu.memory_space<vmem>>, vector<8x7xf32>,
    %c16_119 = arith.constant 16 : index
    %c7 = arith.constant 7 : index
    %176 = vector.load %arg30[%c16_119, %c7] : memref<72x64xf32, #tpu.memory_space<vmem>>, vector<8x57xf32>
    tpu.vector_store %arg30[%c16_119, %c7], %173 {strides = array<i32>} : memref<72x64xf32, #tpu.memory_space<vmem>>, vector<8x57xf32>,
    %177 = vector.extract_strided_slice %150 {offsets = [0, 0], sizes = [1, 64], strides = [1, 1]} : vector<2x64xf32> to vector<1x64xf32>
    %178 = vector.extract_strided_slice %149 {offsets = [0, 0], sizes = [8, 63], strides = [1, 1]} : vector<8x64xf32> to vector<8x63xf32>
    %179 = vector.extract_strided_slice %177 {offsets = [0, 1], sizes = [1, 63], strides = [1, 1]} : vector<1x64xf32> to vector<1x63xf32>
    %180 = vector.broadcast %179 : vector<1x63xf32> to vector<8x63xf32>
    %181 = arith.mulf %178, %180 : vector<8x63xf32>
    %cst_120 = arith.constant 0.000000e+00 : f32
    %182 = vector.broadcast %cst_120 : f32 to vector<8x1xf32>
    %c24_121 = arith.constant 24 : index
    %c0_122 = arith.constant 0 : index
    %183 = vector.load %arg30[%c24_121, %c0_122] : memref<72x64xf32, #tpu.memory_space<vmem>>, vector<8x1xf32>
    tpu.vector_store %arg30[%c24_121, %c0_122], %182 {strides = array<i32>} : memref<72x64xf32, #tpu.memory_space<vmem>>, vector<8x1xf32>,
    %c24_123 = arith.constant 24 : index
    %c1_124 = arith.constant 1 : index
    %184 = vector.load %arg30[%c24_123, %c1_124] : memref<72x64xf32, #tpu.memory_space<vmem>>, vector<8x63xf32>
    tpu.vector_store %arg30[%c24_123, %c1_124], %181 {strides = array<i32>} : memref<72x64xf32, #tpu.memory_space<vmem>>, vector<8x63xf32>,
    %c32_125 = arith.constant 32 : index
    %c0_126 = arith.constant 0 : index
    %185 = vector.load %arg30[%c32_125, %c0_126] : memref<72x64xf32, #tpu.memory_space<vmem>>, vector<8x64xf32>
    tpu.vector_store %arg30[%c32_125, %c0_126], %149 {strides = array<i32>} : memref<72x64xf32, #tpu.memory_space<vmem>>, vector<8x64xf32>,
    %186 = vector.extract_strided_slice %150 {offsets = [1, 0], sizes = [1, 64], strides = [1, 1]} : vector<2x64xf32> to vector<1x64xf32>
    %187 = vector.extract_strided_slice %149 {offsets = [0, 1], sizes = [8, 63], strides = [1, 1]} : vector<8x64xf32> to vector<8x63xf32>
    %188 = vector.extract_strided_slice %186 {offsets = [0, 0], sizes = [1, 63], strides = [1, 1]} : vector<1x64xf32> to vector<1x63xf32>
    %189 = vector.broadcast %188 : vector<1x63xf32> to vector<8x63xf32>
    %190 = arith.mulf %187, %189 : vector<8x63xf32>
    %c40_127 = arith.constant 40 : index
    %c0_128 = arith.constant 0 : index
    %191 = vector.load %arg30[%c40_127, %c0_128] : memref<72x64xf32, #tpu.memory_space<vmem>>, vector<8x63xf32>
    tpu.vector_store %arg30[%c40_127, %c0_128], %190 {strides = array<i32>} : memref<72x64xf32, #tpu.memory_space<vmem>>, vector<8x63xf32>,
    %cst_129 = arith.constant 0.000000e+00 : f32
    %192 = vector.broadcast %cst_129 : f32 to vector<8x1xf32>
    %c40_130 = arith.constant 40 : index
    %c63 = arith.constant 63 : index
    %193 = vector.load %arg30[%c40_130, %c63] : memref<72x64xf32, #tpu.memory_space<vmem>>, vector<8x1xf32>
    tpu.vector_store %arg30[%c40_130, %c63], %192 {strides = array<i32>} : memref<72x64xf32, #tpu.memory_space<vmem>>, vector<8x1xf32>,
    %194 = vector.extract_strided_slice %150 {offsets = [0, 0], sizes = [1, 64], strides = [1, 1]} : vector<2x64xf32> to vector<1x64xf32>
    %195 = vector.extract_strided_slice %149 {offsets = [0, 7], sizes = [8, 57], strides = [1, 1]} : vector<8x64xf32> to vector<8x57xf32>
    %196 = vector.extract_strided_slice %194 {offsets = [0, 0], sizes = [1, 57], strides = [1, 1]} : vector<1x64xf32> to vector<1x57xf32>
    %197 = vector.broadcast %196 : vector<1x57xf32> to vector<8x57xf32>
    %198 = arith.mulf %195, %197 : vector<8x57xf32>
    %c48_131 = arith.constant 48 : index
    %c0_132 = arith.constant 0 : index
    %199 = vector.load %arg30[%c48_131, %c0_132] : memref<72x64xf32, #tpu.memory_space<vmem>>, vector<8x57xf32>
    tpu.vector_store %arg30[%c48_131, %c0_132], %198 {strides = array<i32>} : memref<72x64xf32, #tpu.memory_space<vmem>>, vector<8x57xf32>,
    %cst_133 = arith.constant 0.000000e+00 : f32
    %200 = vector.broadcast %cst_133 : f32 to vector<8x7xf32>
    %c48_134 = arith.constant 48 : index
    %c57 = arith.constant 57 : index
    %201 = vector.load %arg30[%c48_134, %c57] : memref<72x64xf32, #tpu.memory_space<vmem>>, vector<8x7xf32>
    tpu.vector_store %arg30[%c48_134, %c57], %200 {strides = array<i32>} : memref<72x64xf32, #tpu.memory_space<vmem>>, vector<8x7xf32>,
    %202 = vector.extract_strided_slice %149 {offsets = [0, 8], sizes = [8, 56], strides = [1, 1]} : vector<8x64xf32> to vector<8x56xf32>
    %c56_135 = arith.constant 56 : index
    %c0_136 = arith.constant 0 : index
    %203 = vector.load %arg30[%c56_135, %c0_136] : memref<72x64xf32, #tpu.memory_space<vmem>>, vector<8x56xf32>
    tpu.vector_store %arg30[%c56_135, %c0_136], %202 {strides = array<i32>} : memref<72x64xf32, #tpu.memory_space<vmem>>, vector<8x56xf32>,
    %cst_137 = arith.constant 0.000000e+00 : f32
    %204 = vector.broadcast %cst_137 : f32 to vector<8x8xf32>
    %c56_138 = arith.constant 56 : index
    %c56_139 = arith.constant 56 : index
    %205 = vector.load %arg30[%c56_138, %c56_139] : memref<72x64xf32, #tpu.memory_space<vmem>>, vector<8x8xf32>
    tpu.vector_store %arg30[%c56_138, %c56_139], %204 {strides = array<i32>} : memref<72x64xf32, #tpu.memory_space<vmem>>, vector<8x8xf32>,
    %206 = vector.extract_strided_slice %150 {offsets = [1, 0], sizes = [1, 64], strides = [1, 1]} : vector<2x64xf32> to vector<1x64xf32>
    %207 = vector.extract_strided_slice %149 {offsets = [0, 9], sizes = [8, 55], strides = [1, 1]} : vector<8x64xf32> to vector<8x55xf32>
    %208 = vector.extract_strided_slice %206 {offsets = [0, 0], sizes = [1, 55], strides = [1, 1]} : vector<1x64xf32> to vector<1x55xf32>
    %209 = vector.broadcast %208 : vector<1x55xf32> to vector<8x55xf32>
    %210 = arith.mulf %207, %209 : vector<8x55xf32>
    %c64_140 = arith.constant 64 : index
    %c0_141 = arith.constant 0 : index
    %211 = vector.load %arg30[%c64_140, %c0_141] : memref<72x64xf32, #tpu.memory_space<vmem>>, vector<8x55xf32>
    tpu.vector_store %arg30[%c64_140, %c0_141], %210 {strides = array<i32>} : memref<72x64xf32, #tpu.memory_space<vmem>>, vector<8x55xf32>,
    %cst_142 = arith.constant 0.000000e+00 : f32
    %212 = vector.broadcast %cst_142 : f32 to vector<8x9xf32>
    %c64_143 = arith.constant 64 : index
    %c55 = arith.constant 55 : index
    %213 = vector.load %arg30[%c64_143, %c55] : memref<72x64xf32, #tpu.memory_space<vmem>>, vector<8x9xf32>
    tpu.vector_store %arg30[%c64_143, %c55], %212 {strides = array<i32>} : memref<72x64xf32, #tpu.memory_space<vmem>>, vector<8x9xf32>,
    %c0_144 = arith.constant 0 : index
    %c0_145 = arith.constant 0 : index
    %214 = vector.load %arg30[%c0_144, %c0_145] : memref<72x64xf32, #tpu.memory_space<vmem>>, vector<72x64xf32>
    %cst_146 = arith.constant dense<0.000000e+00> : vector<16x64xf32>
    %215 = tpu.matmul %151, %214, %cst_146 {dimension_numbers = #tpu.dot_dimension_numbers<[1], [0], [0], [1], [0, 0, 1, 1], [], []>} : vector<16x72xf32>, vector<72x64xf32>, vector<16x64xf32> -> vector<16x64xf32>
    %216 = vector.broadcast %152 : vector<16x1xf32> to vector<16x64xf32>
    %217 = arith.mulf %215, %216 : vector<16x64xf32>
    %218 = vector.broadcast %153 : vector<16x1xf32> to vector<16x64xf32>
    %219 = arith.addf %217, %218 : vector<16x64xf32>
    %cst_147 = arith.constant 0.000000e+00 : f32
    %220 = vector.broadcast %cst_147 : f32 to vector<16x64xf32>
    %221 = arith.maximumf %219, %220 : vector<16x64xf32>
    %222 = vector.extract_strided_slice %150 {offsets = [0, 0], sizes = [1, 64], strides = [1, 1]} : vector<2x64xf32> to vector<1x64xf32>
    %223 = vector.extract_strided_slice %221 {offsets = [0, 0], sizes = [16, 55], strides = [1, 1]} : vector<16x64xf32> to vector<16x55xf32>
    %224 = vector.extract_strided_slice %222 {offsets = [0, 9], sizes = [1, 55], strides = [1, 1]} : vector<1x64xf32> to vector<1x55xf32>
    %225 = vector.broadcast %224 : vector<1x55xf32> to vector<16x55xf32>
    %226 = arith.mulf %223, %225 : vector<16x55xf32>
    %cst_148 = arith.constant 0.000000e+00 : f32
    %227 = vector.broadcast %cst_148 : f32 to vector<16x9xf32>
    %c0_149 = arith.constant 0 : index
    %c0_150 = arith.constant 0 : index
    %228 = vector.load %arg31[%c0_149, %c0_150] : memref<144x64xf32, #tpu.memory_space<vmem>>, vector<16x9xf32>
    tpu.vector_store %arg31[%c0_149, %c0_150], %227 {strides = array<i32>} : memref<144x64xf32, #tpu.memory_space<vmem>>, vector<16x9xf32>,
    %c0_151 = arith.constant 0 : index
    %c9_152 = arith.constant 9 : index
    %229 = vector.load %arg31[%c0_151, %c9_152] : memref<144x64xf32, #tpu.memory_space<vmem>>, vector<16x55xf32>
    tpu.vector_store %arg31[%c0_151, %c9_152], %226 {strides = array<i32>} : memref<144x64xf32, #tpu.memory_space<vmem>>, vector<16x55xf32>,
    %230 = vector.extract_strided_slice %221 {offsets = [0, 0], sizes = [16, 56], strides = [1, 1]} : vector<16x64xf32> to vector<16x56xf32>
    %cst_153 = arith.constant 0.000000e+00 : f32
    %231 = vector.broadcast %cst_153 : f32 to vector<16x8xf32>
    %c16_154 = arith.constant 16 : index
    %c0_155 = arith.constant 0 : index
    %232 = vector.load %arg31[%c16_154, %c0_155] : memref<144x64xf32, #tpu.memory_space<vmem>>, vector<16x8xf32>
    tpu.vector_store %arg31[%c16_154, %c0_155], %231 {strides = array<i32>} : memref<144x64xf32, #tpu.memory_space<vmem>>, vector<16x8xf32>,
    %c16_156 = arith.constant 16 : index
    %c8_157 = arith.constant 8 : index
    %233 = vector.load %arg31[%c16_156, %c8_157] : memref<144x64xf32, #tpu.memory_space<vmem>>, vector<16x56xf32>
    tpu.vector_store %arg31[%c16_156, %c8_157], %230 {strides = array<i32>} : memref<144x64xf32, #tpu.memory_space<vmem>>, vector<16x56xf32>,
    %234 = vector.extract_strided_slice %150 {offsets = [1, 0], sizes = [1, 64], strides = [1, 1]} : vector<2x64xf32> to vector<1x64xf32>
    %235 = vector.extract_strided_slice %221 {offsets = [0, 0], sizes = [16, 57], strides = [1, 1]} : vector<16x64xf32> to vector<16x57xf32>
    %236 = vector.extract_strided_slice %234 {offsets = [0, 7], sizes = [1, 57], strides = [1, 1]} : vector<1x64xf32> to vector<1x57xf32>
    %237 = vector.broadcast %236 : vector<1x57xf32> to vector<16x57xf32>
    %238 = arith.mulf %235, %237 : vector<16x57xf32>
    %cst_158 = arith.constant 0.000000e+00 : f32
    %239 = vector.broadcast %cst_158 : f32 to vector<16x7xf32>
    %c32_159 = arith.constant 32 : index
    %c0_160 = arith.constant 0 : index
    %240 = vector.load %arg31[%c32_159, %c0_160] : memref<144x64xf32, #tpu.memory_space<vmem>>, vector<16x7xf32>
    tpu.vector_store %arg31[%c32_159, %c0_160], %239 {strides = array<i32>} : memref<144x64xf32, #tpu.memory_space<vmem>>, vector<16x7xf32>,
    %c32_161 = arith.constant 32 : index
    %c7_162 = arith.constant 7 : index
    %241 = vector.load %arg31[%c32_161, %c7_162] : memref<144x64xf32, #tpu.memory_space<vmem>>, vector<16x57xf32>
    tpu.vector_store %arg31[%c32_161, %c7_162], %238 {strides = array<i32>} : memref<144x64xf32, #tpu.memory_space<vmem>>, vector<16x57xf32>,
    %242 = vector.extract_strided_slice %150 {offsets = [0, 0], sizes = [1, 64], strides = [1, 1]} : vector<2x64xf32> to vector<1x64xf32>
    %243 = vector.extract_strided_slice %221 {offsets = [0, 0], sizes = [16, 63], strides = [1, 1]} : vector<16x64xf32> to vector<16x63xf32>
    %244 = vector.extract_strided_slice %242 {offsets = [0, 1], sizes = [1, 63], strides = [1, 1]} : vector<1x64xf32> to vector<1x63xf32>
    %245 = vector.broadcast %244 : vector<1x63xf32> to vector<16x63xf32>
    %246 = arith.mulf %243, %245 : vector<16x63xf32>
    %cst_163 = arith.constant 0.000000e+00 : f32
    %247 = vector.broadcast %cst_163 : f32 to vector<16x1xf32>
    %c48_164 = arith.constant 48 : index
    %c0_165 = arith.constant 0 : index
    %248 = vector.load %arg31[%c48_164, %c0_165] : memref<144x64xf32, #tpu.memory_space<vmem>>, vector<16x1xf32>
    tpu.vector_store %arg31[%c48_164, %c0_165], %247 {strides = array<i32>} : memref<144x64xf32, #tpu.memory_space<vmem>>, vector<16x1xf32>,
    %c48_166 = arith.constant 48 : index
    %c1_167 = arith.constant 1 : index
    %249 = vector.load %arg31[%c48_166, %c1_167] : memref<144x64xf32, #tpu.memory_space<vmem>>, vector<16x63xf32>
    tpu.vector_store %arg31[%c48_166, %c1_167], %246 {strides = array<i32>} : memref<144x64xf32, #tpu.memory_space<vmem>>, vector<16x63xf32>,
    %c64_168 = arith.constant 64 : index
    %c0_169 = arith.constant 0 : index
    %250 = vector.load %arg31[%c64_168, %c0_169] : memref<144x64xf32, #tpu.memory_space<vmem>>, vector<16x64xf32>
    tpu.vector_store %arg31[%c64_168, %c0_169], %221 {strides = array<i32>} : memref<144x64xf32, #tpu.memory_space<vmem>>, vector<16x64xf32>,
    %251 = vector.extract_strided_slice %150 {offsets = [1, 0], sizes = [1, 64], strides = [1, 1]} : vector<2x64xf32> to vector<1x64xf32>
    %252 = vector.extract_strided_slice %221 {offsets = [0, 1], sizes = [16, 63], strides = [1, 1]} : vector<16x64xf32> to vector<16x63xf32>
    %253 = vector.extract_strided_slice %251 {offsets = [0, 0], sizes = [1, 63], strides = [1, 1]} : vector<1x64xf32> to vector<1x63xf32>
    %254 = vector.broadcast %253 : vector<1x63xf32> to vector<16x63xf32>
    %255 = arith.mulf %252, %254 : vector<16x63xf32>
    %c80 = arith.constant 80 : index
    %c0_170 = arith.constant 0 : index
    %256 = vector.load %arg31[%c80, %c0_170] : memref<144x64xf32, #tpu.memory_space<vmem>>, vector<16x63xf32>
    tpu.vector_store %arg31[%c80, %c0_170], %255 {strides = array<i32>} : memref<144x64xf32, #tpu.memory_space<vmem>>, vector<16x63xf32>,
    %cst_171 = arith.constant 0.000000e+00 : f32
    %257 = vector.broadcast %cst_171 : f32 to vector<16x1xf32>
    %c80_172 = arith.constant 80 : index
    %c63_173 = arith.constant 63 : index
    %258 = vector.load %arg31[%c80_172, %c63_173] : memref<144x64xf32, #tpu.memory_space<vmem>>, vector<16x1xf32>
    tpu.vector_store %arg31[%c80_172, %c63_173], %257 {strides = array<i32>} : memref<144x64xf32, #tpu.memory_space<vmem>>, vector<16x1xf32>,
    %259 = vector.extract_strided_slice %150 {offsets = [0, 0], sizes = [1, 64], strides = [1, 1]} : vector<2x64xf32> to vector<1x64xf32>
    %260 = vector.extract_strided_slice %221 {offsets = [0, 7], sizes = [16, 57], strides = [1, 1]} : vector<16x64xf32> to vector<16x57xf32>
    %261 = vector.extract_strided_slice %259 {offsets = [0, 0], sizes = [1, 57], strides = [1, 1]} : vector<1x64xf32> to vector<1x57xf32>
    %262 = vector.broadcast %261 : vector<1x57xf32> to vector<16x57xf32>
    %263 = arith.mulf %260, %262 : vector<16x57xf32>
    %c96 = arith.constant 96 : index
    %c0_174 = arith.constant 0 : index
    %264 = vector.load %arg31[%c96, %c0_174] : memref<144x64xf32, #tpu.memory_space<vmem>>, vector<16x57xf32>
    tpu.vector_store %arg31[%c96, %c0_174], %263 {strides = array<i32>} : memref<144x64xf32, #tpu.memory_space<vmem>>, vector<16x57xf32>,
    %cst_175 = arith.constant 0.000000e+00 : f32
    %265 = vector.broadcast %cst_175 : f32 to vector<16x7xf32>
    %c96_176 = arith.constant 96 : index
    %c57_177 = arith.constant 57 : index
    %266 = vector.load %arg31[%c96_176, %c57_177] : memref<144x64xf32, #tpu.memory_space<vmem>>, vector<16x7xf32>
    tpu.vector_store %arg31[%c96_176, %c57_177], %265 {strides = array<i32>} : memref<144x64xf32, #tpu.memory_space<vmem>>, vector<16x7xf32>,
    %267 = vector.extract_strided_slice %221 {offsets = [0, 8], sizes = [16, 56], strides = [1, 1]} : vector<16x64xf32> to vector<16x56xf32>
    %c112 = arith.constant 112 : index
    %c0_178 = arith.constant 0 : index
    %268 = vector.load %arg31[%c112, %c0_178] : memref<144x64xf32, #tpu.memory_space<vmem>>, vector<16x56xf32>
    tpu.vector_store %arg31[%c112, %c0_178], %267 {strides = array<i32>} : memref<144x64xf32, #tpu.memory_space<vmem>>, vector<16x56xf32>,
    %cst_179 = arith.constant 0.000000e+00 : f32
    %269 = vector.broadcast %cst_179 : f32 to vector<16x8xf32>
    %c112_180 = arith.constant 112 : index
    %c56_181 = arith.constant 56 : index
    %270 = vector.load %arg31[%c112_180, %c56_181] : memref<144x64xf32, #tpu.memory_space<vmem>>, vector<16x8xf32>
    tpu.vector_store %arg31[%c112_180, %c56_181], %269 {strides = array<i32>} : memref<144x64xf32, #tpu.memory_space<vmem>>, vector<16x8xf32>,
    %271 = vector.extract_strided_slice %150 {offsets = [1, 0], sizes = [1, 64], strides = [1, 1]} : vector<2x64xf32> to vector<1x64xf32>
    %272 = vector.extract_strided_slice %221 {offsets = [0, 9], sizes = [16, 55], strides = [1, 1]} : vector<16x64xf32> to vector<16x55xf32>
    %273 = vector.extract_strided_slice %271 {offsets = [0, 0], sizes = [1, 55], strides = [1, 1]} : vector<1x64xf32> to vector<1x55xf32>
    %274 = vector.broadcast %273 : vector<1x55xf32> to vector<16x55xf32>
    %275 = arith.mulf %272, %274 : vector<16x55xf32>
    %c128 = arith.constant 128 : index
    %c0_182 = arith.constant 0 : index
    %276 = vector.load %arg31[%c128, %c0_182] : memref<144x64xf32, #tpu.memory_space<vmem>>, vector<16x55xf32>
    tpu.vector_store %arg31[%c128, %c0_182], %275 {strides = array<i32>} : memref<144x64xf32, #tpu.memory_space<vmem>>, vector<16x55xf32>,
    %cst_183 = arith.constant 0.000000e+00 : f32
    %277 = vector.broadcast %cst_183 : f32 to vector<16x9xf32>
    %c128_184 = arith.constant 128 : index
    %c55_185 = arith.constant 55 : index
    %278 = vector.load %arg31[%c128_184, %c55_185] : memref<144x64xf32, #tpu.memory_space<vmem>>, vector<16x9xf32>
    tpu.vector_store %arg31[%c128_184, %c55_185], %277 {strides = array<i32>} : memref<144x64xf32, #tpu.memory_space<vmem>>, vector<16x9xf32>,
    %c0_186 = arith.constant 0 : index
    %c0_187 = arith.constant 0 : index
    %279 = vector.load %arg31[%c0_186, %c0_187] : memref<144x64xf32, #tpu.memory_space<vmem>>, vector<144x64xf32>
    %cst_188 = arith.constant dense<0.000000e+00> : vector<16x64xf32>
    %280 = tpu.matmul %154, %279, %cst_188 {dimension_numbers = #tpu.dot_dimension_numbers<[1], [0], [0], [1], [0, 0, 1, 1], [], []>} : vector<16x144xf32>, vector<144x64xf32>, vector<16x64xf32> -> vector<16x64xf32>
    %281 = vector.broadcast %155 : vector<16x1xf32> to vector<16x64xf32>
    %282 = arith.mulf %280, %281 : vector<16x64xf32>
    %283 = vector.broadcast %156 : vector<16x1xf32> to vector<16x64xf32>
    %284 = arith.addf %282, %283 : vector<16x64xf32>
    %cst_189 = arith.constant 0.000000e+00 : f32
    %285 = vector.broadcast %cst_189 : f32 to vector<16x64xf32>
    %286 = arith.maximumf %284, %285 : vector<16x64xf32>
    %c0_190 = arith.constant 0 : index
    %c0_191 = arith.constant 0 : index
    %c0_192 = arith.constant 0 : index
    %287 = vector.load %arg26[%c0_190, %c0_191, %c0_192] : memref<1x16x64xf32, #tpu.memory_space<vmem>>, vector<1x16x64xf32>
    %288 = vector.shape_cast %287 : vector<1x16x64xf32> to vector<16x64xf32>
    %289 = vector.shape_cast %286 : vector<16x64xf32> to vector<1x16x64xf32>
    tpu.vector_store %arg26[%c0_190, %c0_191, %c0_192], %289 {strides = array<i32>} : memref<1x16x64xf32, #tpu.memory_space<vmem>>, vector<1x16x64xf32>,
    %c0_193 = arith.constant 0 : index
    %c0_194 = arith.constant 0 : index
    %290 = vector.load %arg17[%c0_193, %c0_194] : memref<55x16xf32, #tpu.memory_space<vmem>>, vector<55x16xf32>
    %291 = vector.extract_strided_slice %286 {offsets = [0, 0], sizes = [16, 56], strides = [1, 1]} : vector<16x64xf32> to vector<16x56xf32>
    %292 = vector.extract_strided_slice %286 {offsets = [0, 8], sizes = [16, 56], strides = [1, 1]} : vector<16x64xf32> to vector<16x56xf32>
    %293 = arith.maximumf %291, %292 : vector<16x56xf32>
    %294 = vector.extract_strided_slice %293 {offsets = [0, 0], sizes = [16, 55], strides = [1, 1]} : vector<16x56xf32> to vector<16x55xf32>
    %295 = vector.extract_strided_slice %293 {offsets = [0, 1], sizes = [16, 55], strides = [1, 1]} : vector<16x56xf32> to vector<16x55xf32>
    %296 = arith.maximumf %294, %295 : vector<16x55xf32>
    %cst_195 = arith.constant dense<0.000000e+00> : vector<16x16xf32>
    %297 = tpu.matmul %296, %290, %cst_195 {dimension_numbers = #tpu.dot_dimension_numbers<[1], [0], [0], [1], [0, 0, 1, 1], [], []>} : vector<16x55xf32>, vector<55x16xf32>, vector<16x16xf32> -> vector<16x16xf32>
    %c0_196 = arith.constant 0 : index
    %c0_197 = arith.constant 0 : index
    %298 = vector.load %arg18[%c0_196, %c0_197] : memref<2x16xf32, #tpu.memory_space<vmem>>, vector<2x16xf32>
    %c0_198 = arith.constant 0 : index
    %c0_199 = arith.constant 0 : index
    %299 = vector.load %arg19[%c0_198, %c0_199] : memref<32x144xf32, #tpu.memory_space<vmem>>, vector<32x144xf32>
    %c0_200 = arith.constant 0 : index
    %c0_201 = arith.constant 0 : index
    %300 = vector.load %arg20[%c0_200, %c0_201] : memref<32x1xf32, #tpu.memory_space<vmem>>, vector<32x1xf32>
    %c0_202 = arith.constant 0 : index
    %c0_203 = arith.constant 0 : index
    %301 = vector.load %arg21[%c0_202, %c0_203] : memref<32x1xf32, #tpu.memory_space<vmem>>, vector<32x1xf32>
    %c0_204 = arith.constant 0 : index
    %c0_205 = arith.constant 0 : index
    %302 = vector.load %arg22[%c0_204, %c0_205] : memref<32x288xf32, #tpu.memory_space<vmem>>, vector<32x288xf32>
    %c0_206 = arith.constant 0 : index
    %c0_207 = arith.constant 0 : index
    %303 = vector.load %arg23[%c0_206, %c0_207] : memref<32x1xf32, #tpu.memory_space<vmem>>, vector<32x1xf32>
    %c0_208 = arith.constant 0 : index
    %c0_209 = arith.constant 0 : index
    %304 = vector.load %arg24[%c0_208, %c0_209] : memref<32x1xf32, #tpu.memory_space<vmem>>, vector<32x1xf32>
    %305 = vector.extract_strided_slice %298 {offsets = [0, 0], sizes = [1, 16], strides = [1, 1]} : vector<2x16xf32> to vector<1x16xf32>
    %306 = vector.extract_strided_slice %297 {offsets = [0, 0], sizes = [16, 11], strides = [1, 1]} : vector<16x16xf32> to vector<16x11xf32>
    %307 = vector.extract_strided_slice %305 {offsets = [0, 5], sizes = [1, 11], strides = [1, 1]} : vector<1x16xf32> to vector<1x11xf32>
    %308 = vector.broadcast %307 : vector<1x11xf32> to vector<16x11xf32>
    %309 = arith.mulf %306, %308 : vector<16x11xf32>
    %cst_210 = arith.constant 0.000000e+00 : f32
    %310 = vector.broadcast %cst_210 : f32 to vector<16x5xf32>
    %c0_211 = arith.constant 0 : index
    %c0_212 = arith.constant 0 : index
    %311 = vector.load %arg32[%c0_211, %c0_212] : memref<144x16xf32, #tpu.memory_space<vmem>>, vector<16x5xf32>
    tpu.vector_store %arg32[%c0_211, %c0_212], %310 {strides = array<i32>} : memref<144x16xf32, #tpu.memory_space<vmem>>, vector<16x5xf32>,
    %c0_213 = arith.constant 0 : index
    %c5 = arith.constant 5 : index
    %312 = vector.load %arg32[%c0_213, %c5] : memref<144x16xf32, #tpu.memory_space<vmem>>, vector<16x11xf32>
    tpu.vector_store %arg32[%c0_213, %c5], %309 {strides = array<i32>} : memref<144x16xf32, #tpu.memory_space<vmem>>, vector<16x11xf32>,
    %313 = vector.extract_strided_slice %297 {offsets = [0, 0], sizes = [16, 12], strides = [1, 1]} : vector<16x16xf32> to vector<16x12xf32>
    %cst_214 = arith.constant 0.000000e+00 : f32
    %314 = vector.broadcast %cst_214 : f32 to vector<16x4xf32>
    %c16_215 = arith.constant 16 : index
    %c0_216 = arith.constant 0 : index
    %315 = vector.load %arg32[%c16_215, %c0_216] : memref<144x16xf32, #tpu.memory_space<vmem>>, vector<16x4xf32>
    tpu.vector_store %arg32[%c16_215, %c0_216], %314 {strides = array<i32>} : memref<144x16xf32, #tpu.memory_space<vmem>>, vector<16x4xf32>,
    %c16_217 = arith.constant 16 : index
    %c4 = arith.constant 4 : index
    %316 = vector.load %arg32[%c16_217, %c4] : memref<144x16xf32, #tpu.memory_space<vmem>>, vector<16x12xf32>
    tpu.vector_store %arg32[%c16_217, %c4], %313 {strides = array<i32>} : memref<144x16xf32, #tpu.memory_space<vmem>>, vector<16x12xf32>,
    %317 = vector.extract_strided_slice %298 {offsets = [1, 0], sizes = [1, 16], strides = [1, 1]} : vector<2x16xf32> to vector<1x16xf32>
    %318 = vector.extract_strided_slice %297 {offsets = [0, 0], sizes = [16, 13], strides = [1, 1]} : vector<16x16xf32> to vector<16x13xf32>
    %319 = vector.extract_strided_slice %317 {offsets = [0, 3], sizes = [1, 13], strides = [1, 1]} : vector<1x16xf32> to vector<1x13xf32>
    %320 = vector.broadcast %319 : vector<1x13xf32> to vector<16x13xf32>
    %321 = arith.mulf %318, %320 : vector<16x13xf32>
    %cst_218 = arith.constant 0.000000e+00 : f32
    %322 = vector.broadcast %cst_218 : f32 to vector<16x3xf32>
    %c32_219 = arith.constant 32 : index
    %c0_220 = arith.constant 0 : index
    %323 = vector.load %arg32[%c32_219, %c0_220] : memref<144x16xf32, #tpu.memory_space<vmem>>, vector<16x3xf32>
    tpu.vector_store %arg32[%c32_219, %c0_220], %322 {strides = array<i32>} : memref<144x16xf32, #tpu.memory_space<vmem>>, vector<16x3xf32>,
    %c32_221 = arith.constant 32 : index
    %c3_222 = arith.constant 3 : index
    %324 = vector.load %arg32[%c32_221, %c3_222] : memref<144x16xf32, #tpu.memory_space<vmem>>, vector<16x13xf32>
    tpu.vector_store %arg32[%c32_221, %c3_222], %321 {strides = array<i32>} : memref<144x16xf32, #tpu.memory_space<vmem>>, vector<16x13xf32>,
    %325 = vector.extract_strided_slice %298 {offsets = [0, 0], sizes = [1, 16], strides = [1, 1]} : vector<2x16xf32> to vector<1x16xf32>
    %326 = vector.extract_strided_slice %297 {offsets = [0, 0], sizes = [16, 15], strides = [1, 1]} : vector<16x16xf32> to vector<16x15xf32>
    %327 = vector.extract_strided_slice %325 {offsets = [0, 1], sizes = [1, 15], strides = [1, 1]} : vector<1x16xf32> to vector<1x15xf32>
    %328 = vector.broadcast %327 : vector<1x15xf32> to vector<16x15xf32>
    %329 = arith.mulf %326, %328 : vector<16x15xf32>
    %cst_223 = arith.constant 0.000000e+00 : f32
    %330 = vector.broadcast %cst_223 : f32 to vector<16x1xf32>
    %c48_224 = arith.constant 48 : index
    %c0_225 = arith.constant 0 : index
    %331 = vector.load %arg32[%c48_224, %c0_225] : memref<144x16xf32, #tpu.memory_space<vmem>>, vector<16x1xf32>
    tpu.vector_store %arg32[%c48_224, %c0_225], %330 {strides = array<i32>} : memref<144x16xf32, #tpu.memory_space<vmem>>, vector<16x1xf32>,
    %c48_226 = arith.constant 48 : index
    %c1_227 = arith.constant 1 : index
    %332 = vector.load %arg32[%c48_226, %c1_227] : memref<144x16xf32, #tpu.memory_space<vmem>>, vector<16x15xf32>
    tpu.vector_store %arg32[%c48_226, %c1_227], %329 {strides = array<i32>} : memref<144x16xf32, #tpu.memory_space<vmem>>, vector<16x15xf32>,
    %c64_228 = arith.constant 64 : index
    %c0_229 = arith.constant 0 : index
    %333 = vector.load %arg32[%c64_228, %c0_229] : memref<144x16xf32, #tpu.memory_space<vmem>>, vector<16x16xf32>
    tpu.vector_store %arg32[%c64_228, %c0_229], %297 {strides = array<i32>} : memref<144x16xf32, #tpu.memory_space<vmem>>, vector<16x16xf32>,
    %334 = vector.extract_strided_slice %298 {offsets = [1, 0], sizes = [1, 16], strides = [1, 1]} : vector<2x16xf32> to vector<1x16xf32>
    %335 = vector.extract_strided_slice %297 {offsets = [0, 1], sizes = [16, 15], strides = [1, 1]} : vector<16x16xf32> to vector<16x15xf32>
    %336 = vector.extract_strided_slice %334 {offsets = [0, 0], sizes = [1, 15], strides = [1, 1]} : vector<1x16xf32> to vector<1x15xf32>
    %337 = vector.broadcast %336 : vector<1x15xf32> to vector<16x15xf32>
    %338 = arith.mulf %335, %337 : vector<16x15xf32>
    %c80_230 = arith.constant 80 : index
    %c0_231 = arith.constant 0 : index
    %339 = vector.load %arg32[%c80_230, %c0_231] : memref<144x16xf32, #tpu.memory_space<vmem>>, vector<16x15xf32>
    tpu.vector_store %arg32[%c80_230, %c0_231], %338 {strides = array<i32>} : memref<144x16xf32, #tpu.memory_space<vmem>>, vector<16x15xf32>,
    %cst_232 = arith.constant 0.000000e+00 : f32
    %340 = vector.broadcast %cst_232 : f32 to vector<16x1xf32>
    %c80_233 = arith.constant 80 : index
    %c15_234 = arith.constant 15 : index
    %341 = vector.load %arg32[%c80_233, %c15_234] : memref<144x16xf32, #tpu.memory_space<vmem>>, vector<16x1xf32>
    tpu.vector_store %arg32[%c80_233, %c15_234], %340 {strides = array<i32>} : memref<144x16xf32, #tpu.memory_space<vmem>>, vector<16x1xf32>,
    %342 = vector.extract_strided_slice %298 {offsets = [0, 0], sizes = [1, 16], strides = [1, 1]} : vector<2x16xf32> to vector<1x16xf32>
    %343 = vector.extract_strided_slice %297 {offsets = [0, 3], sizes = [16, 13], strides = [1, 1]} : vector<16x16xf32> to vector<16x13xf32>
    %344 = vector.extract_strided_slice %342 {offsets = [0, 0], sizes = [1, 13], strides = [1, 1]} : vector<1x16xf32> to vector<1x13xf32>
    %345 = vector.broadcast %344 : vector<1x13xf32> to vector<16x13xf32>
    %346 = arith.mulf %343, %345 : vector<16x13xf32>
    %c96_235 = arith.constant 96 : index
    %c0_236 = arith.constant 0 : index
    %347 = vector.load %arg32[%c96_235, %c0_236] : memref<144x16xf32, #tpu.memory_space<vmem>>, vector<16x13xf32>
    tpu.vector_store %arg32[%c96_235, %c0_236], %346 {strides = array<i32>} : memref<144x16xf32, #tpu.memory_space<vmem>>, vector<16x13xf32>,
    %cst_237 = arith.constant 0.000000e+00 : f32
    %348 = vector.broadcast %cst_237 : f32 to vector<16x3xf32>
    %c96_238 = arith.constant 96 : index
    %c13 = arith.constant 13 : index
    %349 = vector.load %arg32[%c96_238, %c13] : memref<144x16xf32, #tpu.memory_space<vmem>>, vector<16x3xf32>
    tpu.vector_store %arg32[%c96_238, %c13], %348 {strides = array<i32>} : memref<144x16xf32, #tpu.memory_space<vmem>>, vector<16x3xf32>,
    %350 = vector.extract_strided_slice %297 {offsets = [0, 4], sizes = [16, 12], strides = [1, 1]} : vector<16x16xf32> to vector<16x12xf32>
    %c112_239 = arith.constant 112 : index
    %c0_240 = arith.constant 0 : index
    %351 = vector.load %arg32[%c112_239, %c0_240] : memref<144x16xf32, #tpu.memory_space<vmem>>, vector<16x12xf32>
    tpu.vector_store %arg32[%c112_239, %c0_240], %350 {strides = array<i32>} : memref<144x16xf32, #tpu.memory_space<vmem>>, vector<16x12xf32>,
    %cst_241 = arith.constant 0.000000e+00 : f32
    %352 = vector.broadcast %cst_241 : f32 to vector<16x4xf32>
    %c112_242 = arith.constant 112 : index
    %c12_243 = arith.constant 12 : index
    %353 = vector.load %arg32[%c112_242, %c12_243] : memref<144x16xf32, #tpu.memory_space<vmem>>, vector<16x4xf32>
    tpu.vector_store %arg32[%c112_242, %c12_243], %352 {strides = array<i32>} : memref<144x16xf32, #tpu.memory_space<vmem>>, vector<16x4xf32>,
    %354 = vector.extract_strided_slice %298 {offsets = [1, 0], sizes = [1, 16], strides = [1, 1]} : vector<2x16xf32> to vector<1x16xf32>
    %355 = vector.extract_strided_slice %297 {offsets = [0, 5], sizes = [16, 11], strides = [1, 1]} : vector<16x16xf32> to vector<16x11xf32>
    %356 = vector.extract_strided_slice %354 {offsets = [0, 0], sizes = [1, 11], strides = [1, 1]} : vector<1x16xf32> to vector<1x11xf32>
    %357 = vector.broadcast %356 : vector<1x11xf32> to vector<16x11xf32>
    %358 = arith.mulf %355, %357 : vector<16x11xf32>
    %c128_244 = arith.constant 128 : index
    %c0_245 = arith.constant 0 : index
    %359 = vector.load %arg32[%c128_244, %c0_245] : memref<144x16xf32, #tpu.memory_space<vmem>>, vector<16x11xf32>
    tpu.vector_store %arg32[%c128_244, %c0_245], %358 {strides = array<i32>} : memref<144x16xf32, #tpu.memory_space<vmem>>, vector<16x11xf32>,
    %cst_246 = arith.constant 0.000000e+00 : f32
    %360 = vector.broadcast %cst_246 : f32 to vector<16x5xf32>
    %c128_247 = arith.constant 128 : index
    %c11 = arith.constant 11 : index
    %361 = vector.load %arg32[%c128_247, %c11] : memref<144x16xf32, #tpu.memory_space<vmem>>, vector<16x5xf32>
    tpu.vector_store %arg32[%c128_247, %c11], %360 {strides = array<i32>} : memref<144x16xf32, #tpu.memory_space<vmem>>, vector<16x5xf32>,
    %c0_248 = arith.constant 0 : index
    %c0_249 = arith.constant 0 : index
    %362 = vector.load %arg32[%c0_248, %c0_249] : memref<144x16xf32, #tpu.memory_space<vmem>>, vector<144x16xf32>
    %cst_250 = arith.constant dense<0.000000e+00> : vector<32x16xf32>
    %363 = tpu.matmul %299, %362, %cst_250 {dimension_numbers = #tpu.dot_dimension_numbers<[1], [0], [0], [1], [0, 0, 1, 1], [], []>} : vector<32x144xf32>, vector<144x16xf32>, vector<32x16xf32> -> vector<32x16xf32>
    %364 = vector.broadcast %300 : vector<32x1xf32> to vector<32x16xf32>
    %365 = arith.mulf %363, %364 : vector<32x16xf32>
    %366 = vector.broadcast %301 : vector<32x1xf32> to vector<32x16xf32>
    %367 = arith.addf %365, %366 : vector<32x16xf32>
    %cst_251 = arith.constant 0.000000e+00 : f32
    %368 = vector.broadcast %cst_251 : f32 to vector<32x16xf32>
    %369 = arith.maximumf %367, %368 : vector<32x16xf32>
    %370 = vector.extract_strided_slice %298 {offsets = [0, 0], sizes = [1, 16], strides = [1, 1]} : vector<2x16xf32> to vector<1x16xf32>
    %371 = vector.extract_strided_slice %369 {offsets = [0, 0], sizes = [32, 11], strides = [1, 1]} : vector<32x16xf32> to vector<32x11xf32>
    %372 = vector.extract_strided_slice %370 {offsets = [0, 5], sizes = [1, 11], strides = [1, 1]} : vector<1x16xf32> to vector<1x11xf32>
    %373 = vector.broadcast %372 : vector<1x11xf32> to vector<32x11xf32>
    %374 = arith.mulf %371, %373 : vector<32x11xf32>
    %cst_252 = arith.constant 0.000000e+00 : f32
    %375 = vector.broadcast %cst_252 : f32 to vector<32x5xf32>
    %c0_253 = arith.constant 0 : index
    %c0_254 = arith.constant 0 : index
    %376 = vector.load %arg33[%c0_253, %c0_254] : memref<288x16xf32, #tpu.memory_space<vmem>>, vector<32x5xf32>
    tpu.vector_store %arg33[%c0_253, %c0_254], %375 {strides = array<i32>} : memref<288x16xf32, #tpu.memory_space<vmem>>, vector<32x5xf32>,
    %c0_255 = arith.constant 0 : index
    %c5_256 = arith.constant 5 : index
    %377 = vector.load %arg33[%c0_255, %c5_256] : memref<288x16xf32, #tpu.memory_space<vmem>>, vector<32x11xf32>
    tpu.vector_store %arg33[%c0_255, %c5_256], %374 {strides = array<i32>} : memref<288x16xf32, #tpu.memory_space<vmem>>, vector<32x11xf32>,
    %378 = vector.extract_strided_slice %369 {offsets = [0, 0], sizes = [32, 12], strides = [1, 1]} : vector<32x16xf32> to vector<32x12xf32>
    %cst_257 = arith.constant 0.000000e+00 : f32
    %379 = vector.broadcast %cst_257 : f32 to vector<32x4xf32>
    %c32_258 = arith.constant 32 : index
    %c0_259 = arith.constant 0 : index
    %380 = vector.load %arg33[%c32_258, %c0_259] : memref<288x16xf32, #tpu.memory_space<vmem>>, vector<32x4xf32>
    tpu.vector_store %arg33[%c32_258, %c0_259], %379 {strides = array<i32>} : memref<288x16xf32, #tpu.memory_space<vmem>>, vector<32x4xf32>,
    %c32_260 = arith.constant 32 : index
    %c4_261 = arith.constant 4 : index
    %381 = vector.load %arg33[%c32_260, %c4_261] : memref<288x16xf32, #tpu.memory_space<vmem>>, vector<32x12xf32>
    tpu.vector_store %arg33[%c32_260, %c4_261], %378 {strides = array<i32>} : memref<288x16xf32, #tpu.memory_space<vmem>>, vector<32x12xf32>,
    %382 = vector.extract_strided_slice %298 {offsets = [1, 0], sizes = [1, 16], strides = [1, 1]} : vector<2x16xf32> to vector<1x16xf32>
    %383 = vector.extract_strided_slice %369 {offsets = [0, 0], sizes = [32, 13], strides = [1, 1]} : vector<32x16xf32> to vector<32x13xf32>
    %384 = vector.extract_strided_slice %382 {offsets = [0, 3], sizes = [1, 13], strides = [1, 1]} : vector<1x16xf32> to vector<1x13xf32>
    %385 = vector.broadcast %384 : vector<1x13xf32> to vector<32x13xf32>
    %386 = arith.mulf %383, %385 : vector<32x13xf32>
    %cst_262 = arith.constant 0.000000e+00 : f32
    %387 = vector.broadcast %cst_262 : f32 to vector<32x3xf32>
    %c64_263 = arith.constant 64 : index
    %c0_264 = arith.constant 0 : index
    %388 = vector.load %arg33[%c64_263, %c0_264] : memref<288x16xf32, #tpu.memory_space<vmem>>, vector<32x3xf32>
    tpu.vector_store %arg33[%c64_263, %c0_264], %387 {strides = array<i32>} : memref<288x16xf32, #tpu.memory_space<vmem>>, vector<32x3xf32>,
    %c64_265 = arith.constant 64 : index
    %c3_266 = arith.constant 3 : index
    %389 = vector.load %arg33[%c64_265, %c3_266] : memref<288x16xf32, #tpu.memory_space<vmem>>, vector<32x13xf32>
    tpu.vector_store %arg33[%c64_265, %c3_266], %386 {strides = array<i32>} : memref<288x16xf32, #tpu.memory_space<vmem>>, vector<32x13xf32>,
    %390 = vector.extract_strided_slice %298 {offsets = [0, 0], sizes = [1, 16], strides = [1, 1]} : vector<2x16xf32> to vector<1x16xf32>
    %391 = vector.extract_strided_slice %369 {offsets = [0, 0], sizes = [32, 15], strides = [1, 1]} : vector<32x16xf32> to vector<32x15xf32>
    %392 = vector.extract_strided_slice %390 {offsets = [0, 1], sizes = [1, 15], strides = [1, 1]} : vector<1x16xf32> to vector<1x15xf32>
    %393 = vector.broadcast %392 : vector<1x15xf32> to vector<32x15xf32>
    %394 = arith.mulf %391, %393 : vector<32x15xf32>
    %cst_267 = arith.constant 0.000000e+00 : f32
    %395 = vector.broadcast %cst_267 : f32 to vector<32x1xf32>
    %c96_268 = arith.constant 96 : index
    %c0_269 = arith.constant 0 : index
    %396 = vector.load %arg33[%c96_268, %c0_269] : memref<288x16xf32, #tpu.memory_space<vmem>>, vector<32x1xf32>
    tpu.vector_store %arg33[%c96_268, %c0_269], %395 {strides = array<i32>} : memref<288x16xf32, #tpu.memory_space<vmem>>, vector<32x1xf32>,
    %c96_270 = arith.constant 96 : index
    %c1_271 = arith.constant 1 : index
    %397 = vector.load %arg33[%c96_270, %c1_271] : memref<288x16xf32, #tpu.memory_space<vmem>>, vector<32x15xf32>
    tpu.vector_store %arg33[%c96_270, %c1_271], %394 {strides = array<i32>} : memref<288x16xf32, #tpu.memory_space<vmem>>, vector<32x15xf32>,
    %c128_272 = arith.constant 128 : index
    %c0_273 = arith.constant 0 : index
    %398 = vector.load %arg33[%c128_272, %c0_273] : memref<288x16xf32, #tpu.memory_space<vmem>>, vector<32x16xf32>
    tpu.vector_store %arg33[%c128_272, %c0_273], %369 {strides = array<i32>} : memref<288x16xf32, #tpu.memory_space<vmem>>, vector<32x16xf32>,
    %399 = vector.extract_strided_slice %298 {offsets = [1, 0], sizes = [1, 16], strides = [1, 1]} : vector<2x16xf32> to vector<1x16xf32>
    %400 = vector.extract_strided_slice %369 {offsets = [0, 1], sizes = [32, 15], strides = [1, 1]} : vector<32x16xf32> to vector<32x15xf32>
    %401 = vector.extract_strided_slice %399 {offsets = [0, 0], sizes = [1, 15], strides = [1, 1]} : vector<1x16xf32> to vector<1x15xf32>
    %402 = vector.broadcast %401 : vector<1x15xf32> to vector<32x15xf32>
    %403 = arith.mulf %400, %402 : vector<32x15xf32>
    %c160 = arith.constant 160 : index
    %c0_274 = arith.constant 0 : index
    %404 = vector.load %arg33[%c160, %c0_274] : memref<288x16xf32, #tpu.memory_space<vmem>>, vector<32x15xf32>
    tpu.vector_store %arg33[%c160, %c0_274], %403 {strides = array<i32>} : memref<288x16xf32, #tpu.memory_space<vmem>>, vector<32x15xf32>,
    %cst_275 = arith.constant 0.000000e+00 : f32
    %405 = vector.broadcast %cst_275 : f32 to vector<32x1xf32>
    %c160_276 = arith.constant 160 : index
    %c15_277 = arith.constant 15 : index
    %406 = vector.load %arg33[%c160_276, %c15_277] : memref<288x16xf32, #tpu.memory_space<vmem>>, vector<32x1xf32>
    tpu.vector_store %arg33[%c160_276, %c15_277], %405 {strides = array<i32>} : memref<288x16xf32, #tpu.memory_space<vmem>>, vector<32x1xf32>,
    %407 = vector.extract_strided_slice %298 {offsets = [0, 0], sizes = [1, 16], strides = [1, 1]} : vector<2x16xf32> to vector<1x16xf32>
    %408 = vector.extract_strided_slice %369 {offsets = [0, 3], sizes = [32, 13], strides = [1, 1]} : vector<32x16xf32> to vector<32x13xf32>
    %409 = vector.extract_strided_slice %407 {offsets = [0, 0], sizes = [1, 13], strides = [1, 1]} : vector<1x16xf32> to vector<1x13xf32>
    %410 = vector.broadcast %409 : vector<1x13xf32> to vector<32x13xf32>
    %411 = arith.mulf %408, %410 : vector<32x13xf32>
    %c192 = arith.constant 192 : index
    %c0_278 = arith.constant 0 : index
    %412 = vector.load %arg33[%c192, %c0_278] : memref<288x16xf32, #tpu.memory_space<vmem>>, vector<32x13xf32>
    tpu.vector_store %arg33[%c192, %c0_278], %411 {strides = array<i32>} : memref<288x16xf32, #tpu.memory_space<vmem>>, vector<32x13xf32>,
    %cst_279 = arith.constant 0.000000e+00 : f32
    %413 = vector.broadcast %cst_279 : f32 to vector<32x3xf32>
    %c192_280 = arith.constant 192 : index
    %c13_281 = arith.constant 13 : index
    %414 = vector.load %arg33[%c192_280, %c13_281] : memref<288x16xf32, #tpu.memory_space<vmem>>, vector<32x3xf32>
    tpu.vector_store %arg33[%c192_280, %c13_281], %413 {strides = array<i32>} : memref<288x16xf32, #tpu.memory_space<vmem>>, vector<32x3xf32>,
    %415 = vector.extract_strided_slice %369 {offsets = [0, 4], sizes = [32, 12], strides = [1, 1]} : vector<32x16xf32> to vector<32x12xf32>
    %c224 = arith.constant 224 : index
    %c0_282 = arith.constant 0 : index
    %416 = vector.load %arg33[%c224, %c0_282] : memref<288x16xf32, #tpu.memory_space<vmem>>, vector<32x12xf32>
    tpu.vector_store %arg33[%c224, %c0_282], %415 {strides = array<i32>} : memref<288x16xf32, #tpu.memory_space<vmem>>, vector<32x12xf32>,
    %cst_283 = arith.constant 0.000000e+00 : f32
    %417 = vector.broadcast %cst_283 : f32 to vector<32x4xf32>
    %c224_284 = arith.constant 224 : index
    %c12_285 = arith.constant 12 : index
    %418 = vector.load %arg33[%c224_284, %c12_285] : memref<288x16xf32, #tpu.memory_space<vmem>>, vector<32x4xf32>
    tpu.vector_store %arg33[%c224_284, %c12_285], %417 {strides = array<i32>} : memref<288x16xf32, #tpu.memory_space<vmem>>, vector<32x4xf32>,
    %419 = vector.extract_strided_slice %298 {offsets = [1, 0], sizes = [1, 16], strides = [1, 1]} : vector<2x16xf32> to vector<1x16xf32>
    %420 = vector.extract_strided_slice %369 {offsets = [0, 5], sizes = [32, 11], strides = [1, 1]} : vector<32x16xf32> to vector<32x11xf32>
    %421 = vector.extract_strided_slice %419 {offsets = [0, 0], sizes = [1, 11], strides = [1, 1]} : vector<1x16xf32> to vector<1x11xf32>
    %422 = vector.broadcast %421 : vector<1x11xf32> to vector<32x11xf32>
    %423 = arith.mulf %420, %422 : vector<32x11xf32>
    %c256 = arith.constant 256 : index
    %c0_286 = arith.constant 0 : index
    %424 = vector.load %arg33[%c256, %c0_286] : memref<288x16xf32, #tpu.memory_space<vmem>>, vector<32x11xf32>
    tpu.vector_store %arg33[%c256, %c0_286], %423 {strides = array<i32>} : memref<288x16xf32, #tpu.memory_space<vmem>>, vector<32x11xf32>,
    %cst_287 = arith.constant 0.000000e+00 : f32
    %425 = vector.broadcast %cst_287 : f32 to vector<32x5xf32>
    %c256_288 = arith.constant 256 : index
    %c11_289 = arith.constant 11 : index
    %426 = vector.load %arg33[%c256_288, %c11_289] : memref<288x16xf32, #tpu.memory_space<vmem>>, vector<32x5xf32>
    tpu.vector_store %arg33[%c256_288, %c11_289], %425 {strides = array<i32>} : memref<288x16xf32, #tpu.memory_space<vmem>>, vector<32x5xf32>,
    %c0_290 = arith.constant 0 : index
    %c0_291 = arith.constant 0 : index
    %427 = vector.load %arg33[%c0_290, %c0_291] : memref<288x16xf32, #tpu.memory_space<vmem>>, vector<288x16xf32>
    %cst_292 = arith.constant dense<0.000000e+00> : vector<32x16xf32>
    %428 = tpu.matmul %302, %427, %cst_292 {dimension_numbers = #tpu.dot_dimension_numbers<[1], [0], [0], [1], [0, 0, 1, 1], [], []>} : vector<32x288xf32>, vector<288x16xf32>, vector<32x16xf32> -> vector<32x16xf32>
    %429 = vector.broadcast %303 : vector<32x1xf32> to vector<32x16xf32>
    %430 = arith.mulf %428, %429 : vector<32x16xf32>
    %431 = vector.broadcast %304 : vector<32x1xf32> to vector<32x16xf32>
    %432 = arith.addf %430, %431 : vector<32x16xf32>
    %cst_293 = arith.constant 0.000000e+00 : f32
    %433 = vector.broadcast %cst_293 : f32 to vector<32x16xf32>
    %434 = arith.maximumf %432, %433 : vector<32x16xf32>
    %c0_294 = arith.constant 0 : index
    %c0_295 = arith.constant 0 : index
    %c0_296 = arith.constant 0 : index
    %435 = vector.load %arg27[%c0_294, %c0_295, %c0_296] : memref<1x32x16xf32, #tpu.memory_space<vmem>>, vector<1x32x16xf32>
    %436 = vector.shape_cast %435 : vector<1x32x16xf32> to vector<32x16xf32>
    %437 = vector.shape_cast %434 : vector<32x16xf32> to vector<1x32x16xf32>
    tpu.vector_store %arg27[%c0_294, %c0_295, %c0_296], %437 {strides = array<i32>} : memref<1x32x16xf32, #tpu.memory_space<vmem>>, vector<1x32x16xf32>,
    return
  }
  func.func @transform_0(%arg0: i32) -> (i32, i32, i32) {
    %c0_i32 = arith.constant 0 : i32
    %c0_i32_0 = arith.constant 0 : i32
    %c0_i32_1 = arith.constant 0 : i32
    return %arg0, %c0_i32, %c0_i32_0 : i32, i32, i32
  }
  func.func @transform_1(%arg0: i32) -> (i32, i32) {
    %c0_i32 = arith.constant 0 : i32
    %c0_i32_0 = arith.constant 0 : i32
    %c0_i32_1 = arith.constant 0 : i32
    return %c0_i32, %c0_i32_0 : i32, i32
  }
  func.func @transform_2(%arg0: i32) -> (i32, i32) {
    %c0_i32 = arith.constant 0 : i32
    %c0_i32_0 = arith.constant 0 : i32
    %c0_i32_1 = arith.constant 0 : i32
    return %c0_i32, %c0_i32_0 : i32, i32
  }
  func.func @transform_3(%arg0: i32) -> (i32, i32) {
    %c0_i32 = arith.constant 0 : i32
    %c0_i32_0 = arith.constant 0 : i32
    %c0_i32_1 = arith.constant 0 : i32
    return %c0_i32, %c0_i32_0 : i32, i32
  }
  func.func @transform_4(%arg0: i32) -> (i32, i32) {
    %c0_i32 = arith.constant 0 : i32
    %c0_i32_0 = arith.constant 0 : i32
    %c0_i32_1 = arith.constant 0 : i32
    return %c0_i32, %c0_i32_0 : i32, i32
  }
  func.func @transform_5(%arg0: i32) -> (i32, i32) {
    %c0_i32 = arith.constant 0 : i32
    %c0_i32_0 = arith.constant 0 : i32
    %c0_i32_1 = arith.constant 0 : i32
    return %c0_i32, %c0_i32_0 : i32, i32
  }
  func.func @transform_6(%arg0: i32) -> (i32, i32) {
    %c0_i32 = arith.constant 0 : i32
    %c0_i32_0 = arith.constant 0 : i32
    %c0_i32_1 = arith.constant 0 : i32
    return %c0_i32, %c0_i32_0 : i32, i32
  }
  func.func @transform_7(%arg0: i32) -> (i32, i32) {
    %c0_i32 = arith.constant 0 : i32
    %c0_i32_0 = arith.constant 0 : i32
    %c0_i32_1 = arith.constant 0 : i32
    return %c0_i32, %c0_i32_0 : i32, i32
  }
  func.func @transform_8(%arg0: i32) -> (i32, i32) {
    %c0_i32 = arith.constant 0 : i32
    %c0_i32_0 = arith.constant 0 : i32
    %c0_i32_1 = arith.constant 0 : i32
    return %c0_i32, %c0_i32_0 : i32, i32
  }
  func.func @transform_9(%arg0: i32) -> (i32, i32) {
    %c0_i32 = arith.constant 0 : i32
    %c0_i32_0 = arith.constant 0 : i32
    %c0_i32_1 = arith.constant 0 : i32
    return %c0_i32, %c0_i32_0 : i32, i32
  }
  func.func @transform_10(%arg0: i32) -> (i32, i32) {
    %c0_i32 = arith.constant 0 : i32
    %c0_i32_0 = arith.constant 0 : i32
    %c0_i32_1 = arith.constant 0 : i32
    return %c0_i32, %c0_i32_0 : i32, i32
  }
  func.func @transform_11(%arg0: i32) -> (i32, i32) {
    %c0_i32 = arith.constant 0 : i32
    %c0_i32_0 = arith.constant 0 : i32
    %c0_i32_1 = arith.constant 0 : i32
    return %c0_i32, %c0_i32_0 : i32, i32
  }
  func.func @transform_12(%arg0: i32) -> (i32, i32) {
    %c0_i32 = arith.constant 0 : i32
    %c0_i32_0 = arith.constant 0 : i32
    %c0_i32_1 = arith.constant 0 : i32
    return %c0_i32, %c0_i32_0 : i32, i32
  }
  func.func @transform_13(%arg0: i32) -> (i32, i32) {
    %c0_i32 = arith.constant 0 : i32
    %c0_i32_0 = arith.constant 0 : i32
    %c0_i32_1 = arith.constant 0 : i32
    return %c0_i32, %c0_i32_0 : i32, i32
  }
  func.func @transform_14(%arg0: i32) -> (i32, i32) {
    %c0_i32 = arith.constant 0 : i32
    %c0_i32_0 = arith.constant 0 : i32
    %c0_i32_1 = arith.constant 0 : i32
    return %c0_i32, %c0_i32_0 : i32, i32
  }
  func.func @transform_15(%arg0: i32) -> (i32, i32) {
    %c0_i32 = arith.constant 0 : i32
    %c0_i32_0 = arith.constant 0 : i32
    %c0_i32_1 = arith.constant 0 : i32
    return %c0_i32, %c0_i32_0 : i32, i32
  }
  func.func @transform_16(%arg0: i32) -> (i32, i32) {
    %c0_i32 = arith.constant 0 : i32
    %c0_i32_0 = arith.constant 0 : i32
    %c0_i32_1 = arith.constant 0 : i32
    return %c0_i32, %c0_i32_0 : i32, i32
  }
  func.func @transform_17(%arg0: i32) -> (i32, i32) {
    %c0_i32 = arith.constant 0 : i32
    %c0_i32_0 = arith.constant 0 : i32
    %c0_i32_1 = arith.constant 0 : i32
    return %c0_i32, %c0_i32_0 : i32, i32
  }
  func.func @transform_18(%arg0: i32) -> (i32, i32) {
    %c0_i32 = arith.constant 0 : i32
    %c0_i32_0 = arith.constant 0 : i32
    %c0_i32_1 = arith.constant 0 : i32
    return %c0_i32, %c0_i32_0 : i32, i32
  }
  func.func @transform_19(%arg0: i32) -> (i32, i32) {
    %c0_i32 = arith.constant 0 : i32
    %c0_i32_0 = arith.constant 0 : i32
    %c0_i32_1 = arith.constant 0 : i32
    return %c0_i32, %c0_i32_0 : i32, i32
  }
  func.func @transform_20(%arg0: i32) -> (i32, i32) {
    %c0_i32 = arith.constant 0 : i32
    %c0_i32_0 = arith.constant 0 : i32
    %c0_i32_1 = arith.constant 0 : i32
    return %c0_i32, %c0_i32_0 : i32, i32
  }
  func.func @transform_21(%arg0: i32) -> (i32, i32) {
    %c0_i32 = arith.constant 0 : i32
    %c0_i32_0 = arith.constant 0 : i32
    %c0_i32_1 = arith.constant 0 : i32
    return %c0_i32, %c0_i32_0 : i32, i32
  }
  func.func @transform_22(%arg0: i32) -> (i32, i32) {
    %c0_i32 = arith.constant 0 : i32
    %c0_i32_0 = arith.constant 0 : i32
    %c0_i32_1 = arith.constant 0 : i32
    return %c0_i32, %c0_i32_0 : i32, i32
  }
  func.func @transform_23(%arg0: i32) -> (i32, i32) {
    %c0_i32 = arith.constant 0 : i32
    %c0_i32_0 = arith.constant 0 : i32
    %c0_i32_1 = arith.constant 0 : i32
    return %c0_i32, %c0_i32_0 : i32, i32
  }
  func.func @transform_24(%arg0: i32) -> (i32, i32, i32) {
    %c0_i32 = arith.constant 0 : i32
    %c0_i32_0 = arith.constant 0 : i32
    %c0_i32_1 = arith.constant 0 : i32
    return %arg0, %c0_i32, %c0_i32_0 : i32, i32, i32
  }
  func.func @transform_25(%arg0: i32) -> (i32, i32, i32) {
    %c0_i32 = arith.constant 0 : i32
    %c0_i32_0 = arith.constant 0 : i32
    %c0_i32_1 = arith.constant 0 : i32
    return %arg0, %c0_i32, %c0_i32_0 : i32, i32, i32
  }
  func.func @transform_26(%arg0: i32) -> (i32, i32, i32) {
    %c0_i32 = arith.constant 0 : i32
    %c0_i32_0 = arith.constant 0 : i32
    %c0_i32_1 = arith.constant 0 : i32
    return %arg0, %c0_i32, %c0_i32_0 : i32, i32, i32
  }
}

</mosaic_0001>

<bundles_post_ra>
// kernel: tpu_custom_call.1
= control target key start
LH: loop header
LB: loop body
LE: loop exit
PB: predicated region body
PF: predicated region fallthrough
CT: control target
= control target key end

     0   :  { %s4732_s0 = inlined_call_operand.vmem [shape: f32[2,3,256], index: 0, kind: input, shape index: {}]   ;;  %s4733_s1 = inlined_call_operand.vmem [shape: f32[2,256], index: 1, kind: input, shape index: {}]   ;;  %s4734_s2 = inlined_call_operand.vmem [shape: f32[8,27], index: 2, kind: input, shape index: {}]   ;;  %s4735_s3 = inlined_call_operand.vmem [shape: f32[8,1], index: 3, kind: input, shape index: {}]   ;;  %s4736_s4 = inlined_call_operand.vmem [shape: f32[8,1], index: 4, kind: input, shape index: {}]   ;;  %s4737_s5 = inlined_call_operand.vmem [shape: f32[8,72], index: 5, kind: input, shape index: {}]   ;;  %s4738_s6 = inlined_call_operand.vmem [shape: f32[8,1], index: 6, kind: input, shape index: {}]   ;;  %s4739_s7 = inlined_call_operand.vmem [shape: f32[8,1], index: 7, kind: input, shape index: {}]   ;;  %s4740_s8 = inlined_call_operand.vmem [shape: f32[239,64], index: 8, kind: input, shape index: {}]   ;;  %s4741_s9 = inlined_call_operand.vmem [shape: f32[2,64], index: 9, kind: input, shape index: {}]   ;;  %s4742_s10 = inlined_call_operand.vmem [shape: f32[16,72], index: 10, kind: input, shape index: {}]   ;;  %s4743_s11 = inlined_call_operand.vmem [shape: f32[16,1], index: 11, kind: input, shape index: {}]   ;;  %s4744_s12 = inlined_call_operand.vmem [shape: f32[16,1], index: 12, kind: input, shape index: {}]   ;;  %s4745_s13 = inlined_call_operand.vmem [shape: f32[16,144], index: 13, kind: input, shape index: {}]   ;;  %s4746_s14 = inlined_call_operand.vmem [shape: f32[16,1], index: 14, kind: input, shape index: {}]   ;;  %s4747_s15 = inlined_call_operand.vmem [shape: f32[16,1], index: 15, kind: input, shape index: {}]   ;;  %s4748_s16 = inlined_call_operand.vmem [shape: f32[55,16], index: 16, kind: input, shape index: {}]   ;;  %s4749_s17 = inlined_call_operand.vmem [shape: f32[2,16], index: 17, kind: input, shape index: {}]   ;;  %s4750_s18 = inlined_call_operand.vmem [shape: f32[32,144], index: 18, kind: input, shape index: {}]   ;;  %s4751_s19 = inlined_call_operand.vmem [shape: f32[32,1], index: 19, kind: input, shape index: {}]   ;;  %s4752_s20 = inlined_call_operand.vmem [shape: f32[32,1], index: 20, kind: input, shape index: {}]   ;;  %s4753_s21 = inlined_call_operand.vmem [shape: f32[32,288], index: 21, kind: input, shape index: {}]   ;;  %s4754_s22 = inlined_call_operand.vmem [shape: f32[32,1], index: 22, kind: input, shape index: {}]   ;;  %s4755_s23 = inlined_call_operand.vmem [shape: f32[32,1], index: 23, kind: input, shape index: {}]   ;;  %s4756_s24 = inlined_call_operand.hbm [shape: f32[2,8,256], index: 24, kind: output, shape index: {0}]   ;;  %s4757_s25 = inlined_call_operand.hbm [shape: f32[2,16,64], index: 25, kind: output, shape index: {1}]   ;;  %s4758_s26 = inlined_call_operand.vmem [shape: f32[2,32,16], index: 26, kind: output, shape index: {2}]  }
   0x1   :  { %4812 = sst [smem:[#allocation22_spill]] %s4732_s0 }
   0x2   :  { %4813 = sst [smem:[#allocation23_spill]] %s4733_s1 }
   0x3   :  { %4814 = sst [smem:[#allocation24_spill]] %s4734_s2 }
   0x4   :  { %4815 = sst [smem:[#allocation25_spill]] %s4735_s3 }
   0x5   :  { %4816 = sst [smem:[#allocation26_spill]] %s4736_s4 }
   0x6   :  { %4817 = sst [smem:[#allocation27_spill]] %s4737_s5 }
   0x7   :  { %4818 = sst [smem:[#allocation28_spill]] %s4738_s6 }
   0x8   :  { %4819 = sst [smem:[#allocation29_spill]] %s4739_s7 }
   0x9   :  { %4820 = sst [smem:[#allocation30_spill]] %s4740_s8 }
   0xa   :  { %4821 = sst [smem:[#allocation31_spill]] %s4741_s9 }
   0xb   :  { %4822 = sst [smem:[#allocation32_spill]] %s4742_s10 }
   0xc   :  { %4823 = sst [smem:[#allocation33_spill]] %s4743_s11 }
   0xd   :  { %4824 = sst [smem:[#allocation34_spill]] %s4758_s26 }
   0xe   :  { %32 = vsyncpa [#allocation9], 0 }
   0xf   :  { %34 = vsyncpa [#allocation9 + $0x1], 0 }
  0x10   :  { %35 = vsyncpa [#allocation11], 0 }
  0x11   :  { %37 = vsyncpa [#allocation11 + $0x1], 0  ;;  %s3617_s27 = smov 0   ;;  %s3619_s3 = smov 0  }
  0x12   :  { %s3621_s7 = smov 0   ;;  %s3623_s28 = smov 0  }
  0x13 LB: > { %4825 = sst [smem:[#allocation14_spill]] %s3443_s27  ;;  %s3638_s8 = sadd.s32 4294967295, %s3455_s28   ;;  %s3455_s28 = sphi %s3623_s28, %s4879_s28   ;;  %s3451_s7 = sphi %s3621_s7, %s4882_s7   ;;  %s3447_s3 = sphi %s3619_s3, %s4881_s3   ;;  %s3443_s27 = sphi %s3617_s27, %s4880_s27  }
  0x14   : > { %4826 = sst [smem:[#allocation15_spill]] %s3447_s3  ;;  %s3128_s4 = sadd.s32 4294967294, %s3455_s28  }
  0x15   : > { %4827 = sst [smem:[#allocation16_spill]] %s3451_s7  ;;  %s3642_s29 = sadd.s32 1, %s3455_s28  }
  0x16   : > { %4828 = sst [smem:[#allocation17_spill]] %s3455_s28  ;;  %s559_s0 = sadd.s32 1, %s3451_s7 }
  0x17   : > { %4829 = sst [smem:[#allocation18_spill]] %s3642_s29  ;;  %s556_s9 = ssub.s32 %s3455_s28, %s3642_s29 }
  0x18   : > { %p569_p0 = scmp.ne.s32.totalorder %s3451_s7, %s3447_s3  ;;  %p557_p1 = scmp.eq.s32.totalorder %s556_s9, 0 }
  0x19   : > { %p570_p2 = scmp.eq.s32.totalorder %s3638_s8, 1  ;;  %p575_p3 = scmp.ne.s32.totalorder %s3447_s3, %s3443_s27 }
  0x1a   : > { %p576_p4 = scmp.eq.s32.totalorder %s3128_s4, 1  ;;  %p3131_p7 = scmp.ge.s32.totalorder %s3455_s28, 1 }
  0x1b   : > { %s3653_s30 = scalar_select %p557_p1, %s3451_s7, %s559_s0  }
  0x1c   : > { %p3655_p5 = por %p570_p2, %p569_p0  ;;  %p3659_p6 = por %p576_p4, %p575_p3 }
  0x1d   : > { %4830 = sst [smem:[#allocation19_spill]] %s3653_s30  ;;  %p723_p8 = scmp.lt.s32.totalorder %s3455_s28, 3 }
  0x1e   : > { %s4832_s5 = scalar_select %p3659_p6, 1, 0 }
  0x1f   : > { %p724_p9 = pnand %p3131_p7, %p723_p8 }
  0x20   : > { %4833 = sst [smem:[#allocation20_spill]] %s4832_s5 }
  0x21   : > { %727 = sbr.rel (%p724_p9) target bundleno = 3200 (0xc80), region = 116 }
  0x26   : > { %v822_v0 = vlaneseq  ;;  %s4834_s1 = sld [smem:[#allocation23_spill]]  ;;  %p803_p10 = scmp.lt.s32.totalorder %s3638_s8, 1  ;;  %vm858_vm0 = vcmask 138240   ;;  %vm949_vm1 = vcmask 7168   ;;  %vm4797_vm2 = vcmask 121856  }
  0x27   : > { %s4836_s6 = sld [smem:[#allocation22_spill]]  ;;  %s4770_s30 = smov 17   ;;  %v3464_v21 = vmov 0.0   ;;  %vm850_vm3 = vcmask 133120   ;;  %vm906_vm4 = vcmask 924672   ;;  %vm846_vm5 = vcmask 908288  }
  0x28   : > { %v823_v1 = vshrl.u32 %v822_v0, 7  ;;  %s3674_s4 = scalar_select %p803_p10, %s3638_s8, 1  ;;  %1159 = vst.msk [vmem:[#allocation3] sm:$0xff] %vm858_vm0, %v3464_v21  ;;  %1127 = vmatprep.mubr.f32.mxu0 %v3464_v21  ;;  %1394 = vmatprep.mubr.f32.mxu1 %v3464_v21  ;;  %vm935_vm6 = vcmask 1039360   ;;  %vm1015_vm7 = vcmask 916480   ;;  %vm1020_vm8 = vcmask 916485  }
  0x29   : > { %s4772_s7 = smov 1   ;;  %s4768_s9 = smov 15   ;;  %1194 = vst.msk [vmem:[#allocation3 + $0x20] sm:$0xff] %vm4797_vm2, %v3464_v21  ;;  %vm1022_vm9 = vcmask 1048453   ;;  %vm910_vm10 = vcmask 121862   ;;  %vm912_vm11 = vcmask 114688  }
  0x2a   : > { %v3669_v3 = vsub.s32 1, %v823_v1  ;;  %v888_v4 = vsub.s32 3, %v823_v1  ;;  %v3671_v5 = vsub.s32 0, %v823_v1  ;;  %v828_v6 = vsub.s32 2, %v823_v1  ;;  %4835 = sst [smem:[#allocation21_spill]] %s3674_s4  ;;  %s3167_s0 = sshll.u32 %s3674_s4, 3 }
  0x2b   : > { %s4764_s10 = smov 111   ;;  %1216 = vst.msk [vmem:[#allocation3 + $0x30] sm:$0xff] %vm949_vm1, %v3464_v21  ;;  %1609 = vst.msk [vmem:[#allocation4 + $0x18] sm:$0xff] %vm949_vm1, %v3464_v21  ;;  %vm939_vm12 = vcmask 3073   ;;  %vm865_vm13 = vcmask 128003   ;;  %vm875_vm14 = vcmask 130048  }
  0x2c   : > { %v814_v2 = vld [vmem:[%s4834_s1] sm:$0xf]  ;;  %1819 = vst.msk [vmem:[#allocation5 + $0x30] sm:$0xff] %vm949_vm1, %v3464_v21  ;;  %1820 = vst.msk [vmem:[#allocation5 + $0x38] sm:$0xff] %vm949_vm1, %v3464_v21  ;;  %s4838_s29 = sld [smem:[#allocation25_spill]]  ;;  %s4839_s5 = smov 17  }
  0x2d   : > { %v885_v7 = vrot.slane %v814_v2, %v3669_v3  ;;  %v889_v8 = vrot.slane %v814_v2, %v888_v4  ;;  %v825_v9 = vrot.slane %v814_v2, %v3671_v5  ;;  %v829_v10 = vrot.slane %v814_v2, %v828_v6  ;;  %s807_s1 = scalar_lea.vmem %s4836_s6, %s3167_s0  ;;  %s4766_s0 = smov 113   ;;  %2227 = vst.msk [vmem:[#allocation6 + $0x30] sm:$0xff] %vm949_vm1, %v3464_v21 }
  0x2e   : > { %v3688_v13 = vld [vmem:[%s807_s1] sm:$0x77]  ;;  %s4777_s6 = smov 127   ;;  %s4762_s1 = smov 112   ;;  %2228 = vst.msk [vmem:[#allocation6 + $0x38] sm:$0xff] %vm949_vm1, %v3464_v21  ;;  %2561 = vst.msk [vmem:[#allocation7 + $0x60] sm:$0xff] %vm949_vm1, %v3464_v21 }
  0x2f   : > { %v3680_v11 = vrot.slane %v885_v7, %v3669_v3  ;;  %v3683_v12 = vrot.slane %v889_v8, %v3669_v3  ;;  %v3693_v15 = vrot.slane %v825_v9, %v3671_v5  ;;  %v3696_v16 = vrot.slane %v829_v10, %v3671_v5  ;;  %959 = vst [vmem:[#allocation2 + $0x18] sm:$0x70] %v3688_v13  ;;  %s4795_s27 = smov 9   ;;  %s4784_s28 = smov 119  }
  0x30   : > { %v3707_v18 = vcombine.high %v3688_v13, %v3688_v13  ;;  %v1009_v19 = vrot.slane %v3688_v13, 3  ;;  %2562 = vst.msk [vmem:[#allocation7 + $0x68] sm:$0xff] %vm949_vm1, %v3464_v21  ;;  %2563 = vst.msk [vmem:[#allocation7 + $0x70] sm:$0xff] %vm949_vm1, %v3464_v21  ;;  %v956_v57 = vcombine.low %v3688_v13, %v3688_v13  ;;  %v869_v1 = vrot.slane %v3688_v13, 5  ;;  %s4853_s11 = sld [smem:[#allocation33_spill]]  ;;  %s3169_s4 = sshll.u32 %s3638_s8, 8 }
  0x31   : > { %v902_v14 = vcombine.low %v3680_v11, %v3683_v12  ;;  %v842_v17 = vcombine.low %v3693_v15, %v3696_v16  ;;  %2564 = vst.msk [vmem:[#allocation7 + $0x78] sm:$0xff] %vm949_vm1, %v3464_v21  ;;  %v3466_v4 = vmov 0   ;;  %vm862_vm15 = vcmask 1042568  }
  0x32   : > { %v1010_v20 = vrot.slane %v3707_v18, 3  ;;  %851 = vst.msk [vmem:[#allocation2] sm:$0x7] %vm850_vm3, %v3464_v21  ;;  %958 = vst [vmem:[#allocation2 + $0x10] sm:$0x70] %v956_v57  ;;  %v870_v63 = vrot.slane %v3707_v18, 5  ;;  %3363 = vset.pattern.permute.xlu1 %v3466_v4  ;;  %3362 = vset.pattern.permute.xlu0 %v3466_v4 }
  0x33   : > { %1024 = vrot.lane.b32.xlu1 %v902_v14, %s4770_s30  ;;  %960 = vrot.lane.b32.xlu0 %v902_v14, %s4772_s7  ;;  %911 = vst.msk [vmem:[#allocation2] sm:$0xc0] %vm910_vm10, %v3464_v21  ;;  %v816_v6 = vld [vmem:[%s4838_s29] sm:$0xff]  ;;  %s4843_s29 = smov 113   ;;  %vm1040_vm3 = vcmask 903168   ;;  %vm1007_vm10 = vcmask 1045386  }
  0x34   : > { %913 = vst.msk [vmem:[#allocation2 + $0x10] sm:$0x1] %vm912_vm11, %v3464_v21  ;;  %vm926_vm11 = vcmask 1047678  }
  0x35   : > { %940 = vst.msk [vmem:[#allocation2 + $0x10] sm:$0xe] %vm939_vm12, %v3464_v21  ;;  %vm929_vm12 = vcmask 1040504  }
  0x36   : > { %866 = vst.msk [vmem:[#allocation2] sm:$0x38] %vm865_vm13, %v3464_v21  ;;  %vm1056_vm13 = vcmask 1042432  }
  0x37   : > { %903 = vrot.lane.b32.xlu1 %v902_v14, %s4766_s0  ;;  %987 = vrot.lane.b32.xlu0 %v842_v17, %s4768_s9  ;;  %1172 = vst.msk [vmem:[#allocation3 + $0x10] sm:$0xff] %vm875_vm14, %v3464_v21 }
  0x3b   : > { %843 = vrot.lane.b32.xlu1 %v842_v17, %s4764_s10  ;;  %932 = vrot.lane.b32.xlu0 %v842_v17, %s4777_s6 }
  0x3f   : > { %1011 = vrot.lane.b32.xlu1 %v1009_v19, %s4762_s1  ;;  %1013 = vrot.lane.b32.xlu0 %v1010_v20, %s4762_s1  ;;  %s4779_s1 = smov 16  }
  0xa5   : > { %v1025_v22 = vpop.permute.xlu1 %1024  ;;  %v961_v23 = vpop.permute.xlu0 %960 }
  0xa6   : > { %v1026_v24 = vrot.slane %v1025_v22, 4  ;;  %v962_v25 = vrot.slane %v961_v23, 4 }
  0xa8   : > { %v1027_v26 = vsel %vm858_vm0, %v1026_v24, %v1025_v22  ;;  %v963_v27 = vsel %vm949_vm1, %v962_v25, %v961_v23 }
  0xa9   : > { %v904_v28 = vpop.permute.xlu1 %903  ;;  %v3745_v29 = vmul.f32 %v963_v27, %v3688_v13  ;;  %v1029_v30 = vmul.f32 %v1027_v26, %v3688_v13  ;;  %v988_v31 = vpop.permute.xlu0 %987 }
  0xaa   : > { %v989_v32 = vrot.slane %v988_v31, 4  ;;  %v905_v34 = vrot.slane %v904_v28, 4 }
  0xab   : > { %1032 = vrot.lane.b32.xlu1 %v1029_v30, %s4764_s10  ;;  %v968_v33 = vrot.slane %v3745_v29, 1  ;;  %v1031_v51 = vcombine.high %v1029_v30, %v1029_v30  ;;  %v967_v62 = vcombine.high %v3745_v29, %v3745_v29 }
  0xac   : > { %v990_v35 = vsel %vm4797_vm2, %v989_v32, %v988_v31  ;;  %v907_v41 = vsel %vm906_vm4, %v904_v28, %v905_v34 }
  0xad   : > { %v844_v36 = vpop.permute.xlu1 %843  ;;  %v992_v37 = vmul.f32 %v990_v35, %v3688_v13  ;;  %v933_v38 = vpop.permute.xlu0 %932  ;;  %v909_v49 = vmul.f32 %v907_v41, %v3688_v13  ;;  %v969_v0 = vrot.slane %v967_v62, 1 }
  0xae   : > { %v845_v39 = vrot.slane %v844_v36, 4  ;;  %v934_v40 = vrot.slane %v933_v38, 4 }
  0xaf   : > { %970 = vrot.lane.b32.xlu1 %v968_v33, %s4777_s6  ;;  %v994_v44 = vcombine.high %v992_v37, %v992_v37  ;;  %v915_v54 = vcombine.high %v909_v49, %v909_v49  ;;  %v995_v55 = vrot.slane %v992_v37, 6  ;;  %v916_v59 = vrot.slane %v909_v49, 2 }
  0xb0   : > { %v847_v42 = vsel %vm846_vm5, %v844_v36, %v845_v39  ;;  %v936_v47 = vsel %vm935_vm6, %v933_v38, %v934_v40 }
  0xb1   : > { %v849_v43 = vmul.f32 %v847_v42, %v3688_v13  ;;  %v1012_v45 = vpop.permute.xlu1 %1011  ;;  %v1014_v46 = vpop.permute.xlu0 %1013  ;;  %v938_v52 = vmul.f32 %v936_v47, %v3688_v13  ;;  %v996_v53 = vrot.slane %v994_v44, 6  ;;  %v917_v58 = vrot.slane %v915_v54, 2 }
  0xb2   : > { %v1016_v48 = vsel %vm1015_vm7, %v1012_v45, %v1014_v46  ;;  %1021 = vst.msk [vmem:[#allocation2 + $0x28] sm:$0xe0] %vm1020_vm8, %v1014_v46  ;;  %vm1042_vm8 = vcmask 1043320  }
  0xb3   : > { %854 = vrot.lane.b32.xlu0 %v849_v43, %s4770_s30  ;;  %v853_v50 = vcombine.high %v849_v43, %v849_v43  ;;  %1019 = vst [vmem:[#allocation2 + $0x20] sm:$0xe0] %v1016_v48  ;;  %1023 = vst.msk [vmem:[#allocation2 + $0x28] sm:$0xe0] %vm1022_vm9, %v3464_v21  ;;  %v942_v56 = vcombine.high %v938_v52, %v938_v52  ;;  %v943_v61 = vrot.slane %v938_v52, 7  ;;  %vm1005_vm9 = vcmask 921602  }
  0xb5   : > { %856 = vrot.lane.b32.xlu1 %v853_v50, %s4770_s30  ;;  %v944_v60 = vrot.slane %v942_v56, 7  ;;  %s4844_s30 = smov 111  }
  0xb7   : > { %1034 = vrot.lane.b32.xlu0 %v1031_v51, %s4764_s10  ;;  %s4848_s10 = sld [smem:[#allocation29_spill]] }
  0xb9   : > { %999 = vrot.lane.b32.xlu1 %v996_v53, %s4766_s0 }
  0xbb   : > { %997 = vrot.lane.b32.xlu0 %v995_v55, %s4766_s0  ;;  %s4841_s0 = smov 1  }
  0xbd   : > { %920 = vrot.lane.b32.xlu1 %v917_v58, %s4768_s9 }
  0xbf   : > { %918 = vrot.lane.b32.xlu0 %v916_v59, %s4768_s9  ;;  %s4837_s9 = sld [smem:[#allocation26_spill]] }
  0xc1   : > { %947 = vrot.lane.b32.xlu1 %v944_v60, %s4772_s7 }
  0xc3   : > { %945 = vrot.lane.b32.xlu0 %v943_v61, %s4772_s7  ;;  %s4842_s7 = smov 127  }
  0xc5   : > { %873 = vrot.lane.b32.xlu1 %v870_v63, %s4779_s1  ;;  %v817_v2 = vld [vmem:[%s4837_s9] sm:$0xff]  ;;  %s4847_s9 = smov 16  }
  0xc7   : > { %972 = vrot.lane.b32.xlu0 %v969_v0, %s4777_s6  ;;  %s4840_s6 = smov 15  }
  0xc9   : > { %1143 = vperm.xlu1 %3363, %v817_v2  }
  0xcb   : > { %871 = vrot.lane.b32.xlu0 %v869_v1, %s4779_s1  ;;  %s4845_s1 = sld [smem:[#allocation24_spill]] }
  0xcd   : > { %1286 = vrot.lane.b32.xlu1 %v3680_v11, %s4839_s5 }
  0xcf   : > { %1136 = vperm.xlu0 %3362, %v816_v6  }
  0xd1   : > { %1253 = vrot.lane.b32.xlu1 %v3693_v15, %s4840_s6  ;;  %v815_v36 = vld [vmem:[%s4845_s1] sm:$0xff]  ;;  %s4846_s1 = smov 112  }
  0xd3   : > { %1288 = vrot.lane.b32.xlu0 %v3683_v12, %s4839_s5 }
  0xd5   : > { %1231 = vrot.lane.b32.xlu1 %v3680_v11, %s4841_s0 }
  0xd7   : > { %1255 = vrot.lane.b32.xlu0 %v3696_v16, %s4840_s6 }
  0xd9   : > { %1207 = vrot.lane.b32.xlu1 %v3693_v15, %s4842_s7 }
  0xdb   : > { %1233 = vrot.lane.b32.xlu0 %v3683_v12, %s4841_s0 }
  0xdd   : > { %1185 = vrot.lane.b32.xlu1 %v3680_v11, %s4843_s29 }
  0xdf   : > { %1209 = vrot.lane.b32.xlu0 %v3696_v16, %s4842_s7 }
  0xe1   : > { %1150 = vrot.lane.b32.xlu1 %v3693_v15, %s4844_s30 }
  0xe3   : > { %1187 = vrot.lane.b32.xlu0 %v3683_v12, %s4843_s29 }
  0xe7   : > { %1152 = vrot.lane.b32.xlu0 %v3696_v16, %s4844_s30 }
 0x11d   : > { %v1033_v7 = vpop.permute.xlu1 %1032 }
 0x121   : > { %v971_v8 = vpop.permute.xlu1 %970 }
 0x125   : > { %v855_v9 = vpop.permute.xlu0 %854 }
 0x126   : > { %863 = vst.msk [vmem:[#allocation2] sm:$0x7] %vm862_vm15, %v855_v9  ;;  %vm953_vm15 = vcmask 1043465  }
 0x127   : > { %v857_v10 = vpop.permute.xlu1 %856 }
 0x128   : > { %v859_v13 = vsel %vm858_vm0, %v855_v9, %v857_v10 }
 0x129   : > { %864 = vst [vmem:[#allocation2 + $0x8] sm:$0x7] %v859_v13  ;;  %v1035_v11 = vpop.permute.xlu0 %1034 }
 0x12a   : > { %v1036_v12 = vsel %vm846_vm5, %v1033_v7, %v1035_v11  ;;  %1041 = vst.msk [vmem:[#allocation2 + $0x38] sm:$0x7] %vm1040_vm3, %v1035_v11  ;;  %vm978_vm3 = vcmask 1039367  }
 0x12b   : > { %1039 = vst [vmem:[#allocation2 + $0x30] sm:$0x7] %v1036_v12  ;;  %1043 = vst.msk [vmem:[#allocation2 + $0x38] sm:$0x7] %vm1042_vm8, %v3464_v21  ;;  %v1000_v14 = vpop.permute.xlu1 %999  ;;  %vm981_vm8 = vcmask 1033216  }
 0x12c   : > { %1006 = vst.msk [vmem:[#allocation2 + $0x28] sm:$0x1c] %vm1005_vm9, %v1000_v14  ;;  %vm983_vm9 = vcmask 1048575  }
 0x12d   : > { %1008 = vst.msk [vmem:[#allocation2 + $0x28] sm:$0x1c] %vm1007_vm10, %v3464_v21  ;;  %v998_v15 = vpop.permute.xlu0 %997  ;;  %vm985_vm10 = vcmask 1042424  }
 0x12e   : > { %v1001_v16 = vsel %vm906_vm4, %v998_v15, %v1000_v14 }
 0x12f   : > { %1004 = vst [vmem:[#allocation2 + $0x20] sm:$0x1c] %v1001_v16  ;;  %v921_v17 = vpop.permute.xlu1 %920  ;;  %v820_v16 = vld [vmem:[%s4848_s10] sm:$0xff]  ;;  %s4851_s10 = sld [smem:[#allocation30_spill]] }
 0x131   : > { %v919_v18 = vpop.permute.xlu0 %918 }
 0x132   : > { %v923_v19 = vsel %vm4797_vm2, %v919_v18, %v921_v17  ;;  %927 = vst.msk [vmem:[#allocation2] sm:$0xc0] %vm926_vm11, %v919_v18  ;;  %v1051_v20 = vld [vmem:[#allocation2 + $0x38] sm:$0x7]  ;;  %v1050_v22 = vld [vmem:[#allocation2 + $0x30] sm:$0x7] }
 0x133   : > { %930 = vst.msk [vmem:[#allocation2 + $0x10] sm:$0x1] %vm929_vm12, %v919_v18  ;;  %928 = vst [vmem:[#allocation2 + $0x18] ss:$-12 sps:$4 sm:$0xc1] %v923_v19   ;;  %3138 = vmatprep.subr.msk.mxu0 %vm1056_vm13, %v1051_v20  ;;  %v948_v23 = vpop.permute.xlu1 %947  ;;  %vm879_vm11 = vcmask 1045635  }
 0x134   : > { %3139 = vmatpush1.msk.msra.mxu0 %vm1056_vm13, %v1050_v22  ;;  %vm1052_vm12 = vcmask 220160   ;;  %vm1284_vm13 = vcmask 1048448  }
 0x135   : > { %v946_v24 = vpop.permute.xlu0 %945 }
 0x136   : > { %954 = vst.msk [vmem:[#allocation2 + $0x10] sm:$0xe] %vm953_vm15, %v946_v24  ;;  %v950_v25 = vsel %vm949_vm1, %v946_v24, %v948_v23  ;;  %vm1226_vm15 = vcmask 1047560  }
 0x137   : > { %955 = vst [vmem:[#allocation2 + $0x18] sm:$0xe] %v950_v25  ;;  %v874_v28 = vpop.permute.xlu1 %873 }
 0x139   : > { %v973_v26 = vpop.permute.xlu0 %972 }
 0x13a   : > { %v974_v27 = vsel %vm935_vm6, %v971_v8, %v973_v26  ;;  %979 = vst.msk [vmem:[#allocation2 + $0x18] sm:$0x80] %vm978_vm3, %v973_v26  ;;  %vm1306_vm3 = vcmask 1048440  }
 0x13b   : > { %982 = vst.msk [vmem:[#allocation2 + $0x28] sm:$0x3] %vm981_vm8, %v973_v26  ;;  %977 = vst [vmem:[#allocation2 + $0x20] ss:$-12 sps:$4 sm:$0x83] %v974_v27   ;;  %vm1273_vm8 = vcmask 1048456  }
 0x13c   : > { %984 = vst.msk [vmem:[#allocation2 + $0x18] sm:$0x80] %vm983_vm9, %v3464_v21  ;;  %vm1251_vm9 = vcmask 1048568  }
 0x13d   : > { %986 = vst.msk [vmem:[#allocation2 + $0x28] sm:$0x3] %vm985_vm10, %v3464_v21  ;;  %v872_v29 = vpop.permute.xlu0 %871  ;;  %vm1204_vm10 = vcmask 1047672  }
 0x13e   : > { %880 = vst.msk [vmem:[#allocation2] sm:$0x38] %vm879_vm11, %v872_v29  ;;  %v876_v30 = vsel %vm875_vm14, %v872_v29, %v874_v28  ;;  %vm1169_vm11 = vcmask 1047688  }
 0x13f   : > { %881 = vst [vmem:[#allocation2 + $0x8] sm:$0x38] %v876_v30 }
 0x142   : > { %v1048_v32 = vld [vmem:[#allocation2 + $0x20] sm:$0xff]  ;;  %v1046_v34 = vld [vmem:[#allocation2 + $0x10] sm:$0xff] }
 0x143   : > { %v1047_v33 = vld [vmem:[#allocation2 + $0x18] sm:$0xff] }
 0x144   : > { %v1049_v31 = vld [vmem:[#allocation2 + $0x28] sm:$0xff]  ;;  %v1144_v39 = vpop.permute.xlu1 %1143 }
 0x145   : > { %1089 = vmatprep.subr.mxu0 %v1049_v31  ;;  %v1044_v37 = vld [vmem:[#allocation2] sm:$0xff] }
 0x146   : > { %1090 = vmatpush1.msra.mxu0 %v1048_v32  ;;  %v1045_v35 = vld [vmem:[#allocation2 + $0x8] sm:$0xff] }
 0x147   : > { %1091 = vmatprep.subr.mxu0 %v1047_v33 }
 0x148   : > { %1092 = vmatpush1.msra.mxu0 %v1046_v34  ;;  %v1287_v41 = vpop.permute.xlu1 %1286 }
 0x149   : > { %1093 = vmatprep.subr.mxu0 %v1045_v35 }
 0x14a   : > { %1094 = vmatpush1.msra.mxu0 %v1044_v37  ;;  %v1137_v38 = vpop.permute.xlu0 %1136 }
 0x14b   : > { %3140 = vmatmul.mubr.msk.f32.vlgmr.msra.gmra.mxu0 %vm1052_vm12, %v815_v36  ;;  %1478 = vmatprep.subr.mxu0 %v3464_v21  ;;  %vm1616_vm12 = vcmask 523264  }
 0x14c   : > { %v1254_v43 = vpop.permute.xlu1 %1253 }
 0x14e   : > { %v1289_v40 = vpop.permute.xlu0 %1288 }
 0x14f   : > { %v1290_v60 = vsel %vm858_vm0, %v1287_v41, %v1289_v40 }
 0x150   : > { %v1232_v46 = vpop.permute.xlu1 %1231 }
 0x152   : > { %v1256_v42 = vpop.permute.xlu0 %1255 }
 0x153   : > { %v1257_v63 = vsel %vm4797_vm2, %v1254_v43, %v1256_v42 }
 0x154   : > { %v1208_v54 = vpop.permute.xlu1 %1207 }
 0x156   : > { %v1234_v45 = vpop.permute.xlu0 %1233 }
 0x157   : > { %v1235_v1 = vsel %vm949_vm1, %v1232_v46, %v1234_v45 }
 0x158   : > { %v1186_v4 = vpop.permute.xlu1 %1185 }
 0x15a   : > { %v1210_v53 = vpop.permute.xlu0 %1209 }
 0x15b   : > { %v1211_v56 = vsel %vm935_vm6, %v1208_v54, %v1210_v53 }
 0x15c   : > { %v1151_v13 = vpop.permute.xlu1 %1150 }
 0x15e   : > { %v1188_v2 = vpop.permute.xlu0 %1187 }
 0x15f   : > { %v1189_v7 = vsel %vm906_vm4, %v1186_v4, %v1188_v2  ;;  %v1429_v4 = vld [vmem:[%s4851_s10 + $0x50] sm:$0xff] }
 0x162   : > { %v1153_v10 = vpop.permute.xlu0 %1152 }
 0x163   : > { %v1154_v12 = vsel %vm846_vm5, %v1151_v13, %v1153_v10  ;;  %v1423_v13 = vld [vmem:[%s4851_s10 + $0x20] sm:$0xff] }
 0x20b   : > { %v1129_v44 = vpop.f32.mrf.mxu0 }
 0x20c   : > { %v1139_v47 = vmul.f32 %v1137_v38, %v1129_v44 }
 0x20d   : > { %v1131_v48 = vpop.f32.mrf.mxu0 }
 0x20e   : > { %v1146_v49 = vadd.f32 %v1144_v39, %v1139_v47  ;;  %v1140_v50 = vmul.f32 %v1137_v38, %v1131_v48 }
 0x210   : > { %v3831_v51 = vmax.f32 %v1146_v49, 0.0  ;;  %v1147_v52 = vadd.f32 %v1144_v39, %v1140_v50 }
 0x212   : > { %v3833_v55 = vmax.f32 %v1147_v52, 0.0  ;;  %1275 = vrot.lane.b32.xlu0 %v3831_v51, %s4846_s1  ;;  %v1293_v57 = vmul.f32 %v1287_v41, %v3831_v51  ;;  %v1214_v58 = vmul.f32 %v1211_v56, %v3831_v51  ;;  %v1260_v59 = vmul.f32 %v1254_v43, %v3831_v51 }
 0x213   : > { %v1238_v62 = vmul.f32 %v1232_v46, %v3831_v51  ;;  %v1192_v9 = vmul.f32 %v1189_v7, %v3831_v51  ;;  %v1157_v15 = vmul.f32 %v1154_v12, %v3831_v51  ;;  %v1427_v7 = vld [vmem:[%s4851_s10 + $0x40] sm:$0xff]  ;;  %v1421_v12 = vld [vmem:[%s4851_s10 + $0x10] sm:$0xff] }
 0x214   : > { %1277 = vrot.lane.b32.xlu1 %v3833_v55, %s4846_s1  ;;  %v1294_v61 = vmul.f32 %v1290_v60, %v3833_v55  ;;  %v1261_v0 = vmul.f32 %v1257_v63, %v3833_v55  ;;  %v1239_v6 = vmul.f32 %v1235_v1, %v3833_v55  ;;  %v1215_v8 = vmul.f32 %v1210_v53, %v3833_v55  ;;  %v1433_v53 = vld [vmem:[%s4851_s10 + $0x70] sm:$0xff]  ;;  %v1430_v1 = vld [vmem:[%s4851_s10 + $0x58] sm:$0xff] }
 0x215   : > { %v1193_v11 = vmul.f32 %v1188_v2, %v3833_v55  ;;  %v1158_v14 = vmul.f32 %v1153_v10, %v3833_v55  ;;  %v1424_v10 = vld [vmem:[%s4851_s10 + $0x28] sm:$0xff] }
 0x216   : > { %1297 = vrot.lane.b32.xlu0 %v1293_v57, %s4844_s30  ;;  %v1432_v57 = vld [vmem:[%s4851_s10 + $0x68] sm:$0xff] }
 0x218   : > { %1219 = vrot.lane.b32.xlu1 %v1214_v58, %s4841_s0 }
 0x21a   : > { %1264 = vrot.lane.b32.xlu0 %v1260_v59, %s4843_s29 }
 0x21c   : > { %1299 = vrot.lane.b32.xlu1 %v1294_v61, %s4844_s30  ;;  %s4859_s30 = smov 119  }
 0x21e   : > { %1242 = vrot.lane.b32.xlu0 %v1238_v62, %s4842_s7  ;;  %v1431_v62 = vld [vmem:[%s4851_s10 + $0x60] sm:$0xff] }
 0x220   : > { %1266 = vrot.lane.b32.xlu1 %v1261_v0, %s4843_s29  ;;  %s4788_s29 = smov 120  }
 0x222   : > { %1177 = vrot.lane.b32.xlu0 %v3833_v55, %s4847_s9 }
 0x224   : > { %1244 = vrot.lane.b32.xlu1 %v1239_v6, %s4842_s7  ;;  %v1428_v6 = vld [vmem:[%s4851_s10 + $0x48] sm:$0xff] }
 0x226   : > { %1221 = vrot.lane.b32.xlu0 %v1215_v8, %s4841_s0  ;;  %v1426_v8 = vld [vmem:[%s4851_s10 + $0x38] sm:$0xff] }
 0x228   : > { %1197 = vrot.lane.b32.xlu1 %v1192_v9, %s4840_s6  ;;  %v1425_v9 = vld [vmem:[%s4851_s10 + $0x30] sm:$0xff] }
 0x22a   : > { %1199 = vrot.lane.b32.xlu0 %v1193_v11, %s4840_s6  ;;  %s4849_s6 = sld [smem:[#allocation28_spill]]  ;;  %v1422_v11 = vld [vmem:[%s4851_s10 + $0x18] sm:$0xff] }
 0x22c   : > { %1175 = vrot.lane.b32.xlu1 %v3831_v51, %s4847_s9  ;;  %s3902_s9 = sand.u32 1, %s3447_s3   ;;  %s4810_s3 = smov 123  }
 0x22e   : > { %1164 = vrot.lane.b32.xlu0 %v1158_v14, %s4839_s5  ;;  %v1420_v14 = vld [vmem:[%s4851_s10 + $0x8] sm:$0xff] }
 0x230   : > { %1162 = vrot.lane.b32.xlu1 %v1157_v15, %s4839_s5  ;;  %v819_v17 = vld [vmem:[%s4849_s6] sm:$0xff]  ;;  %s4850_s5 = sld [smem:[#allocation27_spill]]  ;;  %s4791_s6 = smov 7  }
 0x231   : > { %v1419_v15 = vld [vmem:[%s4851_s10] sm:$0xff] }
 0x232   : > { %1410 = vperm.xlu0 %3362, %v820_v16   ;;  %v1448_v16 = vld [vmem:[%s4851_s10 + $0xe8] sm:$0x7f] }
 0x234   : > { %1403 = vperm.xlu1 %3363, %v819_v17   ;;  %v1447_v17 = vld [vmem:[%s4851_s10 + $0xe0] sm:$0xff] }
 0x236   : > { %v818_v50 = vld [vmem:[%s4850_s5] sm:$0xff]  ;;  %s4783_s5 = sshll.u32 %s3902_s9, 4 }
 0x237   : > { %s3935_s26 = scalar_lea.vmem [#allocation8], %s4783_s5  ;;  %s4852_s5 = sld [smem:[#allocation31_spill]] }
 0x284   : > { %v1276_v18 = vpop.permute.xlu0 %1275 }
 0x286   : > { %v1278_v19 = vpop.permute.xlu1 %1277 }
 0x287   : > { %v1279_v20 = vsel %vm1015_vm7, %v1276_v18, %v1278_v19  ;;  %1283 = vst.msk [vmem:[#allocation3 + $0x78] sm:$0xff] %vm1015_vm7, %v1278_v19  ;;  %v1446_v18 = vld [vmem:[%s4851_s10 + $0xd8] sm:$0xff]  ;;  %v1445_v19 = vld [vmem:[%s4851_s10 + $0xd0] sm:$0xff] }
 0x288   : > { %1285 = vst.msk [vmem:[#allocation3 + $0x78] sm:$0xff] %vm1284_vm13, %v3464_v21  ;;  %v1298_v22 = vpop.permute.xlu0 %1297  ;;  %vm1572_vm13 = vcmask 72704  }
 0x289   : > { %1573 = vst.msk [vmem:[#allocation4] sm:$0xff] %vm1572_vm13, %v3464_v21  ;;  %1779 = vst.msk [vmem:[#allocation5] sm:$0xff] %vm1572_vm13, %v3464_v21 }
 0x28a   : > { %v1220_v23 = vpop.permute.xlu1 %1219  ;;  %1780 = vst.msk [vmem:[#allocation5 + $0x8] sm:$0xff] %vm1572_vm13, %v3464_v21  ;;  %vm1614_vm13 = vcmask 523272  }
 0x28b   : > { %1227 = vst.msk [vmem:[#allocation3 + $0x30] sm:$0xff] %vm1226_vm15, %v1220_v23  ;;  %vm1647_vm15 = vcmask 523712  }
 0x28c   : > { %v1265_v24 = vpop.permute.xlu0 %1264 }
 0x28e   : > { %v1300_v25 = vpop.permute.xlu1 %1299 }
 0x28f   : > { %v1301_v26 = vsel %vm846_vm5, %v1298_v22, %v1300_v25  ;;  %1305 = vst.msk [vmem:[#allocation3 + $0x88] sm:$0xff] %vm846_vm5, %v1300_v25  ;;  %v1323_v34 = vld [vmem:[#allocation3 + $0x78] sm:$0xff]  ;;  %v1443_v22 = vld [vmem:[%s4851_s10 + $0xc0] sm:$0xff]  ;;  %v1440_v25 = vld [vmem:[%s4851_s10 + $0xa8] sm:$0xff] }
 0x290   : > { %1307 = vst.msk [vmem:[#allocation3 + $0x88] sm:$0xff] %vm1306_vm3, %v3464_v21  ;;  %v1243_v27 = vpop.permute.xlu0 %1242  ;;  %vm1657_vm3 = vcmask 449536  }
 0x292   : > { %v1267_v28 = vpop.permute.xlu1 %1266  ;;  %v1314_v47 = vld [vmem:[#allocation3 + $0x30] sm:$0xff] }
 0x293   : > { %v1268_v29 = vsel %vm906_vm4, %v1265_v24, %v1267_v28  ;;  %1272 = vst.msk [vmem:[#allocation3 + $0x68] sm:$0xff] %vm906_vm4, %v1267_v28  ;;  %vm1182_vm4 = vcmask 1047680   ;;  %v1441_v24 = vld [vmem:[%s4851_s10 + $0xb0] sm:$0xff] }
 0x294   : > { %1274 = vst.msk [vmem:[#allocation3 + $0x68] sm:$0xff] %vm1273_vm8, %v3464_v21  ;;  %v1178_v30 = vpop.permute.xlu0 %1177  ;;  %v1437_v28 = vld [vmem:[%s4851_s10 + $0x90] sm:$0xff]  ;;  %vm1659_vm8 = vcmask 523704  }
 0x296   : > { %v1245_v31 = vpop.permute.xlu1 %1244 }
 0x297   : > { %v1246_v32 = vsel %vm935_vm6, %v1243_v27, %v1245_v31  ;;  %1250 = vst.msk [vmem:[#allocation3 + $0x58] sm:$0xff] %vm935_vm6, %v1245_v31  ;;  %v1325_v33 = vld [vmem:[#allocation3 + $0x88] sm:$0xff]  ;;  %v1438_v27 = vld [vmem:[%s4851_s10 + $0x98] sm:$0xff] }
 0x298   : > { %1252 = vst.msk [vmem:[#allocation3 + $0x58] sm:$0xff] %vm1251_vm9, %v3464_v21  ;;  %v1222_v35 = vpop.permute.xlu0 %1221  ;;  %1344 = vmatprep.subr.mxu1 %v1325_v33  ;;  %v1548_v33 = vld [vmem:[%s4852_s5] sm:$0x3]  ;;  %vm1626_vm9 = vcmask 515072   ;;  %s4804_s5 = smov 125  }
 0x299   : > { %v1223_v36 = vsel %vm949_vm1, %v1220_v23, %v1222_v35  ;;  %1345 = vmatpush1.msra.mxu1 %v1301_v26  ;;  %vm1326_vm1 = vcmask 588800   ;;  %v1442_v23 = vld [vmem:[%s4851_s10 + $0xb8] sm:$0xff]  ;;  %v1439_v26 = vld [vmem:[%s4851_s10 + $0xa0] sm:$0xff] }
 0x29a   : > { %1346 = vmatprep.subr.mxu1 %v1323_v34  ;;  %v1198_v37 = vpop.permute.xlu1 %1197 }
 0x29b   : > { %1205 = vst.msk [vmem:[#allocation3 + $0x20] sm:$0xff] %vm1204_vm10, %v1198_v37  ;;  %1347 = vmatpush1.msra.mxu1 %v1279_v20  ;;  %v1321_v38 = vld [vmem:[#allocation3 + $0x68] sm:$0xff]  ;;  %vm1628_vm10 = vcmask 523768  }
 0x29c   : > { %v1200_v39 = vpop.permute.xlu0 %1199  ;;  %1348 = vmatprep.subr.mxu1 %v1321_v38  ;;  %v1444_v20 = vld [vmem:[%s4851_s10 + $0xc8] sm:$0xff]  ;;  %v1591_v38 = vrot.slane %v1548_v33, %v3669_v3 }
 0x29d   : > { %v1201_v40 = vsel %vm4797_vm2, %v1198_v37, %v1200_v39  ;;  %1349 = vmatpush1.msra.mxu1 %v1268_v29  ;;  %v1436_v29 = vld [vmem:[%s4851_s10 + $0x88] sm:$0xff]  ;;  %v1566_v37 = vrot.slane %v1548_v33, %v3671_v5  ;;  %vm1586_vm2 = vcmask 523328  }
 0x29e   : > { %v1176_v41 = vpop.permute.xlu1 %1175 }
 0x29f   : > { %v1179_v42 = vsel %vm875_vm14, %v1176_v41, %v1178_v30  ;;  %1183 = vst.msk [vmem:[#allocation3 + $0x10] sm:$0xff] %vm1182_vm4, %v1176_v41  ;;  %v1319_v43 = vld [vmem:[#allocation3 + $0x58] sm:$0xff]  ;;  %v1435_v30 = vld [vmem:[%s4851_s10 + $0x80] sm:$0xff]  ;;  %vm1638_vm4 = vcmask 465920  }
 0x2a0   : > { %1350 = vmatprep.subr.mxu1 %v1319_v43  ;;  %v1165_v44 = vpop.permute.xlu0 %1164 }
 0x2a1   : > { %1351 = vmatpush1.msra.mxu1 %v1246_v32 }
 0x2a2   : > { %1352 = vmatprep.subr.mxu1 %v3833_v55  ;;  %v1163_v45 = vpop.permute.xlu1 %1162  ;;  %v1312_v48 = vld [vmem:[#allocation3 + $0x20] sm:$0xff] }
 0x2a3   : > { %v1166_v46 = vsel %vm858_vm0, %v1163_v45, %v1165_v44  ;;  %1170 = vst.msk [vmem:[#allocation3] sm:$0xff] %vm1169_vm11, %v1163_v45  ;;  %1353 = vmatpush1.msra.mxu1 %v3831_v51  ;;  %v1434_v51 = vld [vmem:[%s4851_s10 + $0x78] sm:$0xff]  ;;  %vm1474_vm0 = vcmask 1046528   ;;  %s4854_s10 = sld [smem:[#allocation32_spill]]  ;;  %vm1640_vm11 = vcmask 523720  }
 0x2a4   : > { %1354 = vmatprep.subr.mxu1 %v1223_v36  ;;  %1479 = vmatpush1.msra.mxu0 %v1434_v51 }
 0x2a5   : > { %1355 = vmatpush1.msra.mxu1 %v1314_v47  ;;  %1480 = vmatprep.subr.mxu0 %v3464_v21 }
 0x2a6   : > { %1356 = vmatprep.subr.mxu1 %v1201_v40  ;;  %v1310_v49 = vld [vmem:[#allocation3 + $0x10] sm:$0xff]  ;;  %1481 = vmatpush1.msra.mxu0 %v1433_v53 }
 0x2a7   : > { %1357 = vmatpush1.msra.mxu1 %v1312_v48  ;;  %1482 = vmatprep.subr.mxu0 %v3464_v21 }
 0x2a8   : > { %1358 = vmatprep.subr.mxu1 %v1179_v42  ;;  %1483 = vmatpush1.msra.mxu0 %v1432_v57 }
 0x2a9   : > { %1359 = vmatpush1.msra.mxu1 %v1310_v49  ;;  %1484 = vmatprep.subr.mxu0 %v3464_v21 }
 0x2aa   : > { %1360 = vmatprep.subr.mxu1 %v1166_v46  ;;  %v1308_v52 = vld [vmem:[#allocation3] sm:$0xff]  ;;  %1485 = vmatpush1.msra.mxu0 %v1431_v62  ;;  %v1554_v62 = vld [vmem:[%s4744_s12 + $0x8] sm:$0xff] }
 0x2ab   : > { %1361 = vmatpush1.msra.mxu1 %v1308_v52  ;;  %1486 = vmatprep.subr.mxu0 %v3464_v21 }
 0x2ac   : > { %3141 = vmatmul.mubr.msk.f32.vlgmr.msra.gmra.mxu1 %vm1326_vm1, %v818_v50  ;;  %1487 = vmatpush1.msra.mxu0 %v1430_v1 }
 0x2ad   : > { %v1411_v58 = vpop.permute.xlu0 %1410  ;;  %1488 = vmatprep.subr.mxu0 %v3464_v21 }
 0x2ae   : > { %1489 = vmatpush1.msra.mxu0 %v1429_v4 }
 0x2af   : > { %v1404_v54 = vpop.permute.xlu1 %1403  ;;  %1490 = vmatprep.subr.mxu0 %v3464_v21 }
 0x2b0   : > { %1491 = vmatpush1.msra.mxu0 %v1428_v6 }
 0x2b1   : > { %1492 = vmatprep.subr.mxu0 %v3464_v21 }
 0x2b2   : > { %1493 = vmatpush1.msra.mxu0 %v1427_v7 }
 0x2b3   : > { %1494 = vmatprep.subr.mxu0 %v3464_v21 }
 0x2b4   : > { %1495 = vmatpush1.msra.mxu0 %v1426_v8 }
 0x2b5   : > { %1496 = vmatprep.subr.mxu0 %v3464_v21 }
 0x2b6   : > { %1497 = vmatpush1.msra.mxu0 %v1425_v9 }
 0x2b7   : > { %1498 = vmatprep.subr.mxu0 %v3464_v21 }
 0x2b8   : > { %1499 = vmatpush1.msra.mxu0 %v1424_v10 }
 0x2b9   : > { %1500 = vmatprep.subr.mxu0 %v3464_v21 }
 0x2ba   : > { %1501 = vmatpush1.msra.mxu0 %v1423_v13 }
 0x2bb   : > { %1502 = vmatprep.subr.mxu0 %v3464_v21 }
 0x2bc   : > { %1503 = vmatpush1.msra.mxu0 %v1422_v11 }
 0x2bd   : > { %1504 = vmatprep.subr.mxu0 %v3464_v21 }
 0x2be   : > { %1505 = vmatpush1.msra.mxu0 %v1421_v12 }
 0x2bf   : > { %1506 = vmatprep.subr.mxu0 %v3464_v21 }
 0x2c0   : > { %1507 = vmatpush1.msra.mxu0 %v1420_v14 }
 0x2c1   : > { %1508 = vmatprep.subr.mxu0 %v3464_v21 }
 0x2c2   : > { %1509 = vmatpush1.msra.mxu0 %v1419_v15 }
 0x2c3   : > { %1514 = vmatprep.subr.mxu0 %v3464_v21 }
 0x2c4   : > { %3142 = vmatpush2.msk.msra.mxu0 %vm1474_vm0, %v1448_v16 }
 0x2c5   : > { %1516 = vmatprep.subr.mxu0 %v3464_v21 }
 0x2c6   : > { %1517 = vmatpush2.msra.mxu0 %v1447_v17 }
 0x2c7   : > { %1518 = vmatprep.subr.mxu0 %v3464_v21 }
 0x2c8   : > { %1519 = vmatpush2.msra.mxu0 %v1446_v18  ;;  %v1550_v18 = vld [vmem:[%s4854_s10 + $0x8] sm:$0xff] }
 0x2c9   : > { %1520 = vmatprep.subr.mxu0 %v3464_v21 }
 0x2ca   : > { %1521 = vmatpush2.msra.mxu0 %v1445_v19 }
 0x2cb   : > { %1522 = vmatprep.subr.mxu0 %v3464_v21 }
 0x2cc   : > { %1523 = vmatpush2.msra.mxu0 %v1444_v20 }
 0x2cd   : > { %1524 = vmatprep.subr.mxu0 %v3464_v21 }
 0x2ce   : > { %1525 = vmatpush2.msra.mxu0 %v1443_v22 }
 0x2cf   : > { %1526 = vmatprep.subr.mxu0 %v3464_v21 }
 0x2d0   : > { %1527 = vmatpush2.msra.mxu0 %v1442_v23 }
 0x2d1   : > { %1528 = vmatprep.subr.mxu0 %v3464_v21 }
 0x2d2   : > { %1529 = vmatpush2.msra.mxu0 %v1441_v24 }
 0x2d3   : > { %1530 = vmatprep.subr.mxu0 %v3464_v21 }
 0x2d4   : > { %1531 = vmatpush2.msra.mxu0 %v1440_v25 }
 0x2d5   : > { %1532 = vmatprep.subr.mxu0 %v3464_v21 }
 0x2d6   : > { %1533 = vmatpush2.msra.mxu0 %v1439_v26 }
 0x2d7   : > { %1534 = vmatprep.subr.mxu0 %v3464_v21 }
 0x2d8   : > { %1535 = vmatpush2.msra.mxu0 %v1438_v27 }
 0x2d9   : > { %1536 = vmatprep.subr.mxu0 %v3464_v21 }
 0x2da   : > { %1537 = vmatpush2.msra.mxu0 %v1437_v28 }
 0x2db   : > { %1538 = vmatprep.subr.mxu0 %v3464_v21 }
 0x2dc   : > { %1539 = vmatpush2.msra.mxu0 %v1436_v29 }
 0x2dd   : > { %1540 = vmatprep.subr.mxu0 %v3464_v21 }
 0x2de   : > { %1541 = vmatpush2.msra.mxu0 %v1435_v30 }
 0x36c   : > { %v1396_v55 = vpop.f32.mrf.mxu1 }
 0x36d   : > { %v1406_v56 = vmul.f32 %v1404_v54, %v1396_v55 }
 0x36e   : > { %v1398_v59 = vpop.f32.mrf.mxu1 }
 0x36f   : > { %v1413_v60 = vadd.f32 %v1411_v58, %v1406_v56  ;;  %v1407_v61 = vmul.f32 %v1404_v54, %v1398_v59  ;;  %v1549_v59 = vld [vmem:[%s4854_s10] sm:$0xff]  ;;  %s4806_s10 = smov 5  }
 0x370   : > { %3261 = vmatprep.mubr.msk.f32.mxu1 %vm1326_vm1, %v1549_v59 }
 0x371   : > { %v3919_v63 = vmax.f32 %v1413_v60, 0.0  ;;  %v1414_v0 = vadd.f32 %v1411_v58, %v1407_v61  ;;  %v1551_v58 = vld [vmem:[%s4853_s11] sm:$0xff]  ;;  %v1552_v60 = vld [vmem:[%s4853_s11 + $0x8] sm:$0xff] }
 0x372   : > { %v1553_v61 = vld [vmem:[%s4744_s12] sm:$0xff] }
 0x373   : > { %v3925_v2 = vmax.f32 %v1414_v0, 0.0  ;;  %1451 = vrot.lane.b32.xlu1 %v3919_v63, %s4846_s1  ;;  %1417 = vst [vmem:[%s3935_s26] sm:$0xff] %v3919_v63 }
 0x375   : > { %1453 = vrot.lane.b32.xlu0 %v3925_v2, %s4846_s1  ;;  %1418 = vst [vmem:[%s3935_s26 + $0x8] sm:$0xff] %v3925_v2  ;;  %s4786_s1 = smov 121  }
 0x3e5   : > { %v1452_v31 = vpop.permute.xlu1 %1451 }
 0x3e7   : > { %v1454_v32 = vpop.permute.xlu0 %1453 }
 0x3e8   : > { %v1455_v34 = vsel %vm1015_vm7, %v1452_v31, %v1454_v32  ;;  %v1459_v35 = vmax.f32 %v3925_v2, %v1454_v32  ;;  %vm1597_vm7 = vcmask 56320  }
 0x3e9   : > { %v1458_v36 = vmax.f32 %v3919_v63, %v1455_v34  ;;  %1598 = vst.msk [vmem:[#allocation4 + $0x10] sm:$0xff] %vm1597_vm7, %v3464_v21  ;;  %1805 = vst.msk [vmem:[#allocation5 + $0x20] sm:$0xff] %vm1597_vm7, %v3464_v21 }
 0x3ea   : > { %1464 = vrot.lane.b32.xlu0 %v1459_v35, %s4842_s7  ;;  %1806 = vst.msk [vmem:[#allocation5 + $0x28] sm:$0xff] %vm1597_vm7, %v3464_v21  ;;  %vm1603_vm7 = vcmask 523320  }
 0x3eb   : > { %1462 = vrot.lane.b32.xlu1 %v1458_v36, %s4842_s7 }
 0x3ee   : > { %1630 = vrot.lane.b32.xlu0 %v1566_v37, %s4791_s6 }
 0x3ef   : > { %1649 = vrot.lane.b32.xlu1 %v1591_v38, %s4795_s27 }
 0x3f2   : > { %1605 = vrot.lane.b32.xlu0 %v1566_v37, %s4842_s7 }
 0x3f3   : > { %1618 = vrot.lane.b32.xlu1 %v1591_v38, %s4841_s0 }
 0x3f6   : > { %1568 = vrot.lane.b32.xlu0 %v1566_v37, %s4784_s28 }
 0x3f7   : > { %1593 = vrot.lane.b32.xlu1 %v1591_v38, %s4786_s1 }
 0x45c   : > { %v1465_v39 = vpop.permute.xlu0 %1464 }
 0x45d   : > { %v1470_v40 = vmax.f32 %v1459_v35, %v1465_v39  ;;  %v1463_v41 = vpop.permute.xlu1 %1462 }
 0x45e   : > { %v1466_v42 = vsel %vm935_vm6, %v1463_v41, %v1465_v39  ;;  %vm1645_vm6 = vcmask 457728  }
 0x45f   : > { %v1469_v43 = vmax.f32 %v1458_v36, %v1466_v42  ;;  %3143 = vmatprep.mubr.msk.f32.mxu0 %vm846_vm5, %v1470_v40  ;;  %vm1580_vm5 = vcmask 64512  }
 0x460   : > { %v4061_v45 = vpop.permute.xlu0 %1630  ;;  %1581 = vst.msk [vmem:[#allocation4 + $0x8] sm:$0xff] %vm1580_vm5, %v3464_v21  ;;  %1791 = vst.msk [vmem:[#allocation5 + $0x10] sm:$0xff] %vm1580_vm5, %v3464_v21 }
 0x461   : > { %1543 = vmatmul.mubr.f32.vlgmr.msra.gmra.mxu0 %v1469_v43  ;;  %v4059_v44 = vpop.permute.xlu1 %1649  ;;  %1792 = vst.msk [vmem:[#allocation5 + $0x18] sm:$0xff] %vm1580_vm5, %v3464_v21  ;;  %vm1578_vm5 = vcmask 523336  }
 0x464   : > { %v4074_v49 = vpop.permute.xlu0 %1605 }
 0x465   : > { %v4066_v46 = vpop.permute.xlu1 %1618 }
 0x468   : > { %v4087_v55 = vpop.permute.xlu0 %1568 }
 0x469   : > { %v4081_v51 = vpop.permute.xlu1 %1593 }
 0x521   : > { %v1544_v47 = vpop.f32.mrf.mxu0 }
 0x522   : > { %1617 = vst.msk [vmem:[#allocation4 + $0x20] sm:$0xff] %vm1616_vm12, %v1544_v47  ;;  %1642 = vrot.lane.b32.xlu0 %v1544_v47, %s4788_s29  ;;  %v1652_v48 = vmul.f32 %v4059_v44, %v1544_v47  ;;  %v1621_v52 = vmul.f32 %v4066_v46, %v1544_v47  ;;  %v1633_v53 = vmul.f32 %v4061_v45, %v1544_v47  ;;  %s4858_s29 = smov 9  }
 0x523   : > { %v1546_v50 = vpop.f32.mrf.mxu0  ;;  %v1596_v54 = vmul.f32 %v4081_v51, %v1544_v47  ;;  %v1608_v56 = vmul.f32 %v4074_v49, %v1544_v47  ;;  %v1571_v57 = vmul.f32 %v4087_v55, %v1544_v47 }
 0x524   : > { %1654 = vrot.lane.b32.xlu1 %v1652_v48, %s4784_s28  ;;  %s4798_s28 = smov 8   ;;  %v1562_v48 = vld [vmem:[%s4747_s15 + $0x8] sm:$0xff] }
 0x526   : > { %1623 = vrot.lane.b32.xlu0 %v1621_v52, %s4842_s7 }
 0x528   : > { %1635 = vrot.lane.b32.xlu1 %v1633_v53, %s4786_s1  ;;  %s4857_s1 = smov 7  }
 0x529   : > { %v1665_v12 = vld [vmem:[#allocation4 + $0x20] sm:$0xff] }
 0x52a   : > { %1600 = vrot.lane.b32.xlu0 %v1596_v54, %s4791_s6  ;;  %s4855_s6 = smov 120  }
 0x52c   : > { %1611 = vrot.lane.b32.xlu1 %v1608_v56, %s4841_s0 }
 0x52e   : > { %1575 = vrot.lane.b32.xlu0 %v1571_v57, %s4795_s27  ;;  %s4856_s27 = smov 121  }
 0x530   : > { %1583 = vrot.lane.b32.xlu1 %v1544_v47, %s4798_s28  ;;  %v1560_v47 = vld [vmem:[%s4746_s14 + $0x8] sm:$0xff] }
 0x532   : > { %1753 = vperm.xlu0 %3362, %v1551_v58  }
 0x534   : > { %1758 = vperm.xlu1 %3363, %v1552_v60  }
 0x536   : > { %1765 = vperm.xlu0 %3362, %v1553_v61  }
 0x538   : > { %1770 = vperm.xlu1 %3363, %v1554_v62  }
 0x594   : > { %v1643_v63 = vpop.permute.xlu0 %1642 }
 0x595   : > { %1646 = vst.msk [vmem:[#allocation4 + $0x38] sm:$0xff] %vm1645_vm6, %v1643_v63 }
 0x596   : > { %1648 = vst.msk [vmem:[#allocation4 + $0x38] sm:$0xff] %vm1647_vm15, %v3464_v21  ;;  %v1655_v0 = vpop.permute.xlu1 %1654 }
 0x597   : > { %1658 = vst.msk [vmem:[#allocation4 + $0x40] sm:$0xff] %vm1657_vm3, %v1655_v0 }
 0x598   : > { %1660 = vst.msk [vmem:[#allocation4 + $0x40] sm:$0xff] %vm1659_vm8, %v3464_v21  ;;  %v1624_v1 = vpop.permute.xlu0 %1623 }
 0x599   : > { %1627 = vst.msk [vmem:[#allocation4 + $0x28] sm:$0xff] %vm1626_vm9, %v1624_v1 }
 0x59a   : > { %1629 = vst.msk [vmem:[#allocation4 + $0x28] sm:$0xff] %vm1628_vm10, %v3464_v21  ;;  %v1636_v2 = vpop.permute.xlu1 %1635 }
 0x59b   : > { %1639 = vst.msk [vmem:[#allocation4 + $0x30] sm:$0xff] %vm1638_vm4, %v1636_v2 }
 0x59c   : > { %1641 = vst.msk [vmem:[#allocation4 + $0x30] sm:$0xff] %vm1640_vm11, %v3464_v21  ;;  %v1601_v4 = vpop.permute.xlu0 %1600 }
 0x59d   : > { %1604 = vst.msk [vmem:[#allocation4 + $0x10] sm:$0xff] %vm1603_vm7, %v1601_v4  ;;  %v1668_v8 = vld [vmem:[#allocation4 + $0x38] sm:$0xff] }
 0x59e   : > { %v1612_v6 = vpop.permute.xlu1 %1611 }
 0x59f   : > { %1615 = vst.msk [vmem:[#allocation4 + $0x18] sm:$0xff] %vm1614_vm13, %v1612_v6  ;;  %v1669_v7 = vld [vmem:[#allocation4 + $0x40] sm:$0xff] }
 0x5a0   : > { %v1576_v9 = vpop.permute.xlu0 %1575  ;;  %3243 = vmatprep.subr.mxu1 %v1669_v7 }
 0x5a1   : > { %1579 = vst.msk [vmem:[#allocation4] sm:$0xff] %vm1578_vm5, %v1576_v9  ;;  %3244 = vmatpush3.msra.mxu1 %v1669_v7  ;;  %v1666_v11 = vld [vmem:[#allocation4 + $0x28] sm:$0xff] }
 0x5a2   : > { %3245 = vmatprep.subr.mxu1 %v1668_v8  ;;  %v1584_v10 = vpop.permute.xlu1 %1583 }
 0x5a3   : > { %1587 = vst.msk [vmem:[#allocation4 + $0x8] sm:$0xff] %vm1586_vm2, %v1584_v10  ;;  %3246 = vmatpush3.msra.mxu1 %v1668_v8  ;;  %v1667_v13 = vld [vmem:[#allocation4 + $0x30] sm:$0xff] }
 0x5a4   : > { %3247 = vmatprep.subr.mxu1 %v1667_v13  ;;  %v1663_v15 = vld [vmem:[#allocation4 + $0x10] sm:$0xff] }
 0x5a5   : > { %3248 = vmatpush3.msra.mxu1 %v1667_v13 }
 0x5a6   : > { %3249 = vmatprep.subr.mxu1 %v1666_v11  ;;  %v1664_v14 = vld [vmem:[#allocation4 + $0x18] sm:$0xff] }
 0x5a7   : > { %3250 = vmatpush3.msra.mxu1 %v1666_v11 }
 0x5a8   : > { %3251 = vmatprep.subr.mxu1 %v1665_v12  ;;  %v1661_v17 = vld [vmem:[#allocation4] sm:$0xff] }
 0x5a9   : > { %3252 = vmatpush3.msra.mxu1 %v1665_v12 }
 0x5aa   : > { %3253 = vmatprep.subr.mxu1 %v1664_v14  ;;  %v1662_v16 = vld [vmem:[#allocation4 + $0x8] sm:$0xff] }
 0x5ab   : > { %3254 = vmatpush3.msra.mxu1 %v1664_v14 }
 0x5ac   : > { %3255 = vmatprep.subr.mxu1 %v1663_v15 }
 0x5ad   : > { %3256 = vmatpush3.msra.mxu1 %v1663_v15  ;;  %v1754_v20 = vpop.permute.xlu0 %1753 }
 0x5ae   : > { %3257 = vmatprep.subr.mxu1 %v1662_v16 }
 0x5af   : > { %3258 = vmatpush3.msra.mxu1 %v1662_v16  ;;  %v1759_v19 = vpop.permute.xlu1 %1758 }
 0x5b0   : > { %3259 = vmatprep.subr.mxu1 %v1661_v17 }
 0x5b1   : > { %3260 = vmatpush3.msra.mxu1 %v1661_v17  ;;  %v1766_v28 = vpop.permute.xlu0 %1765 }
 0x5b2   : > { %3262 = vmatmul.mubr.msk.f32.vlgmr.msra.gmra.mxu1 %vm1326_vm1, %v1550_v18  ;;  %1909 = vmatprep.subr.mxu1 %v3464_v21  ;;  %vm2184_vm1 = vcmask 31744  }
 0x5b3   : > { %v1771_v24 = vpop.permute.xlu1 %1770  ;;  %2186 = vst.msk [vmem:[#allocation6 + $0x18] sm:$0xff] %vm2184_vm1, %v3464_v21  ;;  %2185 = vst.msk [vmem:[#allocation6 + $0x10] sm:$0xff] %vm2184_vm1, %v3464_v21 }
 0x5b4   : > { %2505 = vst.msk [vmem:[#allocation7 + $0x20] sm:$0xff] %vm2184_vm1, %v3464_v21  ;;  %2506 = vst.msk [vmem:[#allocation7 + $0x28] sm:$0xff] %vm2184_vm1, %v3464_v21 }
 0x5b5   : > { %2507 = vst.msk [vmem:[#allocation7 + $0x30] sm:$0xff] %vm2184_vm1, %v3464_v21  ;;  %2508 = vst.msk [vmem:[#allocation7 + $0x38] sm:$0xff] %vm2184_vm1, %v3464_v21  ;;  %vm2729_vm1 = vcmask 261120  }
 0x672   : > { %v3263_v22 = vpop.f32.mrf.mxu1 }
 0x673   : > { %v1762_v23 = vmul.f32 %v3263_v22, %v1759_v19  ;;  %v1555_v22 = vld [vmem:[%s4745_s13] sm:$0xff] }
 0x674   : > { %v1742_v25 = vpop.f32.mrf.mxu1 }
 0x675   : > { %v1774_v26 = vadd.f32 %v1771_v24, %v1762_v23  ;;  %v1761_v27 = vmul.f32 %v1754_v20, %v1742_v25  ;;  %v1558_v23 = vld [vmem:[%s4745_s13 + $0x18] sm:$0xff]  ;;  %v1557_v24 = vld [vmem:[%s4745_s13 + $0x10] sm:$0xff] }
 0x677   : > { %v1776_v29 = vmax.f32 %v1774_v26, 0.0  ;;  %v1773_v30 = vadd.f32 %v1766_v28, %v1761_v27  ;;  %v2018_v28 = vld [vmem:[%s4748_s16 + $0x30] sm:$0x7f] }
 0x678   : > { %3264 = vmatprep.subr.msk.mxu0 %vm1474_vm0, %v2018_v28 }
 0x679   : > { %1832 = vst.msk [vmem:[#allocation5 + $0x48] sm:$0xff] %vm1616_vm12, %v1776_v29  ;;  %v1775_v31 = vmax.f32 %v1773_v30, 0.0  ;;  %1863 = vrot.lane.b32.xlu1 %v1776_v29, %s4855_s6  ;;  %v1848_v32 = vmul.f32 %v1776_v29, %v4061_v45  ;;  %v1834_v34 = vmul.f32 %v1776_v29, %v4066_v46  ;;  %v1818_v36 = vmul.f32 %v1776_v29, %v4074_v49 }
 0x67a   : > { %v1804_v38 = vmul.f32 %v1776_v29, %v4081_v51  ;;  %v1778_v40 = vmul.f32 %v1776_v29, %v4087_v55  ;;  %v1872_v42 = vmul.f32 %v1776_v29, %v4059_v44  ;;  %3265 = vmatpush3.msk.msra.mxu0 %vm1474_vm0, %v2018_v28  ;;  %vm2170_vm0 = vcmask 39936  }
 0x67b   : > { %1831 = vst.msk [vmem:[#allocation5 + $0x40] sm:$0xff] %vm1616_vm12, %v1775_v31  ;;  %1861 = vrot.lane.b32.xlu0 %v1775_v31, %s4855_s6  ;;  %v1847_v33 = vmul.f32 %v1775_v31, %v4061_v45  ;;  %v1833_v35 = vmul.f32 %v1775_v31, %v4066_v46  ;;  %v1817_v37 = vmul.f32 %v1775_v31, %v4074_v49  ;;  %v1559_v45 = vld [vmem:[%s4746_s14] sm:$0xff]  ;;  %v1556_v46 = vld [vmem:[%s4745_s13 + $0x8] sm:$0xff] }
 0x67c   : > { %v1803_v39 = vmul.f32 %v1775_v31, %v4081_v51  ;;  %v1777_v41 = vmul.f32 %v1775_v31, %v4087_v55  ;;  %v1871_v43 = vmul.f32 %v1775_v31, %v4059_v44  ;;  %3146 = vmatprep.mubr.msk.f32.mxu1 %vm875_vm14, %v1556_v46  ;;  %v1561_v44 = vld [vmem:[%s4747_s15] sm:$0xff]  ;;  %2172 = vst.msk [vmem:[#allocation6 + $0x8] sm:$0xff] %vm2170_vm0, %v3464_v21  ;;  %2171 = vst.msk [vmem:[#allocation6] sm:$0xff] %vm2170_vm0, %v3464_v21 }
 0x67d   : > { %1853 = vrot.lane.b32.xlu1 %v1848_v32, %s4856_s27  ;;  %v2012_v46 = vld [vmem:[%s4748_s16] sm:$0xff]  ;;  %2481 = vst.msk [vmem:[#allocation7] sm:$0xff] %vm2170_vm0, %v3464_v21  ;;  %2482 = vst.msk [vmem:[#allocation7 + $0x8] sm:$0xff] %vm2170_vm0, %v3464_v21 }
 0x67e   : > { %2483 = vst.msk [vmem:[#allocation7 + $0x10] sm:$0xff] %vm2170_vm0, %v3464_v21  ;;  %2484 = vst.msk [vmem:[#allocation7 + $0x18] sm:$0xff] %vm2170_vm0, %v3464_v21 }
 0x67f   : > { %1851 = vrot.lane.b32.xlu0 %v1847_v33, %s4856_s27  ;;  %v2016_v33 = vld [vmem:[%s4748_s16 + $0x20] sm:$0xff]  ;;  %s4867_s27 = smov 5  }
 0x680   : > { %v1894_v2 = vld [vmem:[#allocation5 + $0x48] sm:$0xff] }
 0x681   : > { %1839 = vrot.lane.b32.xlu1 %v1834_v34, %s4842_s7 }
 0x682   : > { %v1893_v6 = vld [vmem:[#allocation5 + $0x40] sm:$0xff] }
 0x683   : > { %1837 = vrot.lane.b32.xlu0 %v1833_v35, %s4842_s7 }
 0x685   : > { %1825 = vrot.lane.b32.xlu1 %v1818_v36, %s4841_s0  ;;  %v2015_v36 = vld [vmem:[%s4748_s16 + $0x18] sm:$0xff] }
 0x687   : > { %1823 = vrot.lane.b32.xlu0 %v1817_v37, %s4841_s0 }
 0x689   : > { %1811 = vrot.lane.b32.xlu1 %v1804_v38, %s4857_s1 }
 0x68b   : > { %1809 = vrot.lane.b32.xlu0 %v1803_v39, %s4857_s1  ;;  %s4860_s1 = sshll.u32 %s3902_s9, 4 }
 0x68d   : > { %1797 = vrot.lane.b32.xlu1 %v1776_v29, %s4798_s28  ;;  %v2017_v29 = vld [vmem:[%s4748_s16 + $0x28] sm:$0xff] }
 0x68e   : > { %3266 = vmatprep.subr.mxu0 %v2017_v29 }
 0x68f   : > { %1795 = vrot.lane.b32.xlu0 %v1775_v31, %s4798_s28  ;;  %3267 = vmatpush3.msra.mxu0 %v2017_v29  ;;  %s4808_s28 = smov 124  }
 0x690   : > { %3268 = vmatprep.subr.mxu0 %v2016_v33 }
 0x691   : > { %1785 = vrot.lane.b32.xlu1 %v1778_v40, %s4858_s29  ;;  %3269 = vmatpush3.msra.mxu0 %v2016_v33 }
 0x692   : > { %3270 = vmatprep.subr.mxu0 %v2015_v36 }
 0x693   : > { %1783 = vrot.lane.b32.xlu0 %v1777_v41, %s4858_s29  ;;  %s4254_s29 = scalar_lea.vmem [#allocation10], %s4860_s1  ;;  %3271 = vmatpush3.msra.mxu0 %v2015_v36  ;;  %s4802_s1 = smov 3  }
 0x695   : > { %1877 = vrot.lane.b32.xlu1 %v1872_v42, %s4859_s30 }
 0x697   : > { %1875 = vrot.lane.b32.xlu0 %v1871_v43, %s4859_s30  ;;  %v2014_v43 = vld [vmem:[%s4748_s16 + $0x10] sm:$0xff]  ;;  %s4800_s30 = smov 4  }
 0x698   : > { %3272 = vmatprep.subr.mxu0 %v2014_v43 }
 0x699   : > { %1986 = vperm.xlu1 %3363, %v1559_v45   ;;  %v2013_v45 = vld [vmem:[%s4748_s16 + $0x8] sm:$0xff]  ;;  %3273 = vmatpush3.msra.mxu0 %v2014_v43 }
 0x69a   : > { %3274 = vmatprep.subr.mxu0 %v2013_v45 }
 0x69b   : > { %1991 = vperm.xlu0 %3362, %v1560_v47   ;;  %3275 = vmatpush3.msra.mxu0 %v2013_v45 }
 0x69c   : > { %3276 = vmatprep.subr.mxu0 %v2012_v46 }
 0x69d   : > { %1998 = vperm.xlu1 %3363, %v1561_v44   ;;  %3277 = vmatpush3.msra.mxu0 %v2012_v46  ;;  %v2123_v44 = vld [vmem:[%s4749_s17] sm:$0x3] }
 0x69f   : > { %2003 = vperm.xlu0 %3362, %v1562_v48  }
 0x6eb   : > { %v1864_v49 = vpop.permute.xlu1 %1863 }
 0x6ec   : > { %1868 = vst.msk [vmem:[#allocation5 + $0x78] sm:$0xff] %vm1645_vm6, %v1864_v49  ;;  %v2163_v49 = vrot.slane %v2123_v44, %v3671_v5 }
 0x6ed   : > { %1870 = vst.msk [vmem:[#allocation5 + $0x78] sm:$0xff] %vm1647_vm15, %v3464_v21  ;;  %v1862_v50 = vpop.permute.xlu0 %1861 }
 0x6ee   : > { %1867 = vst.msk [vmem:[#allocation5 + $0x70] sm:$0xff] %vm1645_vm6, %v1862_v50  ;;  %vm2288_vm6 = vcmask 130144  }
 0x6ef   : > { %1869 = vst.msk [vmem:[#allocation5 + $0x70] sm:$0xff] %vm1647_vm15, %v3464_v21  ;;  %v1854_v52 = vpop.permute.xlu1 %1853  ;;  %vm2273_vm15 = vcmask 105472  }
 0x6f0   : > { %1858 = vst.msk [vmem:[#allocation5 + $0x68] sm:$0xff] %vm1638_vm4, %v1854_v52 }
 0x6f1   : > { %1860 = vst.msk [vmem:[#allocation5 + $0x68] sm:$0xff] %vm1640_vm11, %v3464_v21  ;;  %v1852_v51 = vpop.permute.xlu0 %1851 }
 0x6f2   : > { %1857 = vst.msk [vmem:[#allocation5 + $0x60] sm:$0xff] %vm1638_vm4, %v1852_v51  ;;  %v2201_v51 = vrot.slane %v2123_v44, %v3669_v3 }
 0x6f3   : > { %1859 = vst.msk [vmem:[#allocation5 + $0x60] sm:$0xff] %vm1640_vm11, %v3464_v21  ;;  %v1840_v53 = vpop.permute.xlu1 %1839  ;;  %vm2219_vm11 = vcmask 130072  }
 0x6f4   : > { %1844 = vst.msk [vmem:[#allocation5 + $0x58] sm:$0xff] %vm1626_vm9, %v1840_v53  ;;  %v1900_v54 = vld [vmem:[#allocation5 + $0x78] sm:$0xff] }
 0x6f5   : > { %1846 = vst.msk [vmem:[#allocation5 + $0x58] sm:$0xff] %vm1628_vm10, %v3464_v21  ;;  %v1838_v55 = vpop.permute.xlu0 %1837  ;;  %1910 = vmatpush1.msra.mxu1 %v1900_v54 }
 0x6f6   : > { %1843 = vst.msk [vmem:[#allocation5 + $0x50] sm:$0xff] %vm1626_vm9, %v1838_v55  ;;  %1911 = vmatprep.subr.mxu1 %v3464_v21  ;;  %v1899_v56 = vld [vmem:[#allocation5 + $0x70] sm:$0xff]  ;;  %vm4861_vm9 = vcmask 121856  }
 0x6f7   : > { %1845 = vst.msk [vmem:[#allocation5 + $0x50] sm:$0xff] %vm1628_vm10, %v3464_v21  ;;  %1912 = vmatpush1.msra.mxu1 %v1899_v56  ;;  %v1826_v57 = vpop.permute.xlu1 %1825  ;;  %vm2237_vm10 = vcmask 130056   ;;  %vm4862_vm4 = vmmov %vm4861_vm9 }
 0x6f8   : > { %1830 = vst.msk [vmem:[#allocation5 + $0x38] sm:$0xff] %vm1614_vm13, %v1826_v57  ;;  %1913 = vmatprep.subr.mxu1 %v3464_v21  ;;  %v1898_v58 = vld [vmem:[#allocation5 + $0x68] sm:$0xff]  ;;  %vm4869_vm0 = vmmov %vm4862_vm4 }
 0x6f9   : > { %v1824_v59 = vpop.permute.xlu0 %1823  ;;  %1914 = vmatpush1.msra.mxu1 %v1898_v58 }
 0x6fa   : > { %1829 = vst.msk [vmem:[#allocation5 + $0x30] sm:$0xff] %vm1614_vm13, %v1824_v59  ;;  %1915 = vmatprep.subr.mxu1 %v3464_v21  ;;  %v1897_v60 = vld [vmem:[#allocation5 + $0x60] sm:$0xff]  ;;  %vm2181_vm13 = vcmask 130088  }
 0x6fb   : > { %1916 = vmatpush1.msra.mxu1 %v1897_v60  ;;  %v1812_v61 = vpop.permute.xlu1 %1811 }
 0x6fc   : > { %1816 = vst.msk [vmem:[#allocation5 + $0x28] sm:$0xff] %vm1603_vm7, %v1812_v61  ;;  %1917 = vmatprep.subr.mxu1 %v3464_v21  ;;  %v1896_v62 = vld [vmem:[#allocation5 + $0x58] sm:$0xff] }
 0x6fd   : > { %v1810_v63 = vpop.permute.xlu0 %1809  ;;  %1918 = vmatpush1.msra.mxu1 %v1896_v62 }
 0x6fe   : > { %1815 = vst.msk [vmem:[#allocation5 + $0x20] sm:$0xff] %vm1603_vm7, %v1810_v63  ;;  %1919 = vmatprep.subr.mxu1 %v3464_v21  ;;  %v1895_v0 = vld [vmem:[#allocation5 + $0x50] sm:$0xff]  ;;  %vm2195_vm7 = vcmask 130080  }
 0x6ff   : > { %1920 = vmatpush1.msra.mxu1 %v1895_v0  ;;  %v1798_v1 = vpop.permute.xlu1 %1797  ;;  %v1892_v8 = vld [vmem:[#allocation5 + $0x38] sm:$0xff] }
 0x700   : > { %1802 = vst.msk [vmem:[#allocation5 + $0x18] sm:$0xff] %vm1586_vm2, %v1798_v1  ;;  %1921 = vmatprep.subr.mxu1 %v3464_v21 }
 0x701   : > { %v1796_v4 = vpop.permute.xlu0 %1795  ;;  %1922 = vmatpush1.msra.mxu1 %v1894_v2  ;;  %v1891_v10 = vld [vmem:[#allocation5 + $0x30] sm:$0xff] }
 0x702   : > { %1801 = vst.msk [vmem:[#allocation5 + $0x10] sm:$0xff] %vm1586_vm2, %v1796_v4  ;;  %1923 = vmatprep.subr.mxu1 %v3464_v21  ;;  %vm2208_vm2 = vcmask 23552  }
 0x703   : > { %1924 = vmatpush1.msra.mxu1 %v1893_v6  ;;  %v1786_v7 = vpop.permute.xlu1 %1785  ;;  %v1890_v11 = vld [vmem:[#allocation5 + $0x28] sm:$0xff]  ;;  %2210 = vst.msk [vmem:[#allocation6 + $0x28] sm:$0xff] %vm2208_vm2, %v3464_v21  ;;  %2209 = vst.msk [vmem:[#allocation6 + $0x20] sm:$0xff] %vm2208_vm2, %v3464_v21 }
 0x704   : > { %1790 = vst.msk [vmem:[#allocation5 + $0x8] sm:$0xff] %vm1578_vm5, %v1786_v7  ;;  %1925 = vmatprep.subr.mxu1 %v3464_v21 }
 0x705   : > { %v1784_v9 = vpop.permute.xlu0 %1783  ;;  %1926 = vmatpush1.msra.mxu1 %v1892_v8  ;;  %v1889_v14 = vld [vmem:[#allocation5 + $0x20] sm:$0xff]  ;;  %2533 = vst.msk [vmem:[#allocation7 + $0x40] sm:$0xff] %vm2208_vm2, %v3464_v21  ;;  %2534 = vst.msk [vmem:[#allocation7 + $0x48] sm:$0xff] %vm2208_vm2, %v3464_v21 }
 0x706   : > { %1789 = vst.msk [vmem:[#allocation5] sm:$0xff] %vm1578_vm5, %v1784_v9  ;;  %1927 = vmatprep.subr.mxu1 %v3464_v21  ;;  %vm2304_vm5 = vcmask 89088  }
 0x707   : > { %1928 = vmatpush1.msra.mxu1 %v1891_v10  ;;  %v1878_v13 = vpop.permute.xlu1 %1877  ;;  %v1888_v15 = vld [vmem:[#allocation5 + $0x18] sm:$0xff]  ;;  %2535 = vst.msk [vmem:[#allocation7 + $0x50] sm:$0xff] %vm2208_vm2, %v3464_v21  ;;  %2536 = vst.msk [vmem:[#allocation7 + $0x58] sm:$0xff] %vm2208_vm2, %v3464_v21  ;;  %vm2307_vm2 = vcmask 130136  }
 0x708   : > { %1882 = vst.msk [vmem:[#allocation5 + $0x88] sm:$0xff] %vm1657_vm3, %v1878_v13  ;;  %1929 = vmatprep.subr.mxu1 %v3464_v21 }
 0x709   : > { %1884 = vst.msk [vmem:[#allocation5 + $0x88] sm:$0xff] %vm1659_vm8, %v3464_v21  ;;  %v1876_v12 = vpop.permute.xlu0 %1875  ;;  %1930 = vmatpush1.msra.mxu1 %v1890_v11  ;;  %v1887_v16 = vld [vmem:[#allocation5 + $0x10] sm:$0xff] }
 0x70a   : > { %1881 = vst.msk [vmem:[#allocation5 + $0x80] sm:$0xff] %vm1657_vm3, %v1876_v12  ;;  %1931 = vmatprep.subr.mxu1 %v3464_v21  ;;  %v2135_v12 = vld [vmem:[%s4751_s19 + $0x18] sm:$0xff] }
 0x70b   : > { %1883 = vst.msk [vmem:[#allocation5 + $0x80] sm:$0xff] %vm1659_vm8, %v3464_v21  ;;  %1932 = vmatpush1.msra.mxu1 %v1889_v14  ;;  %v1886_v17 = vld [vmem:[#allocation5 + $0x8] sm:$0xff]  ;;  %v2125_v14 = vld [vmem:[%s4750_s18 + $0x8] sm:$0xff]  ;;  %vm2257_vm8 = vcmask 130168  }
 0x70c   : > { %1933 = vmatprep.subr.mxu1 %v3464_v21 }
 0x70d   : > { %1934 = vmatpush1.msra.mxu1 %v1888_v15  ;;  %v1885_v18 = vld [vmem:[#allocation5] sm:$0xff]  ;;  %v2134_v15 = vld [vmem:[%s4751_s19 + $0x10] sm:$0xff] }
 0x70e   : > { %1935 = vmatprep.subr.mxu1 %v3464_v21 }
 0x70f   : > { %1936 = vmatpush1.msra.mxu1 %v1887_v16  ;;  %v2139_v16 = vld [vmem:[%s4752_s20 + $0x18] sm:$0xff] }
 0x710   : > { %1937 = vmatprep.subr.mxu1 %v3464_v21  ;;  %v1902_v19 = vld [vmem:[#allocation5 + $0x88] sm:$0xff] }
 0x711   : > { %1938 = vmatpush1.msra.mxu1 %v1886_v17  ;;  %v2133_v17 = vld [vmem:[%s4751_s19 + $0x8] sm:$0xff] }
 0x712   : > { %1939 = vmatprep.subr.mxu1 %v3464_v21  ;;  %v1901_v20 = vld [vmem:[#allocation5 + $0x80] sm:$0xff] }
 0x713   : > { %1940 = vmatpush1.msra.mxu1 %v1885_v18  ;;  %v2138_v18 = vld [vmem:[%s4752_s20 + $0x10] sm:$0xff] }
 0x714   : > { %1969 = vmatprep.subr.mxu1 %v3464_v21  ;;  %v1987_v25 = vpop.permute.xlu1 %1986 }
 0x715   : > { %1970 = vmatpush2.msra.mxu1 %v1902_v19  ;;  %v2132_v19 = vld [vmem:[%s4751_s19] sm:$0xff] }
 0x716   : > { %1971 = vmatprep.subr.mxu1 %v3464_v21  ;;  %v1992_v26 = vpop.permute.xlu0 %1991 }
 0x717   : > { %1972 = vmatpush2.msra.mxu1 %v1901_v20  ;;  %v2137_v20 = vld [vmem:[%s4752_s20 + $0x8] sm:$0xff] }
 0x718   : > { %1974 = vmatmul.mubr.f32.vlgmr.msra.gmra.mxu1 %v1555_v22  ;;  %2340 = vmatprep.subr.mxu1 %v3464_v21  ;;  %v1999_v31 = vpop.permute.xlu1 %1998  ;;  %v2136_v22 = vld [vmem:[%s4752_s20] sm:$0xff] }
 0x719   : > { %3147 = vmatprep.mubr.msk.f32.mxu1 %vm875_vm14, %v1558_v23 }
 0x71a   : > { %v2004_v39 = vpop.permute.xlu0 %2003 }
 0x71c   : > { %1979 = vmatmul.mubr.f32.gmra.mxu1 %v1557_v24 }
 0x71d   : > { %3151 = vmatprep.mubr.msk.f32.mxu1 %vm875_vm14, %v2125_v14 }
 0x7d8   : > { %v1975_v27 = vpop.f32.mrf.mxu1 }
 0x7d9   : > { %v1994_v30 = vmul.f32 %v1987_v25, %v1975_v27 }
 0x7da   : > { %v1977_v32 = vpop.f32.mrf.mxu1 }
 0x7db   : > { %v2006_v34 = vadd.f32 %v1999_v31, %v1994_v30 }
 0x7dc   : > { %v1980_v35 = vpop.f32.mrf.mxu1 }
 0x7dd   : > { %v2008_v37 = vmax.f32 %v2006_v34, 0.0  ;;  %v1995_v38 = vmul.f32 %v1992_v26, %v1980_v35 }
 0x7de   : > { %v1982_v40 = vpop.f32.mrf.mxu1 }
 0x7df   : > { %2010 = vst.msk [vmem:[%s4254_s29] sm:$0xff] %vm1616_vm12, %v2008_v37  ;;  %v2007_v41 = vadd.f32 %v2004_v39, %v1995_v38  ;;  %2021 = vrot.lane.b32.xlu1 %v2008_v37, %s4855_s6 }
 0x7e1   : > { %v2009_v42 = vmax.f32 %v2007_v41, 0.0 }
 0x7e3   : > { %2011 = vst.msk [vmem:[%s4254_s29 + $0x8] sm:$0xff] %vm1616_vm12, %v2009_v42  ;;  %2023 = vrot.lane.b32.xlu0 %v2009_v42, %s4855_s6  ;;  %vm2285_vm12 = vcmask 97280   ;;  %s2993_s6 = sshll.u32 %s3935_s26, 4  ;;  %s2994_s6 = int_to_ptr.vmem [resolvable:$true] %s2993_s6 }
 0x7e4   : > { %s3365_s11 = scalar_lea.vmem %s2994_s6, 256 }
 0x7e5   : > { %p3366_p11 = scmp.ne.s32.totalorder %s2994_s6, %s3365_s11 }
 0x7e7   : > { %p3367_p12 = pnand %p3366_p11, %p3655_p5 }
 0x7e9   : > { %p3368_p13 = pneg %p3367_p12 }
 0x851   : > { %v2022_v47 = vpop.permute.xlu1 %2021 }
 0x852   : > { %v2027_v48 = vmax.f32 %v2008_v37, %v2022_v47 }
 0x854   : > { %2031 = vrot.lane.b32.xlu1 %v2027_v48, %s4842_s7 }
 0x855   : > { %v2024_v50 = vpop.permute.xlu0 %2023 }
 0x856   : > { %v2028_v52 = vmax.f32 %v2009_v42, %v2024_v50 }
 0x858   : > { %2033 = vrot.lane.b32.xlu0 %v2028_v52, %s4842_s7  ;;  %2260 = vrot.lane.b32.xlu1 %v2163_v49, %s4802_s1 }
 0x85c   : > { %2242 = vrot.lane.b32.xlu0 %v2201_v51, %s4841_s0  ;;  %2222 = vrot.lane.b32.xlu1 %v2163_v49, %s4842_s7 }
 0x860   : > { %2203 = vrot.lane.b32.xlu0 %v2201_v51, %s4804_s5  ;;  %2165 = vrot.lane.b32.xlu1 %v2163_v49, %s4810_s3 }
 0x864   : > { %2291 = vrot.lane.b32.xlu0 %v2201_v51, %s4806_s10 }
 0x8c6   : > { %v2032_v5 = vpop.permute.xlu1 %2031 }
 0x8c7   : > { %v2037_v53 = vmax.f32 %v2027_v48, %v2032_v5 }
 0x8c9   : > { %3278 = vmatprep.mubr.msk.f32.mxu0 %vm1657_vm3, %v2037_v53 }
 0x8ca   : > { %v2034_v3 = vpop.permute.xlu0 %2033  ;;  %v4288_v56 = vpop.permute.xlu1 %2260 }
 0x8cb   : > { %v2038_v54 = vmax.f32 %v2028_v52, %v2034_v3 }
 0x8cd   : > { %3279 = vmatmul.mubr.msk.f32.vlgmr.msra.gmra.mxu0 %vm1657_vm3, %v2038_v54  ;;  %vm2276_vm3 = vcmask 130152  }
 0x8ce   : > { %v4301_v60 = vpop.permute.xlu0 %2242  ;;  %v4313_v63 = vpop.permute.xlu1 %2222 }
 0x8d2   : > { %v4325_v2 = vpop.permute.xlu0 %2203  ;;  %v4332_v7 = vpop.permute.xlu1 %2165 }
 0x8d6   : > { %v4337_v9 = vpop.permute.xlu0 %2291 }
 0x98d   : > { %v3280_v55 = vpop.f32.mrf.mxu0 }
 0x98e   : > { %2241 = vst.msk [vmem:[#allocation6 + $0x48] sm:$0xff] %vm875_vm14, %v3280_v55  ;;  %2281 = vrot.lane.b32.xlu1 %v3280_v55, %s4808_s28  ;;  %v2264_v58 = vmul.f32 %v3280_v55, %v4288_v56  ;;  %v2246_v61 = vmul.f32 %v3280_v55, %v4301_v60  ;;  %v2226_v0 = vmul.f32 %v3280_v55, %v4313_v63 }
 0x98f   : > { %v2114_v57 = vpop.f32.mrf.mxu0  ;;  %v2207_v4 = vmul.f32 %v3280_v55, %v4325_v2  ;;  %v2169_v8 = vmul.f32 %v3280_v55, %v4332_v7  ;;  %v2295_v13 = vmul.f32 %v3280_v55, %v4337_v9 }
 0x990   : > { %2240 = vst.msk [vmem:[#allocation6 + $0x40] sm:$0xff] %vm875_vm14, %v2114_v57  ;;  %2279 = vrot.lane.b32.xlu0 %v2114_v57, %s4808_s28  ;;  %v2263_v59 = vmul.f32 %v4288_v56, %v2114_v57  ;;  %v2245_v62 = vmul.f32 %v4301_v60, %v2114_v57  ;;  %v2225_v1 = vmul.f32 %v4313_v63, %v2114_v57  ;;  %s2969_s28 = scalar_lea.sflag [#allocation9], %s3902_s9 }
 0x991   : > { %v2206_v6 = vmul.f32 %v4325_v2, %v2114_v57  ;;  %v2168_v10 = vmul.f32 %v4332_v7, %v2114_v57  ;;  %v2294_v11 = vmul.f32 %v4337_v9, %v2114_v57 }
 0x992   : > { %2269 = vrot.lane.b32.xlu1 %v2264_v58, %s4804_s5  ;;  %v2126_v58 = vld [vmem:[%s4750_s18 + $0x10] sm:$0xff] }
 0x994   : > { %2267 = vrot.lane.b32.xlu0 %v2263_v59, %s4804_s5  ;;  %v2129_v59 = vld [vmem:[%s4750_s18 + $0x28] sm:$0xff]  ;;  %s4865_s5 = smov 3  }
 0x995   : > { %v2319_v40 = vld [vmem:[#allocation6 + $0x48] sm:$0xff] }
 0x996   : > { %2251 = vrot.lane.b32.xlu1 %v2246_v61, %s4842_s7  ;;  %v2128_v61 = vld [vmem:[%s4750_s18 + $0x20] sm:$0xff] }
 0x997   : > { %v2318_v42 = vld [vmem:[#allocation6 + $0x40] sm:$0xff] }
 0x998   : > { %2249 = vrot.lane.b32.xlu0 %v2245_v62, %s4842_s7  ;;  %v2131_v62 = vld [vmem:[%s4750_s18 + $0x38] sm:$0xff] }
 0x99a   : > { %2233 = vrot.lane.b32.xlu1 %v2226_v0, %s4841_s0  ;;  %v2130_v0 = vld [vmem:[%s4750_s18 + $0x30] sm:$0xff] }
 0x99c   : > { %2231 = vrot.lane.b32.xlu0 %v2225_v1, %s4841_s0 }
 0x99e   : > { %2215 = vrot.lane.b32.xlu1 %v2207_v4, %s4802_s1 }
 0x9a0   : > { %2213 = vrot.lane.b32.xlu0 %v2206_v6, %s4802_s1  ;;  %s4864_s1 = smov 125  }
 0x9a2   : > { %2191 = vrot.lane.b32.xlu1 %v3280_v55, %s4800_s30  ;;  %v2124_v55 = vld [vmem:[%s4750_s18] sm:$0xff] }
 0x9a4   : > { %2189 = vrot.lane.b32.xlu0 %v2114_v57, %s4800_s30  ;;  %v2127_v57 = vld [vmem:[%s4750_s18 + $0x18] sm:$0xff]  ;;  %s4863_s30 = smov 124  }
 0x9a6   : > { %2177 = vrot.lane.b32.xlu1 %v2169_v8, %s4806_s10 }
 0x9a8   : > { %2175 = vrot.lane.b32.xlu0 %v2168_v10, %s4806_s10  ;;  %s4665_s10 = scalar_lea.hbm %s4757_s25, %s3169_s4 }
 0x9aa   : > { %2300 = vrot.lane.b32.xlu1 %v2295_v13, %s4810_s3 }
 0x9ac   : > { %2298 = vrot.lane.b32.xlu0 %v2294_v11, %s4810_s3 }
 0x9ae   : > { %2442 = vperm.xlu1 %3363, %v2135_v12  }
 0x9b0   : > { %2437 = vperm.xlu0 %3362, %v2134_v15  }
 0x9b2   : > { %2466 = vperm.xlu1 %3363, %v2139_v16  }
 0x9b4   : > { %2432 = vperm.xlu0 %3362, %v2133_v17  }
 0x9b6   : > { %2461 = vperm.xlu1 %3363, %v2138_v18  }
 0x9b8   : > { %2427 = vperm.xlu0 %3362, %v2132_v19  }
 0x9ba   : > { %2456 = vperm.xlu1 %3363, %v2137_v20  }
 0x9bc   : > { %2451 = vperm.xlu0 %3362, %v2136_v22  }
 0xa00   : > { %v2282_v23 = vpop.permute.xlu1 %2281 }
 0xa01   : > { %2287 = vst.msk [vmem:[#allocation6 + $0x78] sm:$0xff] %vm2285_vm12, %v2282_v23 }
 0xa02   : > { %2290 = vst.msk [vmem:[#allocation6 + $0x78] sm:$0xff] %vm2288_vm6, %v3464_v21  ;;  %v2280_v24 = vpop.permute.xlu0 %2279 }
 0xa03   : > { %2286 = vst.msk [vmem:[#allocation6 + $0x70] sm:$0xff] %vm2285_vm12, %v2280_v24 }
 0xa04   : > { %2289 = vst.msk [vmem:[#allocation6 + $0x70] sm:$0xff] %vm2288_vm6, %v3464_v21  ;;  %v2270_v25 = vpop.permute.xlu1 %2269 }
 0xa05   : > { %2275 = vst.msk [vmem:[#allocation6 + $0x68] sm:$0xff] %vm2273_vm15, %v2270_v25 }
 0xa06   : > { %2278 = vst.msk [vmem:[#allocation6 + $0x68] sm:$0xff] %vm2276_vm3, %v3464_v21  ;;  %v2268_v26 = vpop.permute.xlu0 %2267 }
 0xa07   : > { %2274 = vst.msk [vmem:[#allocation6 + $0x60] sm:$0xff] %vm2273_vm15, %v2268_v26 }
 0xa08   : > { %2277 = vst.msk [vmem:[#allocation6 + $0x60] sm:$0xff] %vm2276_vm3, %v3464_v21  ;;  %v2252_v27 = vpop.permute.xlu1 %2251 }
 0xa09   : > { %2256 = vst.msk [vmem:[#allocation6 + $0x58] sm:$0xff] %vm4861_vm9, %v2252_v27  ;;  %v2325_v28 = vld [vmem:[#allocation6 + $0x78] sm:$0xff] }
 0xa0a   : > { %2259 = vst.msk [vmem:[#allocation6 + $0x58] sm:$0xff] %vm2257_vm8, %v3464_v21  ;;  %v2250_v29 = vpop.permute.xlu0 %2249  ;;  %2341 = vmatpush1.msra.mxu1 %v2325_v28 }
 0xa0b   : > { %2255 = vst.msk [vmem:[#allocation6 + $0x50] sm:$0xff] %vm4862_vm4, %v2250_v29  ;;  %2342 = vmatprep.subr.mxu1 %v3464_v21  ;;  %v2324_v30 = vld [vmem:[#allocation6 + $0x70] sm:$0xff] }
 0xa0c   : > { %2258 = vst.msk [vmem:[#allocation6 + $0x50] sm:$0xff] %vm2257_vm8, %v3464_v21  ;;  %2343 = vmatpush1.msra.mxu1 %v2324_v30  ;;  %v2234_v31 = vpop.permute.xlu1 %2233 }
 0xa0d   : > { %2239 = vst.msk [vmem:[#allocation6 + $0x38] sm:$0xff] %vm2237_vm10, %v2234_v31  ;;  %2344 = vmatprep.subr.mxu1 %v3464_v21  ;;  %v2323_v32 = vld [vmem:[#allocation6 + $0x68] sm:$0xff] }
 0xa0e   : > { %v2232_v33 = vpop.permute.xlu0 %2231  ;;  %2345 = vmatpush1.msra.mxu1 %v2323_v32 }
 0xa0f   : > { %2238 = vst.msk [vmem:[#allocation6 + $0x30] sm:$0xff] %vm2237_vm10, %v2232_v33  ;;  %2346 = vmatprep.subr.mxu1 %v3464_v21  ;;  %v2322_v34 = vld [vmem:[#allocation6 + $0x60] sm:$0xff] }
 0xa10   : > { %2347 = vmatpush1.msra.mxu1 %v2322_v34  ;;  %v2216_v35 = vpop.permute.xlu1 %2215 }
 0xa11   : > { %2221 = vst.msk [vmem:[#allocation6 + $0x28] sm:$0xff] %vm2219_vm11, %v2216_v35  ;;  %2348 = vmatprep.subr.mxu1 %v3464_v21  ;;  %v2321_v36 = vld [vmem:[#allocation6 + $0x58] sm:$0xff] }
 0xa12   : > { %v2214_v37 = vpop.permute.xlu0 %2213  ;;  %2349 = vmatpush1.msra.mxu1 %v2321_v36 }
 0xa13   : > { %2220 = vst.msk [vmem:[#allocation6 + $0x20] sm:$0xff] %vm2219_vm11, %v2214_v37  ;;  %2350 = vmatprep.subr.mxu1 %v3464_v21  ;;  %v2320_v38 = vld [vmem:[#allocation6 + $0x50] sm:$0xff] }
 0xa14   : > { %2351 = vmatpush1.msra.mxu1 %v2320_v38  ;;  %v2192_v39 = vpop.permute.xlu1 %2191  ;;  %v2317_v45 = vld [vmem:[#allocation6 + $0x38] sm:$0xff] }
 0xa15   : > { %2197 = vst.msk [vmem:[#allocation6 + $0x18] sm:$0xff] %vm2195_vm7, %v2192_v39  ;;  %2352 = vmatprep.subr.mxu1 %v3464_v21 }
 0xa16   : > { %v2190_v41 = vpop.permute.xlu0 %2189  ;;  %2353 = vmatpush1.msra.mxu1 %v2319_v40  ;;  %v2316_v47 = vld [vmem:[#allocation6 + $0x30] sm:$0xff] }
 0xa17   : > { %2196 = vst.msk [vmem:[#allocation6 + $0x10] sm:$0xff] %vm2195_vm7, %v2190_v41  ;;  %2354 = vmatprep.subr.mxu1 %v3464_v21 }
 0xa18   : > { %2355 = vmatpush1.msra.mxu1 %v2318_v42  ;;  %v2178_v43 = vpop.permute.xlu1 %2177  ;;  %v2315_v48 = vld [vmem:[#allocation6 + $0x28] sm:$0xff] }
 0xa19   : > { %2183 = vst.msk [vmem:[#allocation6 + $0x8] sm:$0xff] %vm2181_vm13, %v2178_v43  ;;  %2356 = vmatprep.subr.mxu1 %v3464_v21 }
 0xa1a   : > { %v2176_v46 = vpop.permute.xlu0 %2175  ;;  %2357 = vmatpush1.msra.mxu1 %v2317_v45  ;;  %v2314_v50 = vld [vmem:[#allocation6 + $0x20] sm:$0xff] }
 0xa1b   : > { %2182 = vst.msk [vmem:[#allocation6] sm:$0xff] %vm2181_vm13, %v2176_v46  ;;  %2358 = vmatprep.subr.mxu1 %v3464_v21 }
 0xa1c   : > { %2359 = vmatpush1.msra.mxu1 %v2316_v47  ;;  %v2301_v44 = vpop.permute.xlu1 %2300  ;;  %v2313_v52 = vld [vmem:[#allocation6 + $0x18] sm:$0xff] }
 0xa1d   : > { %2306 = vst.msk [vmem:[#allocation6 + $0x88] sm:$0xff] %vm2304_vm5, %v2301_v44  ;;  %2360 = vmatprep.subr.mxu1 %v3464_v21 }
 0xa1e   : > { %2309 = vst.msk [vmem:[#allocation6 + $0x88] sm:$0xff] %vm2307_vm2, %v3464_v21  ;;  %v2299_v49 = vpop.permute.xlu0 %2298  ;;  %2361 = vmatpush1.msra.mxu1 %v2315_v48  ;;  %v2312_v51 = vld [vmem:[#allocation6 + $0x10] sm:$0xff] }
 0xa1f   : > { %2305 = vst.msk [vmem:[#allocation6 + $0x80] sm:$0xff] %vm2304_vm5, %v2299_v49  ;;  %2362 = vmatprep.subr.mxu1 %v3464_v21 }
 0xa20   : > { %2308 = vst.msk [vmem:[#allocation6 + $0x80] sm:$0xff] %vm2307_vm2, %v3464_v21  ;;  %2363 = vmatpush1.msra.mxu1 %v2314_v50  ;;  %v2311_v5 = vld [vmem:[#allocation6 + $0x8] sm:$0xff]  ;;  %v2141_v50 = vld [vmem:[%s4753_s21 + $0x8] sm:$0xff] }
 0xa21   : > { %2364 = vmatprep.subr.mxu1 %v3464_v21  ;;  %2806 = vmatprep.mubr.f32.mxu0 %v2141_v50 }
 0xa22   : > { %2365 = vmatpush1.msra.mxu1 %v2313_v52  ;;  %v2310_v53 = vld [vmem:[#allocation6] sm:$0xff] }
 0xa23   : > { %2366 = vmatprep.subr.mxu1 %v3464_v21 }
 0xa24   : > { %2367 = vmatpush1.msra.mxu1 %v2312_v51 }
 0xa25   : > { %2368 = vmatprep.subr.mxu1 %v3464_v21  ;;  %v2327_v3 = vld [vmem:[#allocation6 + $0x88] sm:$0xff] }
 0xa26   : > { %2369 = vmatpush1.msra.mxu1 %v2311_v5 }
 0xa27   : > { %2370 = vmatprep.subr.mxu1 %v3464_v21  ;;  %v2326_v54 = vld [vmem:[#allocation6 + $0x80] sm:$0xff] }
 0xa28   : > { %2371 = vmatpush1.msra.mxu1 %v2310_v53 }
 0xa29   : > { %2400 = vmatprep.subr.mxu1 %v3464_v21  ;;  %v2443_v4 = vpop.permute.xlu1 %2442 }
 0xa2a   : > { %2401 = vmatpush2.msra.mxu1 %v2327_v3  ;;  %v2142_v3 = vld [vmem:[%s4753_s21 + $0x10] sm:$0xff] }
 0xa2b   : > { %2402 = vmatprep.subr.mxu1 %v3464_v21  ;;  %v2438_v1 = vpop.permute.xlu0 %2437 }
 0xa2c   : > { %2403 = vmatpush2.msra.mxu1 %v2326_v54  ;;  %v2152_v54 = vld [vmem:[%s4754_s22] sm:$0xff] }
 0xa2d   : > { %2405 = vmatmul.mubr.f32.vlgmr.msra.gmra.mxu1 %v2124_v55  ;;  %v2467_v8 = vpop.permute.xlu1 %2466  ;;  %v2153_v55 = vld [vmem:[%s4754_s22 + $0x8] sm:$0xff] }
 0xa2e   : > { %3152 = vmatprep.mubr.msk.f32.mxu1 %vm875_vm14, %v2127_v57  ;;  %v2154_v57 = vld [vmem:[%s4754_s22 + $0x10] sm:$0xff] }
 0xa2f   : > { %v2433_v6 = vpop.permute.xlu0 %2432 }
 0xa31   : > { %2410 = vmatmul.mubr.f32.gmra.mxu1 %v2126_v58  ;;  %v2462_v13 = vpop.permute.xlu1 %2461  ;;  %v2156_v58 = vld [vmem:[%s4755_s23] sm:$0xff] }
 0xa32   : > { %3153 = vmatprep.mubr.msk.f32.mxu1 %vm875_vm14, %v2129_v59  ;;  %v2157_v59 = vld [vmem:[%s4755_s23 + $0x8] sm:$0xff] }
 0xa33   : > { %v2428_v10 = vpop.permute.xlu0 %2427 }
 0xa35   : > { %2415 = vmatmul.mubr.f32.gmra.mxu1 %v2128_v61  ;;  %v2457_v20 = vpop.permute.xlu1 %2456  ;;  %v2158_v61 = vld [vmem:[%s4755_s23 + $0x10] sm:$0xff] }
 0xa36   : > { %3154 = vmatprep.mubr.msk.f32.mxu1 %vm875_vm14, %v2131_v62  ;;  %v2159_v62 = vld [vmem:[%s4755_s23 + $0x18] sm:$0xff] }
 0xa37   : > { %v2452_v14 = vpop.permute.xlu0 %2451 }
 0xa39   : > { %2420 = vmatmul.mubr.f32.gmra.mxu1 %v2130_v0 }
 0xa3a   : > { %3289 = vmatprep.mubr.msk.f32.mxu1 %vm2729_vm1, %v2142_v3 }
 0xaed   : > { %v2406_v11 = vpop.f32.mrf.mxu1 }
 0xaee   : > { %v2445_v12 = vmul.f32 %v2428_v10, %v2406_v11 }
 0xaef   : > { %v2408_v15 = vpop.f32.mrf.mxu1 }
 0xaf0   : > { %v2469_v16 = vadd.f32 %v2452_v14, %v2445_v12 }
 0xaf1   : > { %v2411_v17 = vpop.f32.mrf.mxu1 }
 0xaf2   : > { %v4447_v18 = vmax.f32 %v2469_v16, 0.0  ;;  %v2446_v19 = vmul.f32 %v2433_v6, %v2411_v17 }
 0xaf3   : > { %v2413_v22 = vpop.f32.mrf.mxu1 }
 0xaf4   : > { %2585 = vst.msk [vmem:[#allocation7 + $0x80] sm:$0xff] %vm875_vm14, %v4447_v18  ;;  %v2470_v23 = vadd.f32 %v2457_v20, %v2446_v19  ;;  %2645 = vrot.lane.b32.xlu1 %v4447_v18, %s4863_s30  ;;  %v2557_v24 = vmul.f32 %v4447_v18, %v4313_v63  ;;  %v2617_v43 = vmul.f32 %v4447_v18, %v4288_v56 }
 0xaf5   : > { %v2416_v25 = vpop.f32.mrf.mxu1  ;;  %v2529_v45 = vmul.f32 %v4447_v18, %v4325_v2  ;;  %v2477_v52 = vmul.f32 %v4447_v18, %v4332_v7 }
 0xaf6   : > { %v4455_v26 = vmax.f32 %v2470_v23, 0.0  ;;  %v2447_v27 = vmul.f32 %v2438_v1, %v2416_v25  ;;  %2569 = vrot.lane.b32.xlu0 %v2557_v24, %s4841_s0 }
 0xaf7   : > { %v2418_v28 = vpop.f32.mrf.mxu1 }
 0xaf8   : > { %2586 = vst.msk [vmem:[#allocation7 + $0x88] sm:$0xff] %vm875_vm14, %v4455_v26  ;;  %v2471_v29 = vadd.f32 %v2462_v13, %v2447_v27  ;;  %2647 = vrot.lane.b32.xlu1 %v4455_v26, %s4863_s30  ;;  %v2558_v30 = vmul.f32 %v4455_v26, %v4313_v63  ;;  %v2618_v34 = vmul.f32 %v4455_v26, %v4288_v56 }
 0xaf9   : > { %v2421_v31 = vpop.f32.mrf.mxu1  ;;  %v2530_v37 = vmul.f32 %v4455_v26, %v4325_v2  ;;  %v2666_v53 = vmul.f32 %v4455_v26, %v4337_v9 }
 0xafa   : > { %v2475_v32 = vmax.f32 %v2471_v29, 0.0  ;;  %v2448_v33 = vmul.f32 %v2443_v4, %v2421_v31  ;;  %2571 = vrot.lane.b32.xlu0 %v2558_v30, %s4841_s0 }
 0xafb   : > { %v2423_v35 = vpop.f32.mrf.mxu1 }
 0xafc   : > { %2587 = vst.msk [vmem:[#allocation7 + $0x90] sm:$0xff] %vm875_vm14, %v2475_v32  ;;  %v2472_v36 = vadd.f32 %v2467_v8, %v2448_v33  ;;  %2627 = vrot.lane.b32.xlu1 %v2618_v34, %s4864_s1  ;;  %v2559_v39 = vmul.f32 %v2475_v32, %v4313_v63  ;;  %v2619_v40 = vmul.f32 %v2475_v32, %v4288_v56 }
 0xafd   : > { %v2531_v41 = vmul.f32 %v2475_v32, %v4325_v2  ;;  %v2479_v49 = vmul.f32 %v2475_v32, %v4332_v7  ;;  %v2667_v5 = vmul.f32 %v2475_v32, %v4337_v9 }
 0xafe   : > { %v2476_v38 = vmax.f32 %v2472_v36, 0.0  ;;  %2543 = vrot.lane.b32.xlu0 %v2530_v37, %s4865_s5 }
 0xb00   : > { %2588 = vst.msk [vmem:[#allocation7 + $0x98] sm:$0xff] %vm875_vm14, %v2476_v38  ;;  %2649 = vrot.lane.b32.xlu1 %v2475_v32, %s4863_s30  ;;  %v2560_v42 = vmul.f32 %v2476_v38, %v4313_v63  ;;  %v2620_v46 = vmul.f32 %v2476_v38, %v4288_v56  ;;  %v2532_v47 = vmul.f32 %v2476_v38, %v4325_v2 }
 0xb01   : > { %v2591_v63 = vmul.f32 %v2475_v32, %v4301_v60  ;;  %v2592_v44 = vmul.f32 %v2476_v38, %v4301_v60  ;;  %v2590_v56 = vmul.f32 %v4455_v26, %v4301_v60  ;;  %v2589_v2 = vmul.f32 %v4447_v18, %v4301_v60 }
 0xb02   : > { %2573 = vrot.lane.b32.xlu0 %v2559_v39, %s4841_s0  ;;  %v2480_v48 = vmul.f32 %v2476_v38, %v4332_v7  ;;  %v2478_v60 = vmul.f32 %v4455_v26, %v4332_v7  ;;  %v2668_v51 = vmul.f32 %v2476_v38, %v4337_v9  ;;  %v2665_v7 = vmul.f32 %v4447_v18, %v4337_v9  ;;  %v2155_v9 = vld [vmem:[%s4754_s22 + $0x18] sm:$0xff] }
 0xb04   : > { %2629 = vrot.lane.b32.xlu1 %v2619_v40, %s4864_s1 }
 0xb06   : > { %2545 = vrot.lane.b32.xlu0 %v2531_v41, %s4865_s5 }
 0xb08   : > { %2651 = vrot.lane.b32.xlu1 %v2476_v38, %s4863_s30 }
 0xb0a   : > { %2575 = vrot.lane.b32.xlu0 %v2560_v42, %s4841_s0  ;;  %s4866_s0 = smov 4  }
 0xb0c   : > { %2625 = vrot.lane.b32.xlu1 %v2617_v43, %s4864_s1 }
 0xb0e   : > { %2541 = vrot.lane.b32.xlu0 %v2529_v45, %s4865_s5 }
 0xb10   : > { %2631 = vrot.lane.b32.xlu1 %v2620_v46, %s4864_s1 }
 0xb12   : > { %2547 = vrot.lane.b32.xlu0 %v2532_v47, %s4865_s5  ;;  %s2991_s5 = scalar_lea.hbm %s4756_s24, %s3169_s4 }
 0xb14   : > { %2601 = vrot.lane.b32.xlu1 %v2591_v63, %s4842_s7 }
 0xb16   : > { %2519 = vrot.lane.b32.xlu0 %v2476_v38, %s4866_s0 }
 0xb18   : > { %2603 = vrot.lane.b32.xlu1 %v2592_v44, %s4842_s7 }
 0xb1a   : > { %2517 = vrot.lane.b32.xlu0 %v2475_v32, %s4866_s0 }
 0xb1c   : > { %2599 = vrot.lane.b32.xlu1 %v2590_v56, %s4842_s7 }
 0xb1e   : > { %2515 = vrot.lane.b32.xlu0 %v4455_v26, %s4866_s0 }
 0xb20   : > { %2597 = vrot.lane.b32.xlu1 %v2589_v2, %s4842_s7  ;;  %s4868_s7 = smov 123  }
 0xb22   : > { %2513 = vrot.lane.b32.xlu0 %v4447_v18, %s4866_s0 }
 0xb24   : > { %2495 = vrot.lane.b32.xlu1 %v2480_v48, %s4867_s27 }
 0xb26   : > { %2493 = vrot.lane.b32.xlu0 %v2479_v49, %s4867_s27 }
 0xb28   : > { %2491 = vrot.lane.b32.xlu1 %v2478_v60, %s4867_s27 }
 0xb2a   : > { %2489 = vrot.lane.b32.xlu0 %v2477_v52, %s4867_s27 }
 0xb2c   : > { %2679 = vrot.lane.b32.xlu1 %v2668_v51, %s4868_s7 }
 0xb2e   : > { %2677 = vrot.lane.b32.xlu0 %v2667_v5, %s4868_s7 }
 0xb30   : > { %2675 = vrot.lane.b32.xlu1 %v2666_v53, %s4868_s7  ;;  %v2712_v53 = vld [vmem:[#allocation7 + $0x98] sm:$0xff] }
 0xb32   : > { %2673 = vrot.lane.b32.xlu0 %v2665_v7, %s4868_s7  ;;  %s3479_s7 = smov [#allocation8]  }
 0xb33   : > { %s3369_s3 = sshll.u32 %s3479_s7, 4  ;;  %s3370_s3 = int_to_ptr.vmem [resolvable:$false] %s3369_s3 }
 0xb34   : > { %2914 = vperm.xlu1 %3363, %v2152_v54   ;;  %v2711_v54 = vld [vmem:[#allocation7 + $0x90] sm:$0xff]  ;;  %s3371_s8 = scalar_lea.vmem %s3370_s3, 512  ;;  %p3372_p0 = scmp.lt.s32.totalorder %s2994_s6, %s3370_s3 }
 0xb35   : > { %p3373_p1 = scmp.lt.s32.totalorder %s3371_s8, %s3365_s11 }
 0xb36   : > { %2919 = vperm.xlu0 %3362, %v2153_v55  }
 0xb37   : > { %p3374_p2 = por %p3373_p1, %p3372_p0 }
 0xb38   : > { %2924 = vperm.xlu1 %3363, %v2154_v57  }
 0xb39   : > { %p3375_p3 = pnand %p3374_p2, %p3368_p13 }
 0xb3a   : > { %2929 = vperm.xlu0 %3362, %v2155_v9   ;;  %v2710_v9 = vld [vmem:[#allocation7 + $0x88] sm:$0xff] }
 0xb3c   : > { %2938 = vperm.xlu1 %3363, %v2156_v58  }
 0xb3e   : > { %2943 = vperm.xlu0 %3362, %v2157_v59  }
 0xb40   : > { %2948 = vperm.xlu1 %3363, %v2158_v61   ;;  %v2709_v61 = vld [vmem:[#allocation7 + $0x80] sm:$0xff] }
 0xb42   : > { %2953 = vperm.xlu0 %3362, %v2159_v62   ;;  %v2140_v62 = vld [vmem:[%s4753_s21] sm:$0xff] }
 0xb66   : > { %v2646_v0 = vpop.permute.xlu1 %2645 }
 0xb67   : > { %2657 = vst.msk [vmem:[#allocation7 + $0xe0] sm:$0xff] %vm2285_vm12, %v2646_v0 }
 0xb68   : > { %2661 = vst.msk [vmem:[#allocation7 + $0xe0] sm:$0xff] %vm2288_vm6, %v3464_v21  ;;  %v2570_v1 = vpop.permute.xlu0 %2569 }
 0xb69   : > { %2581 = vst.msk [vmem:[#allocation7 + $0x60] sm:$0xff] %vm2237_vm10, %v2570_v1 }
 0xb6a   : > { %v2648_v4 = vpop.permute.xlu1 %2647 }
 0xb6b   : > { %2658 = vst.msk [vmem:[#allocation7 + $0xe8] sm:$0xff] %vm2285_vm12, %v2648_v4  ;;  %v2144_v4 = vld [vmem:[%s4753_s21 + $0x20] sm:$0xff] }
 0xb6c   : > { %2662 = vst.msk [vmem:[#allocation7 + $0xe8] sm:$0xff] %vm2288_vm6, %v3464_v21  ;;  %v2572_v6 = vpop.permute.xlu0 %2571 }
 0xb6d   : > { %2582 = vst.msk [vmem:[#allocation7 + $0x68] sm:$0xff] %vm2237_vm10, %v2572_v6 }
 0xb6e   : > { %v2628_v8 = vpop.permute.xlu1 %2627 }
 0xb6f   : > { %2638 = vst.msk [vmem:[#allocation7 + $0xc8] sm:$0xff] %vm2273_vm15, %v2628_v8  ;;  %v2721_v28 = vld [vmem:[#allocation7 + $0xe0] sm:$0xff] }
 0xb70   : > { %2642 = vst.msk [vmem:[#allocation7 + $0xc8] sm:$0xff] %vm2276_vm3, %v3464_v21  ;;  %v2544_v10 = vpop.permute.xlu0 %2543  ;;  %v2705_v32 = vld [vmem:[#allocation7 + $0x60] sm:$0xff] }
 0xb71   : > { %2554 = vst.msk [vmem:[#allocation7 + $0x48] sm:$0xff] %vm2219_vm11, %v2544_v10  ;;  %v2143_v8 = vld [vmem:[%s4753_s21 + $0x18] sm:$0xff] }
 0xb72   : > { %v2650_v13 = vpop.permute.xlu1 %2649  ;;  %v2147_v10 = vld [vmem:[%s4753_s21 + $0x38] sm:$0xff] }
 0xb73   : > { %2659 = vst.msk [vmem:[#allocation7 + $0xf0] sm:$0xff] %vm2285_vm12, %v2650_v13  ;;  %v2722_v25 = vld [vmem:[#allocation7 + $0xe8] sm:$0xff] }
 0xb74   : > { %2663 = vst.msk [vmem:[#allocation7 + $0xf0] sm:$0xff] %vm2288_vm6, %v3464_v21  ;;  %v2574_v11 = vpop.permute.xlu0 %2573  ;;  %v2706_v30 = vld [vmem:[#allocation7 + $0x68] sm:$0xff] }
 0xb75   : > { %2583 = vst.msk [vmem:[#allocation7 + $0x70] sm:$0xff] %vm2237_vm10, %v2574_v11 }
 0xb76   : > { %v2630_v12 = vpop.permute.xlu1 %2629 }
 0xb77   : > { %2639 = vst.msk [vmem:[#allocation7 + $0xd0] sm:$0xff] %vm2273_vm15, %v2630_v12  ;;  %v2718_v37 = vld [vmem:[#allocation7 + $0xc8] sm:$0xff]  ;;  %v2150_v12 = vld [vmem:[%s4753_s21 + $0x50] sm:$0xff] }
 0xb78   : > { %2643 = vst.msk [vmem:[#allocation7 + $0xd0] sm:$0xff] %vm2276_vm3, %v3464_v21  ;;  %v2546_v14 = vpop.permute.xlu0 %2545  ;;  %v2702_v42 = vld [vmem:[#allocation7 + $0x48] sm:$0xff] }
 0xb79   : > { %2555 = vst.msk [vmem:[#allocation7 + $0x50] sm:$0xff] %vm2219_vm11, %v2546_v14 }
 0xb7a   : > { %v2652_v15 = vpop.permute.xlu1 %2651 }
 0xb7b   : > { %2660 = vst.msk [vmem:[#allocation7 + $0xf8] sm:$0xff] %vm2285_vm12, %v2652_v15  ;;  %v2723_v22 = vld [vmem:[#allocation7 + $0xf0] sm:$0xff]  ;;  %vm4870_vm12 = vmmov %vm4869_vm0 }
 0xb7c   : > { %2664 = vst.msk [vmem:[#allocation7 + $0xf8] sm:$0xff] %vm2288_vm6, %v3464_v21  ;;  %v2576_v16 = vpop.permute.xlu0 %2575  ;;  %v2707_v27 = vld [vmem:[#allocation7 + $0x70] sm:$0xff]  ;;  %vm4871_vm6 = vmmov %vm4869_vm0 }
 0xb7d   : > { %2584 = vst.msk [vmem:[#allocation7 + $0x78] sm:$0xff] %vm2237_vm10, %v2576_v16  ;;  %v2145_v15 = vld [vmem:[%s4753_s21 + $0x28] sm:$0xff]  ;;  %v2148_v16 = vld [vmem:[%s4753_s21 + $0x40] sm:$0xff] }
 0xb7e   : > { %v2626_v17 = vpop.permute.xlu1 %2625 }
 0xb7f   : > { %2637 = vst.msk [vmem:[#allocation7 + $0xc0] sm:$0xff] %vm2273_vm15, %v2626_v17  ;;  %v2719_v34 = vld [vmem:[#allocation7 + $0xd0] sm:$0xff] }
 0xb80   : > { %2641 = vst.msk [vmem:[#allocation7 + $0xc0] sm:$0xff] %vm2276_vm3, %v3464_v21  ;;  %v2542_v18 = vpop.permute.xlu0 %2541  ;;  %v2703_v39 = vld [vmem:[#allocation7 + $0x50] sm:$0xff] }
 0xb81   : > { %2553 = vst.msk [vmem:[#allocation7 + $0x40] sm:$0xff] %vm2219_vm11, %v2542_v18  ;;  %v2149_v17 = vld [vmem:[%s4753_s21 + $0x48] sm:$0xff]  ;;  %v2151_v18 = vld [vmem:[%s4753_s21 + $0x58] sm:$0xff] }
 0xb82   : > { %v2632_v19 = vpop.permute.xlu1 %2631 }
 0xb83   : > { %2640 = vst.msk [vmem:[#allocation7 + $0xd8] sm:$0xff] %vm2273_vm15, %v2632_v19  ;;  %v2724_v20 = vld [vmem:[#allocation7 + $0xf8] sm:$0xff]  ;;  %vm4872_vm15 = vmmov %vm4869_vm0 }
 0xb84   : > { %2644 = vst.msk [vmem:[#allocation7 + $0xd8] sm:$0xff] %vm2276_vm3, %v3464_v21  ;;  %v2548_v23 = vpop.permute.xlu0 %2547  ;;  %3191 = vmatprep.subr.mxu0 %v2724_v20  ;;  %v2708_v24 = vld [vmem:[#allocation7 + $0x78] sm:$0xff] }
 0xb85   : > { %2556 = vst.msk [vmem:[#allocation7 + $0x58] sm:$0xff] %vm2219_vm11, %v2548_v23  ;;  %3192 = vmatpush3.msra.mxu0 %v2708_v24 }
 0xb86   : > { %3193 = vmatprep.subr.mxu0 %v2723_v22  ;;  %v2602_v26 = vpop.permute.xlu1 %2601 }
 0xb87   : > { %2611 = vst.msk [vmem:[#allocation7 + $0xb0] sm:$0xff] %vm4869_vm0, %v2602_v26  ;;  %3194 = vmatpush3.msra.mxu0 %v2707_v27  ;;  %v2717_v40 = vld [vmem:[#allocation7 + $0xc0] sm:$0xff] }
 0xb88   : > { %2615 = vst.msk [vmem:[#allocation7 + $0xb0] sm:$0xff] %vm2257_vm8, %v3464_v21  ;;  %v2520_v29 = vpop.permute.xlu0 %2519  ;;  %3195 = vmatprep.subr.mxu0 %v2722_v25  ;;  %v2701_v45 = vld [vmem:[#allocation7 + $0x40] sm:$0xff] }
 0xb89   : > { %2528 = vst.msk [vmem:[#allocation7 + $0x38] sm:$0xff] %vm2195_vm7, %v2520_v29  ;;  %3196 = vmatpush3.msra.mxu0 %v2706_v30 }
 0xb8a   : > { %3197 = vmatprep.subr.mxu0 %v2721_v28  ;;  %v2604_v31 = vpop.permute.xlu1 %2603 }
 0xb8b   : > { %2612 = vst.msk [vmem:[#allocation7 + $0xb8] sm:$0xff] %vm4870_vm12, %v2604_v31  ;;  %3198 = vmatpush3.msra.mxu0 %v2705_v32  ;;  %v2720_v33 = vld [vmem:[#allocation7 + $0xd8] sm:$0xff] }
 0xb8c   : > { %2616 = vst.msk [vmem:[#allocation7 + $0xb8] sm:$0xff] %vm2257_vm8, %v3464_v21  ;;  %v2518_v35 = vpop.permute.xlu0 %2517  ;;  %3199 = vmatprep.subr.mxu0 %v2720_v33  ;;  %v2704_v36 = vld [vmem:[#allocation7 + $0x58] sm:$0xff] }
 0xb8d   : > { %2527 = vst.msk [vmem:[#allocation7 + $0x30] sm:$0xff] %vm2195_vm7, %v2518_v35  ;;  %3200 = vmatpush3.msra.mxu0 %v2704_v36 }
 0xb8e   : > { %3201 = vmatprep.subr.mxu0 %v2719_v34  ;;  %v2600_v38 = vpop.permute.xlu1 %2599 }
 0xb8f   : > { %2610 = vst.msk [vmem:[#allocation7 + $0xa8] sm:$0xff] %vm4871_vm6, %v2600_v38  ;;  %3202 = vmatpush3.msra.mxu0 %v2703_v39  ;;  %v2715_v47 = vld [vmem:[#allocation7 + $0xb0] sm:$0xff] }
 0xb90   : > { %2614 = vst.msk [vmem:[#allocation7 + $0xa8] sm:$0xff] %vm2257_vm8, %v3464_v21  ;;  %v2516_v41 = vpop.permute.xlu0 %2515  ;;  %3203 = vmatprep.subr.mxu0 %v2718_v37  ;;  %v2700_v44 = vld [vmem:[#allocation7 + $0x38] sm:$0xff] }
 0xb91   : > { %2526 = vst.msk [vmem:[#allocation7 + $0x28] sm:$0xff] %vm2195_vm7, %v2516_v41  ;;  %3204 = vmatpush3.msra.mxu0 %v2702_v42 }
 0xb92   : > { %3205 = vmatprep.subr.mxu0 %v2717_v40  ;;  %v2598_v43 = vpop.permute.xlu1 %2597 }
 0xb93   : > { %2609 = vst.msk [vmem:[#allocation7 + $0xa0] sm:$0xff] %vm4872_vm15, %v2598_v43  ;;  %3206 = vmatpush3.msra.mxu0 %v2701_v45  ;;  %v2716_v46 = vld [vmem:[#allocation7 + $0xb8] sm:$0xff] }
 0xb94   : > { %2613 = vst.msk [vmem:[#allocation7 + $0xa0] sm:$0xff] %vm2257_vm8, %v3464_v21  ;;  %v2514_v63 = vpop.permute.xlu0 %2513  ;;  %3207 = vmatprep.subr.mxu0 %v2716_v46  ;;  %v2699_v2 = vld [vmem:[#allocation7 + $0x30] sm:$0xff] }
 0xb95   : > { %2525 = vst.msk [vmem:[#allocation7 + $0x20] sm:$0xff] %vm2195_vm7, %v2514_v63  ;;  %3208 = vmatpush3.msra.mxu0 %v2700_v44 }
 0xb96   : > { %3209 = vmatprep.subr.mxu0 %v2715_v47  ;;  %v2496_v56 = vpop.permute.xlu1 %2495 }
 0xb97   : > { %2504 = vst.msk [vmem:[#allocation7 + $0x18] sm:$0xff] %vm2181_vm13, %v2496_v56  ;;  %3210 = vmatpush3.msra.mxu0 %v2699_v2  ;;  %v2714_v48 = vld [vmem:[#allocation7 + $0xa8] sm:$0xff] }
 0xb98   : > { %v2494_v49 = vpop.permute.xlu0 %2493  ;;  %3211 = vmatprep.subr.mxu0 %v2714_v48  ;;  %v2698_v50 = vld [vmem:[#allocation7 + $0x28] sm:$0xff] }
 0xb99   : > { %2503 = vst.msk [vmem:[#allocation7 + $0x10] sm:$0xff] %vm2181_vm13, %v2494_v49  ;;  %3212 = vmatpush3.msra.mxu0 %v2698_v50 }
 0xb9a   : > { %v2492_v60 = vpop.permute.xlu1 %2491 }
 0xb9b   : > { %2502 = vst.msk [vmem:[#allocation7 + $0x8] sm:$0xff] %vm2181_vm13, %v2492_v60  ;;  %v2713_v52 = vld [vmem:[#allocation7 + $0xa0] sm:$0xff] }
 0xb9c   : > { %v2490_v51 = vpop.permute.xlu0 %2489  ;;  %3213 = vmatprep.subr.mxu0 %v2713_v52  ;;  %v2697_v5 = vld [vmem:[#allocation7 + $0x20] sm:$0xff] }
 0xb9d   : > { %2501 = vst.msk [vmem:[#allocation7] sm:$0xff] %vm2181_vm13, %v2490_v51  ;;  %3214 = vmatpush3.msra.mxu0 %v2697_v5 }
 0xb9e   : > { %3215 = vmatprep.subr.mxu0 %v2712_v53  ;;  %v2680_v3 = vpop.permute.xlu1 %2679  ;;  %v2696_v7 = vld [vmem:[#allocation7 + $0x18] sm:$0xff] }
 0xb9f   : > { %2688 = vst.msk [vmem:[#allocation7 + $0x118] sm:$0xff] %vm2304_vm5, %v2680_v3  ;;  %3216 = vmatpush3.msra.mxu0 %v2696_v7 }
 0xba0   : > { %2692 = vst.msk [vmem:[#allocation7 + $0x118] sm:$0xff] %vm2307_vm2, %v3464_v21  ;;  %v2678_v55 = vpop.permute.xlu0 %2677  ;;  %3217 = vmatprep.subr.mxu0 %v2711_v54  ;;  %v2695_v57 = vld [vmem:[#allocation7 + $0x10] sm:$0xff] }
 0xba1   : > { %2687 = vst.msk [vmem:[#allocation7 + $0x110] sm:$0xff] %vm2304_vm5, %v2678_v55  ;;  %3218 = vmatpush3.msra.mxu0 %v2695_v57 }
 0xba2   : > { %2691 = vst.msk [vmem:[#allocation7 + $0x110] sm:$0xff] %vm2307_vm2, %v3464_v21  ;;  %3219 = vmatprep.subr.mxu0 %v2710_v9  ;;  %v2676_v58 = vpop.permute.xlu1 %2675  ;;  %v2694_v59 = vld [vmem:[#allocation7 + $0x8] sm:$0xff] }
 0xba3   : > { %2686 = vst.msk [vmem:[#allocation7 + $0x108] sm:$0xff] %vm2304_vm5, %v2676_v58  ;;  %3220 = vmatpush3.msra.mxu0 %v2694_v59 }
 0xba4   : > { %2690 = vst.msk [vmem:[#allocation7 + $0x108] sm:$0xff] %vm2307_vm2, %v3464_v21  ;;  %v2674_v0 = vpop.permute.xlu0 %2673  ;;  %3221 = vmatprep.subr.mxu0 %v2709_v61  ;;  %v2693_v1 = vld [vmem:[#allocation7] sm:$0xff] }
 0xba5   : > { %2685 = vst.msk [vmem:[#allocation7 + $0x100] sm:$0xff] %vm2304_vm5, %v2674_v0  ;;  %3222 = vmatpush3.msra.mxu0 %v2693_v1 }
 0xba6   : > { %2689 = vst.msk [vmem:[#allocation7 + $0x100] sm:$0xff] %vm2307_vm2, %v3464_v21  ;;  %2807 = vmatmul.mubr.f32.vlgmr.msra.gmra.mxu0 %v2140_v62  ;;  %v2146_v21 = vld [vmem:[%s4753_s21 + $0x30] sm:$0xff] }
 0xba7   : > { %v2728_v6 = vld [vmem:[#allocation7 + $0x118] sm:$0xff]  ;;  %2811 = vmatprep.mubr.f32.mxu0 %v2144_v4 }
 0xba8   : > { %3281 = vmatprep.subr.mxu1 %v2728_v6 }
 0xba9   : > { %3282 = vmatpush3.msra.mxu1 %v2728_v6  ;;  %v2727_v13 = vld [vmem:[#allocation7 + $0x110] sm:$0xff] }
 0xbaa   : > { %2812 = vmatmul.mubr.f32.gmra.mxu0 %v2143_v8  ;;  %3283 = vmatprep.subr.mxu1 %v2727_v13 }
 0xbab   : > { %3284 = vmatpush3.msra.mxu1 %v2727_v13  ;;  %v2726_v11 = vld [vmem:[#allocation7 + $0x108] sm:$0xff]  ;;  %2816 = vmatprep.mubr.f32.mxu0 %v2147_v10 }
 0xbac   : > { %3285 = vmatprep.subr.mxu1 %v2726_v11 }
 0xbad   : > { %3286 = vmatpush3.msra.mxu1 %v2726_v11  ;;  %v2725_v14 = vld [vmem:[#allocation7 + $0x100] sm:$0xff] }
 0xbae   : > { %2817 = vmatmul.mubr.f32.gmra.mxu0 %v2146_v21  ;;  %3287 = vmatprep.subr.mxu1 %v2725_v14 }
 0xbaf   : > { %3288 = vmatpush3.msra.mxu1 %v2725_v14  ;;  %2821 = vmatprep.mubr.f32.mxu0 %v2150_v12 }
 0xbb0   : > { %3290 = vmatmul.mubr.msk.f32.vlgmr.msra.gmra.mxu1 %vm2729_vm1, %v2145_v15 }
 0xbb1   : > { %3292 = vmatprep.mubr.msk.f32.mxu1 %vm2729_vm1, %v2148_v16 }
 0xbb2   : > { %2822 = vmatmul.mubr.f32.gmra.mxu0 %v2149_v17 }
 0xbb4   : > { %3293 = vmatmul.mubr.msk.f32.gmra.mxu1 %vm2729_vm1, %v2151_v18 }
 0xbb5   : > { %3378 = shalt.err (!%p3375_p3)
}
 0xbb6   : > { %s3379_s26 = scalar_lea.hbm %s2991_s5, 256  ;;  %s3383_s1 = scalar_lea.hbm %s4756_s24, 512 }
 0xbb7   : > { %p3380_p4 = scmp.ne.s32.totalorder %s2991_s5, %s3379_s26  ;;  %p3384_p9 = scmp.lt.s32.totalorder %s2991_s5, %s4756_s24 }
 0xbb8   : > { %p3385_p10 = scmp.lt.s32.totalorder %s3383_s1, %s3379_s26 }
 0xbb9   : > { %p3381_p7 = pnand %p3380_p4, %p3655_p5 }
 0xbba   : > { %p3386_p11 = por %p3385_p10, %p3384_p9 }
 0xbbb   : > { %p3382_p8 = pneg %p3381_p7 }
 0xbbd   : > { %p3387_p12 = pnand %p3386_p11, %p3382_p8 }
 0xbbf   : > { %3390 = shalt.err (!%p3387_p12)
}
 0xbc0   : > { %3295 = dma.vmem_to_hbm [thread:$0]  (%p3655_p5), %s2994_s6, 256, %s2991_s5, %s2969_s28  }
 0xbc1   : > { %s3006_s11 = sshll.u32 %s4254_s29, 4  ;;  %s2974_s7 = scalar_lea.sflag [#allocation11], %s3902_s9  ;;  %s4681_s11 = int_to_ptr.vmem [resolvable:$true] %s3006_s11 }
 0xbc2   : > { %s3391_s3 = scalar_lea.vmem %s4681_s11, 256  ;;  %s3480_s8 = smov [#allocation10]  }
 0xbc3   : > { %p3392_p13 = scmp.ne.s32.totalorder %s4681_s11, %s3391_s3  ;;  %s3395_s26 = sshll.u32 %s3480_s8, 4  ;;  %s3396_s26 = int_to_ptr.vmem [resolvable:$false] %s3395_s26 }
 0xbc4   : > { %s3397_s4 = scalar_lea.vmem %s3396_s26, 512  ;;  %p3398_p2 = scmp.lt.s32.totalorder %s4681_s11, %s3396_s26 }
 0xbc5   : > { %p3393_p0 = pnand %p3392_p13, %p3655_p5  ;;  %p3399_p3 = scmp.lt.s32.totalorder %s3397_s4, %s3391_s3 }
 0xbc7   : > { %p3394_p1 = pneg %p3393_p0  ;;  %p3400_p4 = por %p3399_p3, %p3398_p2 }
 0xbc9   : > { %p3401_p7 = pnand %p3400_p4, %p3394_p1 }
 0xbcb   : > { %3404 = shalt.err (!%p3401_p7)
}
 0xbcc   : > { %s3405_s29 = scalar_lea.hbm %s4665_s10, 256  ;;  %s3409_s28 = scalar_lea.hbm %s4757_s25, 512 }
 0xbcd   : > { %p3406_p8 = scmp.ne.s32.totalorder %s4665_s10, %s3405_s29  ;;  %p3410_p11 = scmp.lt.s32.totalorder %s4665_s10, %s4757_s25 }
 0xbce   : > { %p3411_p12 = scmp.lt.s32.totalorder %s3409_s28, %s3405_s29 }
 0xbcf   : > { %p3407_p9 = pnand %p3406_p8, %p3655_p5 }
 0xbd0   : > { %p3412_p13 = por %p3411_p12, %p3410_p11 }
 0xbd1   : > { %p3408_p10 = pneg %p3407_p9 }
 0xbd3   : > { %p3413_p0 = pnand %p3412_p13, %p3408_p10 }
 0xbd5   : > { %3416 = shalt.err (!%p3413_p0)
}
 0xbd6   : > { %s3481_s0 = smov 128   ;;  %s4873_s27 = smov 8   ;;  %v2915_v20 = vpop.permute.xlu1 %2914  ;;  %v2920_v22 = vpop.permute.xlu0 %2919 }
 0xbd7   : > { %3296 = dma.vmem_to_hbm [thread:$0]  (%p3655_p5), %s4681_s11, 256, %s4665_s10, %s2974_s7, %s3481_s0, %s3481_s0, %s4873_s27  }
 0xbd8   : > { %s4874_s3 = sld [smem:[#allocation21_spill]] }
 0xbd9   : > { %s4875_s11 = sld [smem:[#allocation34_spill]] }
 0xbda   : > { %v2925_v26 = vpop.permute.xlu1 %2924  ;;  %v2930_v27 = vpop.permute.xlu0 %2929 }
 0xbde   : > { %v2939_v36 = vpop.permute.xlu1 %2938  ;;  %v2944_v37 = vpop.permute.xlu0 %2943  ;;  %s3168_s2 = sshll.u32 %s4874_s3, 5 }
 0xbdf   : > { %s812_s7 = scalar_lea.vmem %s4875_s11, %s3168_s2 }
 0xbe2   : > { %v2949_v60 = vpop.permute.xlu1 %2948  ;;  %v2954_v52 = vpop.permute.xlu0 %2953 }
 0xc66   : > { %v3223_v19 = vpop.f32.mrf.mxu0 }
 0xc68   : > { %v3224_v23 = vpop.f32.mrf.mxu0 }
 0xc69   : > { %v3225_v32 = vadd.f32 %v3224_v23, %v3223_v19 }
 0xc6a   : > { %v3226_v24 = vpop.f32.mrf.mxu0 }
 0xc6c   : > { %v3227_v25 = vpop.f32.mrf.mxu0 }
 0xc6d   : > { %v3228_v29 = vadd.f32 %v3227_v25, %v3226_v24 }
 0xc6e   : > { %v3229_v28 = vpop.f32.mrf.mxu0 }
 0xc70   : > { %v3230_v30 = vpop.f32.mrf.mxu0  ;;  %v3291_v31 = vpop.f32.mrf.mxu1 }
 0xc71   : > { %v2899_v33 = vadd.f32 %v3291_v31, %v3228_v29  ;;  %v3231_v42 = vadd.f32 %v3230_v30, %v3229_v28 }
 0xc72   : > { %v3232_v34 = vpop.f32.mrf.mxu0  ;;  %v2893_v35 = vpop.f32.mrf.mxu1 }
 0xc73   : > { %v2933_v38 = vmul.f32 %v2920_v22, %v2899_v33  ;;  %v2894_v39 = vadd.f32 %v3225_v32, %v2893_v35 }
 0xc74   : > { %v3233_v40 = vpop.f32.mrf.mxu0  ;;  %v3294_v41 = vpop.f32.mrf.mxu1 }
 0xc75   : > { %v2957_v43 = vadd.f32 %v2944_v37, %v2933_v38  ;;  %v2932_v45 = vmul.f32 %v2915_v20, %v2894_v39  ;;  %v3234_v46 = vadd.f32 %v3233_v40, %v3232_v34 }
 0xc76   : > { %v2903_v47 = vpop.f32.mrf.mxu1 }
 0xc77   : > { %v2961_v63 = vmax.f32 %v2957_v43, 0.0  ;;  %v2956_v44 = vadd.f32 %v2939_v36, %v2932_v45  ;;  %v2909_v56 = vadd.f32 %v3294_v41, %v3234_v46  ;;  %v2904_v2 = vadd.f32 %v3231_v42, %v2903_v47 }
 0xc79   : > { %2965 = vst.msk [vmem:[%s812_s7 + $0x8] sm:$0xff] %vm875_vm14, %v2961_v63  ;;  %v2960_v48 = vmax.f32 %v2956_v44, 0.0  ;;  %v2935_v49 = vmul.f32 %v2930_v27, %v2909_v56  ;;  %v2934_v50 = vmul.f32 %v2925_v26, %v2904_v2 }
 0xc7b   : > { %2964 = vst.msk [vmem:[%s812_s7] sm:$0xff] %vm875_vm14, %v2960_v48  ;;  %v2959_v51 = vadd.f32 %v2954_v52, %v2935_v49  ;;  %v2958_v5 = vadd.f32 %v2949_v60, %v2934_v50 }
 0xc7d   : > { %v2963_v53 = vmax.f32 %v2959_v51, 0.0  ;;  %v2962_v3 = vmax.f32 %v2958_v5, 0.0 }
 0xc7f   : > { %2967 = vst.msk [vmem:[%s812_s7 + $0x18] sm:$0xff] %vm875_vm14, %v2963_v53  ;;  %2966 = vst.msk [vmem:[%s812_s7 + $0x10] sm:$0xff] %vm875_vm14, %v2962_v3 }
 0xc80 PF: > { %s4876_s8 = sld [smem:[#allocation17_spill]] }
 0xc81   : > { %s4877_s26 = sld [smem:[#allocation14_spill]] }
 0xc86   : > { %p3306_p5 = scmp.ge.s32.totalorder %s4876_s8, 2 }
 0xc87   : > { %s3024_s29 = sand.u32 1, %s4877_s26  }
 0xc88   : > { %p3300_p1 = pnand %p3306_p5, %p3659_p6  ;;  %s3025_s6 = scalar_lea.sflag [#allocation9], %s3024_s29 }
 0xc8a   : > { %p3301_p2 = pneg %p3300_p1 }
 0xc8c   : > { %3434 = dma.done.wait (%p3301_p2), %s3025_s6, 256  }
 0xc8d   : > { %3436 = vsyncadd (%p3301_p2), %s3025_s6, 4294967040  ;;  %s3034_s5 = scalar_lea.sflag [#allocation11], %s3024_s29 }
 0xc8e   : > { %3438 = dma.done.wait (%p3301_p2), %s3034_s5, 256  }
 0xc8f   : > { %3440 = vsyncadd (%p3301_p2), %s3034_s5, 4294967040  ;;  %s4879_s28 = sld [smem:[#allocation18_spill]] }
 0xc90   : > { %s4880_s27 = sld [smem:[#allocation15_spill]] }
 0xc91   : > { %s4881_s3 = sld [smem:[#allocation16_spill]] }
 0xc92   : > { %s4882_s7 = sld [smem:[#allocation19_spill]] }
 0xc95   : > { %p40_p3 = scmp.ge.s32.totalorder %s4879_s28, 4  }
 0xc97   :  { %42 = sbr.rel (!%p40_p3) target bundleno = 19 (0x13), region = 180 }
 0xc9c   :  { %3047 = vsyncpa [#allocation9], 1 }
 0xc9d   :  { %3049 = vsyncpa [#allocation9 + $0x1], 1 }
 0xc9e   :  { %3050 = vsyncpa [#allocation11], 1 }
 0xc9f   :  { %3052 = vsyncpa [#allocation11 + $0x1], 1 }

</bundles_post_ra>
